<compile_context>
chip_gen: v5e
topology: v5e:2x2
jax: 0.10.0
libtpu: 0.0.40
codegen_flags: <defaults>
</compile_context>

<pallas_src>
import functools

import jax
import jax.numpy as jnp
import numpy as np
from jax import lax
from jax.experimental import pallas as pl
from jax.experimental.pallas import tpu as pltpu


# ----------------------------------------------------------------------------
# In-kernel AvgPool2d (count_include_pad=True) on a (H, W, C) VMEM value.
# Only static contiguous slices / adds / stacks — safe for Mosaic + interpret.
# ----------------------------------------------------------------------------
def _avg_pool_value(y, pk, ps, pp):
    H, W, C = y.shape
    if pp:
        zr = jnp.zeros((pp, W, C), y.dtype)
        y = jnp.concatenate([zr, y, zr], axis=0)
        zc = jnp.zeros((H + 2 * pp, pp, C), y.dtype)
        y = jnp.concatenate([zc, y, zc], axis=1)
    Hp, Wp = H + 2 * pp, W + 2 * pp
    OH = (Hp - pk) // ps + 1
    OW = (Wp - pk) // ps + 1
    # Sliding-window sum along W with full-width adds, then static subsample.
    Wv = Wp - pk + 1
    s = y[:, 0:Wv, :]
    for pw in range(1, pk):
        s = s + y[:, pw:pw + Wv, :]
    yw = jnp.stack([s[:, j * ps, :] for j in range(OW)], axis=1)  # (Hp, OW, C)
    # Sliding-window sum along H, then static subsample.
    Hv = Hp - pk + 1
    t = yw[0:Hv, :, :]
    for ph in range(1, pk):
        t = t + yw[ph:ph + Hv, :, :]
    pooled = jnp.stack([t[i * ps, :, :] for i in range(OH)], axis=0)
    return pooled * (1.0 / float(pk * pk))                        # (OH, OW, C)


# ----------------------------------------------------------------------------
# Fused conv + bias + ReLU + AvgPool kernel (stride=1, kernel = 2*pad+1).
# ----------------------------------------------------------------------------
def _conv_relu_pool_kernel(x_ref, w_ref, b_ref, o_ref, *, K, H, W, pad,
                           apply_relu, do_pool, pk, ps, pp):
    """x:(1, H*W, Cin) bf16   w:(K*K*Cin, Cout) bf16   b:(1, Cout) f32
       o:(1, OH*OW, Cout) out_dtype."""
    M = H * W
    cin = x_ref.shape[-1]
    E = pad * (W + 1)            # flat halo on each side of the flat image

    xv = x_ref[0]                                   # (M, Cin) bf16
    if pad:
        halo = jnp.zeros((E, cin), xv.dtype)
        xv = jnp.concatenate([halo, xv, halo], axis=0)   # (M + 2E, Cin)

    # Per-output-pixel column index, for cancelling horizontal wrap-around.
    col = lax.broadcasted_iota(jnp.int32, (M, 1), 0) % W

    # Flat-shift im2col, concatenated along the contraction dim (all in VMEM).
    taps = []
    for kh in range(K):
        for kw in range(K):
            t = xv[kh * W + kw: kh * W + kw + M, :]      # contiguous window
            shift = kw - pad
            if shift != 0:
                valid = (col + shift >= 0) & (col + shift < W)
                t = jnp.where(valid, t, jnp.zeros((), t.dtype))
            taps.append(t)
    patches = jnp.concatenate(taps, axis=-1)             # (M, K*K*Cin) bf16

    acc = jnp.dot(patches, w_ref[...], preferred_element_type=jnp.float32)
    acc = acc + b_ref[...]
    if apply_relu:
        acc = jnp.maximum(acc, 0.0)

    cout = acc.shape[-1]
    if do_pool:
        pooled = _avg_pool_value(acc.reshape(H, W, cout), pk, ps, pp)
        OH, OW = pooled.shape[0], pooled.shape[1]
        o_ref[0] = pooled.reshape(OH * OW, cout).astype(o_ref.dtype)
    else:
        o_ref[0] = acc.astype(o_ref.dtype)


def conv_relu_pool_pallas(x_nhwc, w_oihw, bias, padding, apply_relu,
                          do_pool, pk, ps, pp, out_dtype):
    """Fused layer for stride=1, kernel = 2*padding+1 ("same")."""
    N, H, W, Cin = x_nhwc.shape
    Cout, Cin_w, KH, KW = w_oihw.shape
    assert Cin == Cin_w and KH == KW and KH == 2 * padding + 1
    K = KH
    M = H * W
    if do_pool:
        OH = (H + 2 * pp - pk) // ps + 1
        OW = (W + 2 * pp - pk) // ps + 1
    else:
        OH, OW = H, W

    x_flat = x_nhwc.reshape(N, M, Cin).astype(jnp.bfloat16)
    # OIHW -> (KH, KW, Cin, Cout) -> (K*K*Cin, Cout), bf16 MXU operands.
    w_flat = jnp.transpose(w_oihw, (2, 3, 1, 0)).reshape(K * K * Cin, Cout)
    w_flat = w_flat.astype(jnp.bfloat16)
    b_mat = bias.reshape(1, Cout).astype(jnp.float32)

    kernel = functools.partial(
        _conv_relu_pool_kernel, K=K, H=H, W=W, pad=padding,
        apply_relu=apply_relu, do_pool=do_pool, pk=pk, ps=ps, pp=pp)

    flops = 2 * N * M * (K * K * Cin) * Cout
    if do_pool:
        flops += N * OH * OW * Cout * pk * pk
    out_bytes = N * OH * OW * Cout * jnp.dtype(out_dtype).itemsize
    bytes_accessed = (x_flat.size * 2 + w_flat.size * 2 + b_mat.size * 4
                      + out_bytes)

    out = pl.pallas_call(
        kernel,
        out_shape=jax.ShapeDtypeStruct((N, OH * OW, Cout), out_dtype),
        grid=(N,),
        in_specs=[
            pl.BlockSpec((1, M, Cin), lambda n: (n, 0, 0)),
            pl.BlockSpec((K * K * Cin, Cout), lambda n: (0, 0)),
            pl.BlockSpec((1, Cout), lambda n: (0, 0)),
        ],
        out_specs=pl.BlockSpec((1, OH * OW, Cout), lambda n: (n, 0, 0)),
        compiler_params=pltpu.CompilerParams(
            dimension_semantics=("parallel",),
            vmem_limit_bytes=32 * 1024 * 1024),
        cost_estimate=pl.CostEstimate(flops=int(flops), transcendentals=0,
                                      bytes_accessed=int(bytes_accessed)),
    )(x_flat, w_flat, b_mat)
    return out.reshape(N, OH, OW, Cout)


# ----------------------------------------------------------------------------
# Generic-geometry fallback (stride != 1 or kernel != 2*pad+1): im2col GEMM
# plus a standalone AvgPool kernel.  Not exercised by the demo geometry.
# ----------------------------------------------------------------------------
def _conv_gemm_kernel(p_ref, w_ref, b_ref, o_ref, *, apply_relu):
    acc = jnp.dot(p_ref[...], w_ref[...], preferred_element_type=jnp.float32)
    acc = acc + b_ref[...]
    if apply_relu:
        acc = jnp.maximum(acc, 0.0)
    o_ref[...] = acc.astype(o_ref.dtype)


def _conv2d_im2col_pallas(x_nhwc, w_oihw, bias, stride, padding, apply_relu,
                          tm=128):
    # TODO(synk): fallback still materialises im2col patches in HBM; only used
    # for geometries outside the fused fast path (not exercised in the demo).
    N, H, W, Cin = x_nhwc.shape
    Cout, Cin_w, KH, KW = w_oihw.shape
    assert Cin == Cin_w
    OH = (H + 2 * padding - KH) // stride + 1
    OW = (W + 2 * padding - KW) // stride + 1
    xp = jnp.pad(x_nhwc, ((0, 0), (padding, padding), (padding, padding), (0, 0)))
    cols = []
    for kh in range(KH):
        for kw in range(KW):
            cols.append(xp[:, kh:kh + stride * (OH - 1) + 1:stride,
                              kw:kw + stride * (OW - 1) + 1:stride, :])
    patches = jnp.stack(cols, axis=3)
    M = N * OH * OW
    Kd = KH * KW * Cin
    patches = patches.reshape(M, Kd).astype(jnp.bfloat16)
    w_mat = jnp.transpose(w_oihw, (2, 3, 1, 0)).reshape(Kd, Cout)
    w_mat = w_mat.astype(jnp.bfloat16)
    b_mat = bias.reshape(1, Cout).astype(jnp.float32)
    Mp = ((M + tm - 1) // tm) * tm
    if Mp != M:
        patches = jnp.pad(patches, ((0, Mp - M), (0, 0)))
    out = pl.pallas_call(
        functools.partial(_conv_gemm_kernel, apply_relu=apply_relu),
        out_shape=jax.ShapeDtypeStruct((Mp, Cout), jnp.float32),
        grid=(Mp // tm,),
        in_specs=[
            pl.BlockSpec((tm, Kd), lambda i: (i, 0)),
            pl.BlockSpec((Kd, Cout), lambda i: (0, 0)),
            pl.BlockSpec((1, Cout), lambda i: (0, 0)),
        ],
        out_specs=pl.BlockSpec((tm, Cout), lambda i: (i, 0)),
        compiler_params=pltpu.CompilerParams(dimension_semantics=("parallel",)),
    )(patches, w_mat, b_mat)
    return out[:M].reshape(N, OH, OW, Cout)


def _avgpool_kernel(x_ref, o_ref, *, pk, ps, pp):
    y = x_ref[0].astype(jnp.float32)              # (H, W, C)
    pooled = _avg_pool_value(y, pk, ps, pp)
    o_ref[0] = pooled.astype(o_ref.dtype)


def avgpool2d_pallas(x_nhwc, pk, ps, pp):
    N, H, W, C = x_nhwc.shape
    OH = (H + 2 * pp - pk) // ps + 1
    OW = (W + 2 * pp - pk) // ps + 1
    return pl.pallas_call(
        functools.partial(_avgpool_kernel, pk=pk, ps=ps, pp=pp),
        out_shape=jax.ShapeDtypeStruct((N, OH, OW, C), x_nhwc.dtype),
        grid=(N,),
        in_specs=[pl.BlockSpec((1, H, W, C), lambda n: (n, 0, 0, 0))],
        out_specs=pl.BlockSpec((1, OH, OW, C), lambda n: (n, 0, 0, 0)),
        compiler_params=pltpu.CompilerParams(dimension_semantics=("parallel",)),
    )(x_nhwc)


# ----------------------------------------------------------------------------
# Tokenizer module (Pallas-backed)
# ----------------------------------------------------------------------------
class TokenizerPallas:
    def __init__(self, kernel_sizes, stride, padding, pooling_kernel_size,
                 pooling_stride, pooling_padding, n_conv_layers,
                 n_input_channels, n_output_channels, in_planes,
                 activation, max_pool, conv_bias, key):
        self.stride = stride
        self.padding = padding
        self.pk = pooling_kernel_size
        self.ps = pooling_stride
        self.pp = pooling_padding
        self.max_pool = max_pool
        self.apply_relu = activation is not None  # CCT uses nn.ReLU
        n_filter_list = ([n_input_channels]
                         + [in_planes for _ in range(n_conv_layers - 1)]
                         + [n_output_channels])
        self.weights, self.biases = [], []
        for i in range(n_conv_layers):
            key, wk, bk = jax.random.split(key, 3)
            cin, cout, ks = n_filter_list[i], n_filter_list[i + 1], kernel_sizes[i]
            fan_in = cin * ks * ks
            w = jax.random.normal(wk, (cout, cin, ks, ks), jnp.float32) / np.sqrt(fan_in)
            b = (jax.random.normal(bk, (cout,), jnp.float32) * 0.01
                 if conv_bias else jnp.zeros((cout,), jnp.float32))
            self.weights.append(w)
            self.biases.append(b)

    def __call__(self, x_nchw):
        x = jnp.transpose(x_nchw, (0, 2, 3, 1))  # NCHW -> NHWC (once)
        n_layers = len(self.weights)
        for li, (w, b) in enumerate(zip(self.weights, self.biases)):
            is_last = li == n_layers - 1
            out_dtype = jnp.float32 if is_last else jnp.bfloat16
            ks = w.shape[2]
            if (self.stride == 1 and w.shape[2] == w.shape[3]
                    and ks == 2 * self.padding + 1):
                x = conv_relu_pool_pallas(
                    x, w, b, self.padding, self.apply_relu, self.max_pool,
                    self.pk, self.ps, self.pp, out_dtype)
            else:
                x = _conv2d_im2col_pallas(x, w, b, self.stride, self.padding,
                                          self.apply_relu)
                if self.max_pool:
                    x = avgpool2d_pallas(x, self.pk, self.ps, self.pp)
                x = x.astype(out_dtype)
        N, H, W, C = x.shape
        # flatten(2,3).transpose(-2,-1) on NCHW == reshape(N, H*W, C) on NHWC
        return x.reshape(N, H * W, C).astype(jnp.float32)

    # pure-JAX f32 reference for correctness checking
    def reference(self, x_nchw):
        x = jnp.transpose(x_nchw, (0, 2, 3, 1))
        for w, b in zip(self.weights, self.biases):
            wh = jnp.transpose(w, (2, 3, 1, 0))  # OIHW -> HWIO
            x = lax.conv_general_dilated(
                x, wh, (self.stride, self.stride),
                [(self.padding, self.padding)] * 2,
                dimension_numbers=("NHWC", "HWIO", "NHWC"))
            x = x + b
            if self.apply_relu:
                x = jnp.maximum(x, 0.0)
            if self.max_pool:
                s = lax.reduce_window(
                    x, 0.0, lax.add, (1, self.pk, self.pk, 1),
                    (1, self.ps, self.ps, 1),
                    [(0, 0), (self.pp, self.pp), (self.pp, self.pp), (0, 0)])
                x = s / float(self.pk * self.pk)
        N, H, W, C = x.shape
        return x.reshape(N, H * W, C)


if __name__ == "__main__":
    key = jax.random.PRNGKey(0)
    key, xk, pk_ = jax.random.split(key, 3)

    tokenizer = TokenizerPallas(
        kernel_sizes=[3, 3], stride=1, padding=1,
        pooling_kernel_size=3, pooling_stride=2, pooling_padding=1,
        n_conv_layers=2, n_input_channels=4, n_output_channels=32,
        in_planes=16, activation="relu", max_pool=True, conv_bias=False,
        key=pk_)

    x = jax.random.normal(xk, (2, 4, 16, 16), jnp.float32)  # NCHW like PyTorch

    out = jax.block_until_ready(tokenizer(x))
    ref = jax.block_until_ready(tokenizer.reference(x))
    assert out.shape == (2, 16, 32), out.shape
    # bf16 MXU operands + bf16 intermediate activations (f32 accumulation)
    # -> loosened tolerance vs the f32 reference.
    np.testing.assert_allclose(np.asarray(out), np.asarray(ref),
                               rtol=3e-2, atol=3e-2)
    print("KERNEL_OK")
</pallas_src>

<mosaic_0001>
module attributes {stable_mosaic.version = 11 : i64} {
  func.func @_conv_relu_pool_kernel(%arg0: i32, %arg1: memref<1x256x4xbf16, #tpu.memory_space<vmem>>, %arg2: memref<36x16xbf16, #tpu.memory_space<vmem>>, %arg3: memref<1x16xf32, #tpu.memory_space<vmem>>, %arg4: memref<1x64x16xbf16, #tpu.memory_space<vmem>>) attributes {dimension_semantics = [#tpu.dimension_semantics<parallel>], iteration_bounds = array<i64: 2>, scalar_prefetch = 0 : i64, scratch_operands = 0 : i64, tpu.core_type = #tpu.core_type<tc>, window_params = [{transform_indices = @transform_0, window_bounds = array<i64: 1, 256, 4>}, {pipeline_mode = #tpu.pipeline_mode<synchronous>, transform_indices = @transform_1, window_bounds = array<i64: 36, 16>}, {pipeline_mode = #tpu.pipeline_mode<synchronous>, transform_indices = @transform_2, window_bounds = array<i64: 1, 16>}, {transform_indices = @transform_3, window_bounds = array<i64: 1, 64, 16>}]} {
    %c0 = arith.constant 0 : index
    %c0_0 = arith.constant 0 : index
    %c0_1 = arith.constant 0 : index
    %0 = vector.load %arg1[%c0, %c0_0, %c0_1] : memref<1x256x4xbf16, #tpu.memory_space<vmem>>, vector<1x256x4xbf16>
    %1 = vector.shape_cast %0 : vector<1x256x4xbf16> to vector<256x4xbf16>
    %cst = arith.constant 0.000000e+00 : bf16
    %2 = vector.broadcast %cst : bf16 to vector<17x4xbf16>
    %3 = tpu.concatenate %2, %1, %2 in 0 : vector<17x4xbf16>, vector<256x4xbf16>, vector<17x4xbf16> -> vector<290x4xbf16>
    %4 = tpu.iota {dimensions = array<i32: 0>} : vector<256x1xi32>
    %c16_i32 = arith.constant 16 : i32
    %c0_i32 = arith.constant 0 : i32
    %5 = arith.cmpi eq, %c16_i32, %c0_i32 : i32
    %c1_i32 = arith.constant 1 : i32
    %6 = arith.select %5, %c1_i32, %c16_i32 : i32
    %7 = vector.broadcast %6 : i32 to vector<256x1xi32>
    %8 = arith.remsi %4, %7 : vector<256x1xi32>
    %c0_i32_2 = arith.constant 0 : i32
    %9 = vector.broadcast %c0_i32_2 : i32 to vector<256x1xi32>
    %10 = arith.cmpi ne, %8, %9 : vector<256x1xi32>
    %c0_i32_3 = arith.constant 0 : i32
    %11 = vector.broadcast %c0_i32_3 : i32 to vector<256x1xi32>
    %12 = arith.cmpi slt, %8, %11 : vector<256x1xi32>
    %c0_i32_4 = arith.constant 0 : i32
    %13 = arith.cmpi slt, %6, %c0_i32_4 : i32
    %14 = vector.broadcast %13 : i1 to vector<256x1xi1>
    %15 = vector.broadcast %14 : vector<256x1xi1> to vector<256x1xi1>
    %16 = arith.xori %12, %15 : vector<256x1xi1>
    %17 = arith.andi %16, %10 : vector<256x1xi1>
    %18 = vector.broadcast %6 : i32 to vector<256x1xi32>
    %19 = arith.addi %8, %18 : vector<256x1xi32>
    %20 = arith.select %17, %19, %8 : vector<256x1xi1>, vector<256x1xi32>
    %21 = vector.extract_strided_slice %3 {offsets = [0, 0], sizes = [256, 4], strides = [1, 1]} : vector<290x4xbf16> to vector<256x4xbf16>
    %c-1_i32 = arith.constant -1 : i32
    %22 = vector.broadcast %c-1_i32 : i32 to vector<256x1xi32>
    %23 = arith.addi %20, %22 : vector<256x1xi32>
    %c0_i32_5 = arith.constant 0 : i32
    %24 = vector.broadcast %c0_i32_5 : i32 to vector<256x1xi32>
    %25 = arith.cmpi sge, %23, %24 : vector<256x1xi32>
    %c-1_i32_6 = arith.constant -1 : i32
    %26 = vector.broadcast %c-1_i32_6 : i32 to vector<256x1xi32>
    %27 = arith.addi %20, %26 : vector<256x1xi32>
    %c16_i32_7 = arith.constant 16 : i32
    %28 = vector.broadcast %c16_i32_7 : i32 to vector<256x1xi32>
    %29 = arith.cmpi slt, %27, %28 : vector<256x1xi32>
    %30 = arith.andi %25, %29 : vector<256x1xi1>
    %cst_8 = arith.constant 0.000000e+00 : bf16
    %31 = vector.shape_cast %30 : vector<256x1xi1> to vector<256x1xi1>
    %32 = vector.broadcast %31 : vector<256x1xi1> to vector<256x4xi1>
    %33 = vector.broadcast %cst_8 : bf16 to vector<256x4xbf16>
    %34 = arith.select %32, %21, %33 : vector<256x4xi1>, vector<256x4xbf16>
    %35 = vector.extract_strided_slice %3 {offsets = [1, 0], sizes = [256, 4], strides = [1, 1]} : vector<290x4xbf16> to vector<256x4xbf16>
    %36 = vector.extract_strided_slice %3 {offsets = [2, 0], sizes = [256, 4], strides = [1, 1]} : vector<290x4xbf16> to vector<256x4xbf16>
    %c1_i32_9 = arith.constant 1 : i32
    %37 = vector.broadcast %c1_i32_9 : i32 to vector<256x1xi32>
    %38 = arith.addi %20, %37 : vector<256x1xi32>
    %c0_i32_10 = arith.constant 0 : i32
    %39 = vector.broadcast %c0_i32_10 : i32 to vector<256x1xi32>
    %40 = arith.cmpi sge, %38, %39 : vector<256x1xi32>
    %c1_i32_11 = arith.constant 1 : i32
    %41 = vector.broadcast %c1_i32_11 : i32 to vector<256x1xi32>
    %42 = arith.addi %20, %41 : vector<256x1xi32>
    %c16_i32_12 = arith.constant 16 : i32
    %43 = vector.broadcast %c16_i32_12 : i32 to vector<256x1xi32>
    %44 = arith.cmpi slt, %42, %43 : vector<256x1xi32>
    %45 = arith.andi %40, %44 : vector<256x1xi1>
    %cst_13 = arith.constant 0.000000e+00 : bf16
    %46 = vector.shape_cast %45 : vector<256x1xi1> to vector<256x1xi1>
    %47 = vector.broadcast %46 : vector<256x1xi1> to vector<256x4xi1>
    %48 = vector.broadcast %cst_13 : bf16 to vector<256x4xbf16>
    %49 = arith.select %47, %36, %48 : vector<256x4xi1>, vector<256x4xbf16>
    %50 = vector.extract_strided_slice %3 {offsets = [16, 0], sizes = [256, 4], strides = [1, 1]} : vector<290x4xbf16> to vector<256x4xbf16>
    %c-1_i32_14 = arith.constant -1 : i32
    %51 = vector.broadcast %c-1_i32_14 : i32 to vector<256x1xi32>
    %52 = arith.addi %20, %51 : vector<256x1xi32>
    %c0_i32_15 = arith.constant 0 : i32
    %53 = vector.broadcast %c0_i32_15 : i32 to vector<256x1xi32>
    %54 = arith.cmpi sge, %52, %53 : vector<256x1xi32>
    %c-1_i32_16 = arith.constant -1 : i32
    %55 = vector.broadcast %c-1_i32_16 : i32 to vector<256x1xi32>
    %56 = arith.addi %20, %55 : vector<256x1xi32>
    %c16_i32_17 = arith.constant 16 : i32
    %57 = vector.broadcast %c16_i32_17 : i32 to vector<256x1xi32>
    %58 = arith.cmpi slt, %56, %57 : vector<256x1xi32>
    %59 = arith.andi %54, %58 : vector<256x1xi1>
    %cst_18 = arith.constant 0.000000e+00 : bf16
    %60 = vector.shape_cast %59 : vector<256x1xi1> to vector<256x1xi1>
    %61 = vector.broadcast %60 : vector<256x1xi1> to vector<256x4xi1>
    %62 = vector.broadcast %cst_18 : bf16 to vector<256x4xbf16>
    %63 = arith.select %61, %50, %62 : vector<256x4xi1>, vector<256x4xbf16>
    %64 = vector.extract_strided_slice %3 {offsets = [17, 0], sizes = [256, 4], strides = [1, 1]} : vector<290x4xbf16> to vector<256x4xbf16>
    %65 = vector.extract_strided_slice %3 {offsets = [18, 0], sizes = [256, 4], strides = [1, 1]} : vector<290x4xbf16> to vector<256x4xbf16>
    %c1_i32_19 = arith.constant 1 : i32
    %66 = vector.broadcast %c1_i32_19 : i32 to vector<256x1xi32>
    %67 = arith.addi %20, %66 : vector<256x1xi32>
    %c0_i32_20 = arith.constant 0 : i32
    %68 = vector.broadcast %c0_i32_20 : i32 to vector<256x1xi32>
    %69 = arith.cmpi sge, %67, %68 : vector<256x1xi32>
    %c1_i32_21 = arith.constant 1 : i32
    %70 = vector.broadcast %c1_i32_21 : i32 to vector<256x1xi32>
    %71 = arith.addi %20, %70 : vector<256x1xi32>
    %c16_i32_22 = arith.constant 16 : i32
    %72 = vector.broadcast %c16_i32_22 : i32 to vector<256x1xi32>
    %73 = arith.cmpi slt, %71, %72 : vector<256x1xi32>
    %74 = arith.andi %69, %73 : vector<256x1xi1>
    %cst_23 = arith.constant 0.000000e+00 : bf16
    %75 = vector.shape_cast %74 : vector<256x1xi1> to vector<256x1xi1>
    %76 = vector.broadcast %75 : vector<256x1xi1> to vector<256x4xi1>
    %77 = vector.broadcast %cst_23 : bf16 to vector<256x4xbf16>
    %78 = arith.select %76, %65, %77 : vector<256x4xi1>, vector<256x4xbf16>
    %79 = vector.extract_strided_slice %3 {offsets = [32, 0], sizes = [256, 4], strides = [1, 1]} : vector<290x4xbf16> to vector<256x4xbf16>
    %c-1_i32_24 = arith.constant -1 : i32
    %80 = vector.broadcast %c-1_i32_24 : i32 to vector<256x1xi32>
    %81 = arith.addi %20, %80 : vector<256x1xi32>
    %c0_i32_25 = arith.constant 0 : i32
    %82 = vector.broadcast %c0_i32_25 : i32 to vector<256x1xi32>
    %83 = arith.cmpi sge, %81, %82 : vector<256x1xi32>
    %c-1_i32_26 = arith.constant -1 : i32
    %84 = vector.broadcast %c-1_i32_26 : i32 to vector<256x1xi32>
    %85 = arith.addi %20, %84 : vector<256x1xi32>
    %c16_i32_27 = arith.constant 16 : i32
    %86 = vector.broadcast %c16_i32_27 : i32 to vector<256x1xi32>
    %87 = arith.cmpi slt, %85, %86 : vector<256x1xi32>
    %88 = arith.andi %83, %87 : vector<256x1xi1>
    %cst_28 = arith.constant 0.000000e+00 : bf16
    %89 = vector.shape_cast %88 : vector<256x1xi1> to vector<256x1xi1>
    %90 = vector.broadcast %89 : vector<256x1xi1> to vector<256x4xi1>
    %91 = vector.broadcast %cst_28 : bf16 to vector<256x4xbf16>
    %92 = arith.select %90, %79, %91 : vector<256x4xi1>, vector<256x4xbf16>
    %93 = vector.extract_strided_slice %3 {offsets = [33, 0], sizes = [256, 4], strides = [1, 1]} : vector<290x4xbf16> to vector<256x4xbf16>
    %94 = vector.extract_strided_slice %3 {offsets = [34, 0], sizes = [256, 4], strides = [1, 1]} : vector<290x4xbf16> to vector<256x4xbf16>
    %c1_i32_29 = arith.constant 1 : i32
    %95 = vector.broadcast %c1_i32_29 : i32 to vector<256x1xi32>
    %96 = arith.addi %20, %95 : vector<256x1xi32>
    %c0_i32_30 = arith.constant 0 : i32
    %97 = vector.broadcast %c0_i32_30 : i32 to vector<256x1xi32>
    %98 = arith.cmpi sge, %96, %97 : vector<256x1xi32>
    %c1_i32_31 = arith.constant 1 : i32
    %99 = vector.broadcast %c1_i32_31 : i32 to vector<256x1xi32>
    %100 = arith.addi %20, %99 : vector<256x1xi32>
    %c16_i32_32 = arith.constant 16 : i32
    %101 = vector.broadcast %c16_i32_32 : i32 to vector<256x1xi32>
    %102 = arith.cmpi slt, %100, %101 : vector<256x1xi32>
    %103 = arith.andi %98, %102 : vector<256x1xi1>
    %cst_33 = arith.constant 0.000000e+00 : bf16
    %104 = vector.shape_cast %103 : vector<256x1xi1> to vector<256x1xi1>
    %105 = vector.broadcast %104 : vector<256x1xi1> to vector<256x4xi1>
    %106 = vector.broadcast %cst_33 : bf16 to vector<256x4xbf16>
    %107 = arith.select %105, %94, %106 : vector<256x4xi1>, vector<256x4xbf16>
    %108 = tpu.concatenate %34, %35, %49, %63, %64, %78, %92, %93, %107 in 1 : vector<256x4xbf16>, vector<256x4xbf16>, vector<256x4xbf16>, vector<256x4xbf16>, vector<256x4xbf16>, vector<256x4xbf16>, vector<256x4xbf16>, vector<256x4xbf16>, vector<256x4xbf16> -> vector<256x36xbf16>
    %c0_34 = arith.constant 0 : index
    %c0_35 = arith.constant 0 : index
    %109 = vector.load %arg2[%c0_34, %c0_35] : memref<36x16xbf16, #tpu.memory_space<vmem>>, vector<36x16xbf16>
    %cst_36 = arith.constant dense<0.000000e+00> : vector<256x16xf32>
    %110 = tpu.matmul %108, %109, %cst_36 {dimension_numbers = #tpu.dot_dimension_numbers<[1], [0], [0], [1], [0, 0, 1, 1], [], []>} : vector<256x36xbf16>, vector<36x16xbf16>, vector<256x16xf32> -> vector<256x16xf32>
    %c0_37 = arith.constant 0 : index
    %c0_38 = arith.constant 0 : index
    %111 = vector.load %arg3[%c0_37, %c0_38] : memref<1x16xf32, #tpu.memory_space<vmem>>, vector<1x16xf32>
    %112 = vector.broadcast %111 : vector<1x16xf32> to vector<256x16xf32>
    %113 = arith.addf %110, %112 : vector<256x16xf32>
    %cst_39 = arith.constant 0.000000e+00 : f32
    %114 = vector.broadcast %cst_39 : f32 to vector<256x16xf32>
    %115 = arith.maximumf %113, %114 : vector<256x16xf32>
    %116 = vector.shape_cast %115 : vector<256x16xf32> to vector<16x16x16xf32>
    %cst_40 = arith.constant 0.000000e+00 : f32
    %117 = vector.broadcast %cst_40 : f32 to vector<1x16x16xf32>
    %118 = tpu.concatenate %117, %116, %117 in 0 : vector<1x16x16xf32>, vector<16x16x16xf32>, vector<1x16x16xf32> -> vector<18x16x16xf32>
    %cst_41 = arith.constant 0.000000e+00 : f32
    %119 = vector.broadcast %cst_41 : f32 to vector<18x1x16xf32>
    %120 = tpu.concatenate %119, %118, %119 in 1 : vector<18x1x16xf32>, vector<18x16x16xf32>, vector<18x1x16xf32> -> vector<18x18x16xf32>
    %121 = vector.extract_strided_slice %120 {offsets = [0, 0, 0], sizes = [18, 16, 16], strides = [1, 1, 1]} : vector<18x18x16xf32> to vector<18x16x16xf32>
    %122 = vector.extract_strided_slice %120 {offsets = [0, 1, 0], sizes = [18, 16, 16], strides = [1, 1, 1]} : vector<18x18x16xf32> to vector<18x16x16xf32>
    %123 = arith.addf %121, %122 : vector<18x16x16xf32>
    %124 = vector.extract_strided_slice %120 {offsets = [0, 2, 0], sizes = [18, 16, 16], strides = [1, 1, 1]} : vector<18x18x16xf32> to vector<18x16x16xf32>
    %125 = arith.addf %123, %124 : vector<18x16x16xf32>
    %126 = vector.extract_strided_slice %125 {offsets = [0, 0, 0], sizes = [18, 1, 16], strides = [1, 1, 1]} : vector<18x16x16xf32> to vector<18x1x16xf32>
    %127 = vector.shape_cast %126 : vector<18x1x16xf32> to vector<18x16xf32>
    %128 = vector.extract_strided_slice %125 {offsets = [0, 2, 0], sizes = [18, 1, 16], strides = [1, 1, 1]} : vector<18x16x16xf32> to vector<18x1x16xf32>
    %129 = vector.shape_cast %128 : vector<18x1x16xf32> to vector<18x16xf32>
    %130 = vector.extract_strided_slice %125 {offsets = [0, 4, 0], sizes = [18, 1, 16], strides = [1, 1, 1]} : vector<18x16x16xf32> to vector<18x1x16xf32>
    %131 = vector.shape_cast %130 : vector<18x1x16xf32> to vector<18x16xf32>
    %132 = vector.extract_strided_slice %125 {offsets = [0, 6, 0], sizes = [18, 1, 16], strides = [1, 1, 1]} : vector<18x16x16xf32> to vector<18x1x16xf32>
    %133 = vector.shape_cast %132 : vector<18x1x16xf32> to vector<18x16xf32>
    %134 = vector.extract_strided_slice %125 {offsets = [0, 8, 0], sizes = [18, 1, 16], strides = [1, 1, 1]} : vector<18x16x16xf32> to vector<18x1x16xf32>
    %135 = vector.shape_cast %134 : vector<18x1x16xf32> to vector<18x16xf32>
    %136 = vector.extract_strided_slice %125 {offsets = [0, 10, 0], sizes = [18, 1, 16], strides = [1, 1, 1]} : vector<18x16x16xf32> to vector<18x1x16xf32>
    %137 = vector.shape_cast %136 : vector<18x1x16xf32> to vector<18x16xf32>
    %138 = vector.extract_strided_slice %125 {offsets = [0, 12, 0], sizes = [18, 1, 16], strides = [1, 1, 1]} : vector<18x16x16xf32> to vector<18x1x16xf32>
    %139 = vector.shape_cast %138 : vector<18x1x16xf32> to vector<18x16xf32>
    %140 = vector.extract_strided_slice %125 {offsets = [0, 14, 0], sizes = [18, 1, 16], strides = [1, 1, 1]} : vector<18x16x16xf32> to vector<18x1x16xf32>
    %141 = vector.shape_cast %140 : vector<18x1x16xf32> to vector<18x16xf32>
    %142 = vector.shape_cast %127 : vector<18x16xf32> to vector<18x1x16xf32>
    %143 = vector.shape_cast %129 : vector<18x16xf32> to vector<18x1x16xf32>
    %144 = vector.shape_cast %131 : vector<18x16xf32> to vector<18x1x16xf32>
    %145 = vector.shape_cast %133 : vector<18x16xf32> to vector<18x1x16xf32>
    %146 = vector.shape_cast %135 : vector<18x16xf32> to vector<18x1x16xf32>
    %147 = vector.shape_cast %137 : vector<18x16xf32> to vector<18x1x16xf32>
    %148 = vector.shape_cast %139 : vector<18x16xf32> to vector<18x1x16xf32>
    %149 = vector.shape_cast %141 : vector<18x16xf32> to vector<18x1x16xf32>
    %150 = tpu.concatenate %142, %143, %144, %145, %146, %147, %148, %149 in 1 : vector<18x1x16xf32>, vector<18x1x16xf32>, vector<18x1x16xf32>, vector<18x1x16xf32>, vector<18x1x16xf32>, vector<18x1x16xf32>, vector<18x1x16xf32>, vector<18x1x16xf32> -> vector<18x8x16xf32>
    %151 = vector.extract_strided_slice %150 {offsets = [0, 0, 0], sizes = [16, 8, 16], strides = [1, 1, 1]} : vector<18x8x16xf32> to vector<16x8x16xf32>
    %152 = vector.extract_strided_slice %150 {offsets = [1, 0, 0], sizes = [16, 8, 16], strides = [1, 1, 1]} : vector<18x8x16xf32> to vector<16x8x16xf32>
    %153 = arith.addf %151, %152 : vector<16x8x16xf32>
    %154 = vector.extract_strided_slice %150 {offsets = [2, 0, 0], sizes = [16, 8, 16], strides = [1, 1, 1]} : vector<18x8x16xf32> to vector<16x8x16xf32>
    %155 = arith.addf %153, %154 : vector<16x8x16xf32>
    %156 = vector.extract_strided_slice %155 {offsets = [0, 0, 0], sizes = [1, 8, 16], strides = [1, 1, 1]} : vector<16x8x16xf32> to vector<1x8x16xf32>
    %157 = vector.shape_cast %156 : vector<1x8x16xf32> to vector<8x16xf32>
    %158 = vector.extract_strided_slice %155 {offsets = [2, 0, 0], sizes = [1, 8, 16], strides = [1, 1, 1]} : vector<16x8x16xf32> to vector<1x8x16xf32>
    %159 = vector.shape_cast %158 : vector<1x8x16xf32> to vector<8x16xf32>
    %160 = vector.extract_strided_slice %155 {offsets = [4, 0, 0], sizes = [1, 8, 16], strides = [1, 1, 1]} : vector<16x8x16xf32> to vector<1x8x16xf32>
    %161 = vector.shape_cast %160 : vector<1x8x16xf32> to vector<8x16xf32>
    %162 = vector.extract_strided_slice %155 {offsets = [6, 0, 0], sizes = [1, 8, 16], strides = [1, 1, 1]} : vector<16x8x16xf32> to vector<1x8x16xf32>
    %163 = vector.shape_cast %162 : vector<1x8x16xf32> to vector<8x16xf32>
    %164 = vector.extract_strided_slice %155 {offsets = [8, 0, 0], sizes = [1, 8, 16], strides = [1, 1, 1]} : vector<16x8x16xf32> to vector<1x8x16xf32>
    %165 = vector.shape_cast %164 : vector<1x8x16xf32> to vector<8x16xf32>
    %166 = vector.extract_strided_slice %155 {offsets = [10, 0, 0], sizes = [1, 8, 16], strides = [1, 1, 1]} : vector<16x8x16xf32> to vector<1x8x16xf32>
    %167 = vector.shape_cast %166 : vector<1x8x16xf32> to vector<8x16xf32>
    %168 = vector.extract_strided_slice %155 {offsets = [12, 0, 0], sizes = [1, 8, 16], strides = [1, 1, 1]} : vector<16x8x16xf32> to vector<1x8x16xf32>
    %169 = vector.shape_cast %168 : vector<1x8x16xf32> to vector<8x16xf32>
    %170 = vector.extract_strided_slice %155 {offsets = [14, 0, 0], sizes = [1, 8, 16], strides = [1, 1, 1]} : vector<16x8x16xf32> to vector<1x8x16xf32>
    %171 = vector.shape_cast %170 : vector<1x8x16xf32> to vector<8x16xf32>
    %172 = vector.shape_cast %157 : vector<8x16xf32> to vector<1x8x16xf32>
    %173 = vector.shape_cast %159 : vector<8x16xf32> to vector<1x8x16xf32>
    %174 = vector.shape_cast %161 : vector<8x16xf32> to vector<1x8x16xf32>
    %175 = vector.shape_cast %163 : vector<8x16xf32> to vector<1x8x16xf32>
    %176 = vector.shape_cast %165 : vector<8x16xf32> to vector<1x8x16xf32>
    %177 = vector.shape_cast %167 : vector<8x16xf32> to vector<1x8x16xf32>
    %178 = vector.shape_cast %169 : vector<8x16xf32> to vector<1x8x16xf32>
    %179 = vector.shape_cast %171 : vector<8x16xf32> to vector<1x8x16xf32>
    %180 = tpu.concatenate %172, %173, %174, %175, %176, %177, %178, %179 in 0 : vector<1x8x16xf32>, vector<1x8x16xf32>, vector<1x8x16xf32>, vector<1x8x16xf32>, vector<1x8x16xf32>, vector<1x8x16xf32>, vector<1x8x16xf32>, vector<1x8x16xf32> -> vector<8x8x16xf32>
    %cst_42 = arith.constant 0.111111112 : f32
    %181 = vector.broadcast %cst_42 : f32 to vector<8x8x16xf32>
    %182 = arith.mulf %180, %181 : vector<8x8x16xf32>
    %183 = vector.shape_cast %182 : vector<8x8x16xf32> to vector<64x16xf32>
    %184 = arith.truncf %183 : vector<64x16xf32> to vector<64x16xbf16>
    %c0_43 = arith.constant 0 : index
    %c0_44 = arith.constant 0 : index
    %c0_45 = arith.constant 0 : index
    %185 = vector.load %arg4[%c0_43, %c0_44, %c0_45] : memref<1x64x16xbf16, #tpu.memory_space<vmem>>, vector<1x64x16xbf16>
    %186 = vector.shape_cast %185 : vector<1x64x16xbf16> to vector<64x16xbf16>
    %187 = vector.shape_cast %184 : vector<64x16xbf16> to vector<1x64x16xbf16>
    tpu.vector_store %arg4[%c0_43, %c0_44, %c0_45], %187 {strides = array<i32>} : memref<1x64x16xbf16, #tpu.memory_space<vmem>>, vector<1x64x16xbf16>,
    return
  }
  func.func @transform_0(%arg0: i32) -> (i32, i32, i32) {
    %c0_i32 = arith.constant 0 : i32
    %c0_i32_0 = arith.constant 0 : i32
    %c0_i32_1 = arith.constant 0 : i32
    return %arg0, %c0_i32, %c0_i32_0 : i32, i32, i32
  }
  func.func @transform_1(%arg0: i32) -> (i32, i32) {
    %c0_i32 = arith.constant 0 : i32
    %c0_i32_0 = arith.constant 0 : i32
    %c0_i32_1 = arith.constant 0 : i32
    return %c0_i32, %c0_i32_0 : i32, i32
  }
  func.func @transform_2(%arg0: i32) -> (i32, i32) {
    %c0_i32 = arith.constant 0 : i32
    %c0_i32_0 = arith.constant 0 : i32
    %c0_i32_1 = arith.constant 0 : i32
    return %c0_i32, %c0_i32_0 : i32, i32
  }
  func.func @transform_3(%arg0: i32) -> (i32, i32, i32) {
    %c0_i32 = arith.constant 0 : i32
    %c0_i32_0 = arith.constant 0 : i32
    %c0_i32_1 = arith.constant 0 : i32
    return %arg0, %c0_i32, %c0_i32_0 : i32, i32, i32
  }
}

</mosaic_0001>

<bundles_post_ra>
// kernel: tpu_custom_call.1
= control target key start
LH: loop header
LB: loop body
LE: loop exit
PB: predicated region body
PF: predicated region fallthrough
CT: control target
= control target key end

     0   :  { %s4081_s12 = smov 0   ;;  %s6078_s0 = inlined_call_operand.vmem [shape: bf16[2,256,4], index: 0, kind: input, shape index: {}]   ;;  %s6079_s1 = inlined_call_operand.vmem [shape: bf16[36,16], index: 1, kind: input, shape index: {}]   ;;  %s6080_s2 = inlined_call_operand.vmem [shape: f32[1,16], index: 2, kind: input, shape index: {}]   ;;  %s6081_s3 = inlined_call_operand.vmem [shape: bf16[2,64,16], index: 3, kind: output, shape index: {}]  }
   0x1 LB: > { %s3861_s13 = sadd.s32 4294967295, %s4048_s12   ;;  %p3865_p0 = scmp.ge.s32.totalorder %s4048_s12, 1  ;;  %s4048_s12 = sphi %s4081_s12, %s13_s12  }
   0x2   : > { %p137_p1 = scmp.lt.s32.totalorder %s4048_s12, 3 }
   0x4   : > { %p138_p2 = pnand %p3865_p0, %p137_p1 }
   0x6   : > { %141 = sbr.rel (%p138_p2) target bundleno = 681 (0x2a9), region = 32 }
   0xb   : > { %p161_p3 = scmp.lt.s32.totalorder %s3861_s13, 1  ;;  %v435_v0 = vlaneseq  ;;  %vm286_vm0 = vsmask.f32 256  ;;  %vm6095_vm1 = vcmask 1040384   ;;  %v6086_v5 = vmov 0   ;;  %s4051_s18 = smov 4  }
   0xc   : > { %v4103_v6 = vrot.slane %v6086_v5, 1  ;;  %vm6093_vm2 = vsmask.f32 7424  ;;  %vm4117_vm3 = vmand %vm6095_vm1, %vm286_vm0  ;;  %v6185_v25 = vmov 0  ;;  %vm4052_vm4 = vmmov 1   ;;  %s4053_s19 = smov 8  }
   0xd   : > { %s6536_s13 = smov (!%p161_p3, %s3861_s13), 1  ;;  %v4097_v1 = vshrl.u32 %v435_v0, 7  ;;  %v6186_v25 = vsel %vm4117_vm3, 4294967295, %v6185_v25  ;;  %vm1045_vm5 = vmpackc.low %vm4052_vm4, %vm4052_vm4  ;;  %vm6094_vm13 = vcmask 1046528   ;;  %s4054_s20 = smov 12  }
   0xe   : > { %s3992_s14 = sshll.u32 %s6536_s13, 7  ;;  %6184 = vst [vmem:[#allocation2_spill] sm:$0xff] %v4103_v6  ;;  %s4055_s21 = smov 16  }
   0xf   : > { %s4095_s17 = scalar_lea.vmem %s6078_s0, %s3992_s14  ;;  %v4109_v10 = vadd.s32 8, %v4097_v1  ;;  %v4112_v11 = vadd.s32 24, %v4097_v1  ;;  %6187 = vst [vmem:[#allocation3_spill] sm:$0xff] %v6186_v25  ;;  %s4056_s22 = smov 20  }
  0x10   : > { %v3994_v2 = vld [vmem:[%s4095_s17] sm:$0xff]  ;;  %v3995_v3 = vld [vmem:[%s4095_s17 + $0x8] sm:$0xff]  ;;  %v3996_v4 = vld [vmem:[%s4095_s17 + $0x10] sm:$0xff]  ;;  %s4057_s23 = smov 24   ;;  %s4058_s24 = smov 28  }
  0x11   : > { %v3997_v7 = vld [vmem:[%s4095_s17 + $0x18] sm:$0xff]  ;;  %v3998_v8 = vld [vmem:[%s4095_s17 + $0x20] sm:$0xff]  ;;  %v3999_v9 = vld [vmem:[%s4095_s17 + $0x28] sm:$0xff]  ;;  %v288_v12 = vshrl.u32 %v3994_v2, 16  ;;  %v291_v13 = vshll.u32 %v3994_v2, 16  ;;  %v295_v14 = vshrl.u32 %v3995_v3, 16 }
  0x12   : > { %v298_v15 = vshll.u32 %v3995_v3, 16  ;;  %v4000_v16 = vld [vmem:[%s4095_s17 + $0x30] sm:$0xff]  ;;  %v303_v17 = vshrl.u32 %v3996_v4, 16  ;;  %v311_v18 = vshrl.u32 %v3997_v7, 16  ;;  %v314_v19 = vshll.u32 %v3997_v7, 16  ;;  %v4001_v62 = vld [vmem:[%s4095_s17 + $0x38] sm:$0xff] }
  0x13   : > { %v319_v20 = vshrl.u32 %v3998_v8, 16  ;;  %v290_v21 = vrot.slane %v288_v12, 7  ;;  %v297_v22 = vrot.slane %v295_v14, 7  ;;  %v322_v23 = vshll.u32 %v3998_v8, 16  ;;  %s4059_s25 = smov 32   ;;  %s3993_s7 = sshll.u32 %s6536_s13, 5 }
  0x14   : > { %v306_v24 = vshll.u32 %v3996_v4, 16  ;;  %v305_v26 = vrot.slane %v303_v17, 7  ;;  %v313_v27 = vrot.slane %v311_v18, 7  ;;  %v327_v29 = vshrl.u32 %v3999_v9, 16  ;;  %v4002_v4 = vld [vmem:[%s4095_s17 + $0x40] sm:$0xff]  ;;  %v4003_v17 = vld [vmem:[%s4095_s17 + $0x48] sm:$0xff]  ;;  %s5721_s10 = scalar_lea.vmem %s6081_s3, %s3993_s7 }
  0x15   : > { %v321_v28 = vrot.slane %v319_v20, 7  ;;  %v293_v30 = vor.u32 %v291_v13, %v290_v21  ;;  %v300_v31 = vor.u32 %v298_v15, %v297_v22  ;;  %v330_v32 = vshll.u32 %v3999_v9, 16 }
  0x16   : > { %v335_v33 = vshrl.u32 %v4000_v16, 16  ;;  %v316_v34 = vor.u32 %v314_v19, %v313_v27  ;;  %v308_v36 = vor.u32 %v306_v24, %v305_v26  ;;  %v329_v37 = vrot.slane %v327_v29, 7 }
  0x17   : > { %v324_v35 = vor.u32 %v322_v23, %v321_v28  ;;  %v4122_v38 = vsel %vm286_vm0, %v290_v21, %v300_v31  ;;  %v4126_v39 = vsel %vm4117_vm3, 0, %v293_v30  ;;  %v338_v41 = vshll.u32 %v4000_v16, 16  ;;  %v4005_v23 = vld [vmem:[%s4095_s17 + $0x58] sm:$0xff] }
  0x18   : > { %v4128_v40 = vrot.slane %v335_v33, 7  ;;  %v1827_v42 = vshll.u32 %v4126_v39, 16  ;;  %v4132_v43 = vsel %vm286_vm0, %v305_v26, %v316_v34  ;;  %v4138_v45 = vsel %vm286_vm0, %v297_v22, %v308_v36  ;;  %v4004_v22 = vld [vmem:[%s4095_s17 + $0x50] sm:$0xff] }
  0x19   : > { %6188 = vst [vmem:[#allocation4_spill] sm:$0xff] %v4132_v43  ;;  %v4135_v44 = vsel %vm286_vm0, %v313_v27, %v324_v35  ;;  %v1851_v46 = vshll.u32 %v4132_v43, 16  ;;  %v1855_v47 = vshrl.u32 %v4132_v43, 16  ;;  %v1835_v49 = vshll.u32 %v4122_v38, 16 }
  0x1a   : > { %v1859_v48 = vshll.u32 %v4135_v44, 16  ;;  %v1829_v50 = vrot.slane %v1827_v42, 1  ;;  %v1839_v51 = vshrl.u32 %v4122_v38, 16  ;;  %v1843_v52 = vshll.u32 %v4138_v45, 16 }
  0x1b   : > { %v1831_v53 = vshrl.u32 %v4126_v39, 16  ;;  %v1853_v54 = vrot.slane %v1851_v46, 1  ;;  %v1837_v56 = vrot.slane %v1835_v49, 1  ;;  %v332_v57 = vor.u32 %v330_v32, %v329_v37 }
  0x1c   : > { %v1861_v55 = vrot.slane %v1859_v48, 1  ;;  %v1830_v58 = vsel %vm6093_vm2, %v4103_v6, %v1829_v50  ;;  %v1845_v59 = vrot.slane %v1843_v52, 1  ;;  %v1863_v61 = vshrl.u32 %v4135_v44, 16 }
  0x1d   : > { %v1833_v60 = vor.u32 %v1831_v53, %v1829_v50  ;;  %1951 = vrot.lane.b32.xlu0 %v1830_v58, %s4051_s18  ;;  %v1857_v63 = vor.u32 %v1855_v47, %v1853_v54  ;;  %v1841_v0 = vor.u32 %v1839_v51, %v1837_v56  ;;  %v4153_v2 = vsel %vm286_vm0, %v321_v28, %v332_v57  ;;  %v4006_v51 = vld [vmem:[%s4095_s17 + $0x60] sm:$0xff] }
  0x1e   : > { %v1847_v3 = vshrl.u32 %v4138_v45, 16  ;;  %v1865_v8 = vor.u32 %v1863_v61, %v1861_v55  ;;  %v1867_v9 = vshll.u32 %v4153_v2, 16  ;;  %v340_v12 = vor.u32 %v338_v41, %v4128_v40 }
  0x1f   : > { %v4158_v7 = vsel %vm6093_vm2, %v1833_v60, %v1837_v56  ;;  %v4163_v13 = vsel %vm6093_vm2, %v1857_v63, %v1861_v55  ;;  %v4166_v14 = vsel %vm6093_vm2, %v1841_v0, %v1845_v59  ;;  %v1871_v16 = vshrl.u32 %v4153_v2, 16 }
  0x20   : > { %6189 = vst [vmem:[#allocation5_spill] sm:$0xff] %v4163_v13  ;;  %v1849_v15 = vor.u32 %v1847_v3, %v1845_v59  ;;  %1959 = vrot.lane.b32.xlu2 %v4163_v13, %s4051_s18  ;;  %1955 = vrot.lane.b32.xlu1 %v4166_v14, %s4051_s18  ;;  %v1869_v18 = vrot.slane %v1867_v9, 1  ;;  %v4175_v19 = vsel %vm286_vm0, %v329_v37, %v340_v12  ;;  %v343_v20 = vshrl.u32 %v4001_v62, 16 }
  0x21   : > { %v346_v21 = vshll.u32 %v4001_v62, 16  ;;  %v1875_v26 = vshll.u32 %v4175_v19, 16  ;;  %v351_v27 = vshrl.u32 %v4002_v4, 16  ;;  %v354_v28 = vshll.u32 %v4002_v4, 16 }
  0x22   : > { %v4180_v24 = vsel %vm6093_vm2, %v1849_v15, %v1853_v54  ;;  %v4184_v29 = vsel %vm6093_vm2, %v1865_v8, %v1869_v18  ;;  %v1873_v30 = vor.u32 %v1871_v16, %v1869_v18  ;;  %v345_v31 = vrot.slane %v343_v20, 7  ;;  %v4007_v16 = vld [vmem:[%s4095_s17 + $0x68] sm:$0xff] }
  0x23   : > { %6190 = vst [vmem:[#allocation6_spill] sm:$0xff] %v4180_v24  ;;  %v1879_v32 = vshrl.u32 %v4175_v19, 16  ;;  %v1877_v33 = vrot.slane %v1875_v26, 1  ;;  %v353_v34 = vrot.slane %v351_v27, 7  ;;  %v359_v35 = vshrl.u32 %v4003_v17, 16 }
  0x24   : > { %v362_v36 = vshll.u32 %v4003_v17, 16  ;;  %v348_v37 = vor.u32 %v346_v21, %v345_v31  ;;  %v367_v41 = vshrl.u32 %v4004_v22, 16  ;;  %v370_v42 = vshll.u32 %v4004_v22, 16  ;;  %v4008_v22 = vld [vmem:[%s4095_s17 + $0x70] sm:$0xff] }
  0x25   : > { %v375_v46 = vshrl.u32 %v4005_v23, 16  ;;  %1953 = vrot.lane.b32.xlu0 %v4158_v7, %s4051_s18  ;;  %v4190_v47 = vsel %vm6093_vm2, %v1873_v30, %v1877_v33  ;;  %v356_v48 = vor.u32 %v354_v28, %v353_v34  ;;  %v1881_v49 = vor.u32 %v1879_v32, %v1877_v33 }
  0x26   : > { %v361_v50 = vrot.slane %v359_v35, 7  ;;  %v4195_v52 = vsel %vm286_vm0, %v4128_v40, %v348_v37  ;;  %v369_v53 = vrot.slane %v367_v41, 7  ;;  %v378_v55 = vshll.u32 %v4005_v23, 16 }
  0x27   : > { %6191 = vst [vmem:[#allocation7_spill] sm:$0xff] %v4195_v52  ;;  %v377_v54 = vrot.slane %v375_v46, 7  ;;  %v4198_v56 = vsel %vm286_vm0, %v345_v31, %v356_v48  ;;  %v1883_v57 = vshll.u32 %v4195_v52, 16  ;;  %v1887_v58 = vshrl.u32 %v4195_v52, 16 }
  0x28   : > { %6192 = vst [vmem:[#allocation8_spill] sm:$0xff] %v4198_v56  ;;  %v364_v59 = vor.u32 %v362_v36, %v361_v50  ;;  %1961 = vrot.lane.b32.xlu2 %v4184_v29, %s4051_s18  ;;  %1957 = vrot.lane.b32.xlu1 %v4180_v24, %s4051_s18  ;;  %v1891_v40 = vshll.u32 %v4198_v56, 16  ;;  %v1895_v60 = vshrl.u32 %v4198_v56, 16  ;;  %v372_v61 = vor.u32 %v370_v42, %v369_v53 }
  0x29   : > { %v380_v62 = vor.u32 %v378_v55, %v377_v54  ;;  %v1885_v63 = vrot.slane %v1883_v57, 1  ;;  %v383_v3 = vshrl.u32 %v4006_v51, 16  ;;  %v386_v4 = vshll.u32 %v4006_v51, 16 }
  0x2a   : > { %v4209_v0 = vsel %vm286_vm0, %v353_v34, %v364_v59  ;;  %v1893_v8 = vrot.slane %v1891_v40, 1  ;;  %v4213_v12 = vsel %vm286_vm0, %v361_v50, %v372_v61  ;;  %v4009_v34 = vld [vmem:[%s4095_s17 + $0x78] sm:$0xff]  ;;  %v391_v37 = vshrl.u32 %v4007_v16, 16 }
  0x2b   : > { %v1899_v9 = vshll.u32 %v4209_v0, 16  ;;  %v4216_v15 = vsel %vm286_vm0, %v369_v53, %v380_v62  ;;  %v1889_v17 = vor.u32 %v1887_v58, %v1885_v63  ;;  %v4220_v18 = vsel %vm6093_vm2, %v1881_v49, %v1885_v63 }
  0x2c   : > { %6193 = vst [vmem:[#allocation9_spill] sm:$0xff] %v4220_v18  ;;  %v1907_v20 = vshll.u32 %v4213_v12, 16  ;;  %v1911_v21 = vshrl.u32 %v4213_v12, 16  ;;  %v1897_v23 = vor.u32 %v1895_v60, %v1893_v8  ;;  %v1915_v27 = vshll.u32 %v4216_v15, 16 }
  0x2d   : > { %v1901_v26 = vrot.slane %v1899_v9, 1  ;;  %v1903_v28 = vshrl.u32 %v4209_v0, 16  ;;  %1963 = vrot.lane.b32.xlu0 %v4190_v47, %s4051_s18  ;;  %v4230_v30 = vsel %vm6093_vm2, %v1889_v17, %v1893_v8  ;;  %v385_v32 = vrot.slane %v383_v3, 7 }
  0x2e   : > { %6194 = vst [vmem:[#allocation10_spill] sm:$0xff] %v4230_v30  ;;  %v1909_v31 = vrot.slane %v1907_v20, 1  ;;  %v1919_v33 = vshrl.u32 %v4216_v15, 16  ;;  %v1917_v35 = vrot.slane %v1915_v27, 1  ;;  %v441_v41 = vadd.s32 40, %v4097_v1 }
  0x2f   : > { %v1905_v36 = vor.u32 %v1903_v28, %v1901_v26  ;;  %v388_v46 = vor.u32 %v386_v4, %v385_v32  ;;  %v394_v48 = vshll.u32 %v4007_v16, 16  ;;  %v399_v49 = vshrl.u32 %v4008_v22, 16 }
  0x30   : > { %v1913_v42 = vor.u32 %v1911_v21, %v1909_v31  ;;  %1967 = vrot.lane.b32.xlu2 %v4230_v30, %s4051_s18  ;;  %1965 = vrot.lane.b32.xlu1 %v4220_v18, %s4051_s18  ;;  %v4240_v50 = vsel %vm6093_vm2, %v1897_v23, %v1901_v26  ;;  %v393_v53 = vrot.slane %v391_v37, 7  ;;  %v402_v55 = vshll.u32 %v4008_v22, 16 }
  0x31   : > { %6195 = vst [vmem:[#allocation11_spill] sm:$0xff] %v4240_v50  ;;  %v4243_v51 = vsel %vm6093_vm2, %v1905_v36, %v1909_v31  ;;  %v4246_v57 = vsel %vm286_vm0, %v377_v54, %v388_v46  ;;  %v1921_v58 = vor.u32 %v1919_v33, %v1917_v35  ;;  %v401_v59 = vrot.slane %v399_v49, 7 }
  0x32   : > { %v407_v40 = vshrl.u32 %v4009_v34, 16  ;;  %v1923_v60 = vshll.u32 %v4246_v57, 16  ;;  %v396_v61 = vor.u32 %v394_v48, %v393_v53  ;;  %v1927_v62 = vshrl.u32 %v4246_v57, 16 }
  0x33   : > { %v410_v63 = vshll.u32 %v4009_v34, 16  ;;  %v4251_v3 = vsel %vm6093_vm2, %v1913_v42, %v1917_v35  ;;  %v404_v4 = vor.u32 %v402_v55, %v401_v59  ;;  %v479_v9 = vand.u32 15, %v4109_v10 }
  0x34   : > { %6196 = vst [vmem:[#allocation12_spill] sm:$0xff] %v4251_v3  ;;  %v4253_v8 = vrot.slane %v407_v40, 7  ;;  %v1925_v16 = vrot.slane %v1923_v60, 1  ;;  %v4257_v54 = vsel %vm286_vm0, %v385_v32, %v396_v61  ;;  %v493_v17 = vand.u32 15, %v4112_v11 }
  0x35   : > { %1969 = vrot.lane.b32.xlu0 %v4240_v50, %s4051_s18  ;;  %v4263_v20 = vsel %vm286_vm0, %v393_v53, %v404_v4  ;;  %v1931_v21 = vshll.u32 %v4257_v54, 16  ;;  %v1935_v22 = vshrl.u32 %v4257_v54, 16  ;;  %v507_v11 = vand.u32 15, %v441_v41 }
  0x36   : > { %6197 = vst [vmem:[#allocation13_spill] sm:$0xff] %v4253_v8  ;;  %v412_v23 = vor.u32 %v410_v63, %v4253_v8  ;;  %v1939_v10 = vshll.u32 %v4263_v20, 16  ;;  %v1929_v26 = vor.u32 %v1927_v62, %v1925_v16  ;;  %v1943_v27 = vshrl.u32 %v4263_v20, 16 }
  0x37   : > { %v4271_v28 = vsel %vm6093_vm2, %v1921_v58, %v1925_v16  ;;  %v1933_v31 = vrot.slane %v1931_v21, 1  ;;  %v1075_v33 = vsel %vm1045_vm5, 65537, %v6086_v5  ;;  %v4285_v37 = vunpack.c.l.b16 %v6086_v5 }
  0x38   : > { %6198 = vst [vmem:[#allocation14_spill] sm:$0xff] %v4271_v28  ;;  %v4274_v32 = vsel %vm286_vm0, %v401_v59, %v412_v23  ;;  %1973 = vrot.lane.b32.xlu2 %v4251_v3, %s4051_s18  ;;  %1971 = vrot.lane.b32.xlu1 %v4243_v51, %s4051_s18  ;;  %v1941_v34 = vrot.slane %v1939_v10, 1  ;;  %v4282_v36 = vunpack.c.l.b16 %v1075_v33  ;;  %v4288_v42 = vunpack.c.h.b16 %v6086_v5 }
  0x39   : > { %6199 = vst [vmem:[#allocation15_spill] sm:$0xff] %v4274_v32  ;;  %v1947_v35 = vshll.u32 %v4274_v32, 16  ;;  %v1937_v41 = vor.u32 %v1935_v22, %v1933_v31  ;;  %v1270_v46 = vadd.s32 1, %v479_v9  ;;  %v1272_v48 = vadd.s32 1, %v493_v17 }
  0x3a   : > { %v4291_v49 = vsel %vm6093_vm2, %v1929_v26, %v1933_v31  ;;  %v1945_v53 = vor.u32 %v1943_v27, %v1941_v34  ;;  %v1274_v58 = vadd.s32 1, %v507_v11  ;;  %v443_v40 = vadd.s32 56, %v4097_v1 }
  0x3b   : > { %6200 = vst [vmem:[#allocation16_spill] sm:$0xff] %v4291_v49  ;;  %v4293_v55 = vrot.slane %v1947_v35, 1  ;;  %v4296_v59 = vsel %vm6093_vm2, %v1937_v41, %v1941_v34  ;;  %vm1334_vm6 = vcmp.lt.s32.totalorder %v1270_v46, 16  ;;  %vm1336_vm7 = vcmp.lt.s32.totalorder %v1272_v48, 16 }
  0x3c   : > { %vm1338_vm8 = vcmp.lt.s32.totalorder %v1274_v58, 16  ;;  %vm1462_vm9 = vmpackc.low %vm1334_vm6, %vm1334_vm6  ;;  %v445_v61 = vadd.s32 72, %v4097_v1  ;;  %v447_v62 = vadd.s32 88, %v4097_v1  ;;  %v521_v4 = vand.u32 15, %v443_v40 }
  0x3d   : > { %6201 = vst [vmem:[#allocation17_spill] sm:$0xff] %v4293_v55  ;;  %v4301_v60 = vsel %vm6093_vm2, %v1945_v53, %v4293_v55  ;;  %1975 = vrot.lane.b32.xlu0 %v4271_v28, %s4051_s18  ;;  %vm1464_vm10 = vmpackc.low %vm1336_vm7, %vm1336_vm7  ;;  %v1494_v63 = vsel %vm1462_vm9, 65537, %v6086_v5  ;;  %v449_v9 = vadd.s32 104, %v4097_v1  ;;  %v451_v16 = vadd.s32 120, %v4097_v1 }
  0x3e   : > { %6202 = vst [vmem:[#allocation18_spill] sm:$0xff] %v4301_v60  ;;  %vm1466_vm11 = vmpackc.low %vm1338_vm8, %vm1338_vm8  ;;  %v1496_v17 = vsel %vm1464_vm10, 65537, %v6086_v5  ;;  %v1526_v21 = vunpack.c.l.b16 %v1494_v63  ;;  %v535_v22 = vand.u32 15, %v445_v61  ;;  %v549_v23 = vand.u32 15, %v447_v62 }
  0x3f   : > { %v1498_v10 = vsel %vm1466_vm11, 65537, %v6086_v5  ;;  %v1528_v26 = vunpack.c.l.b16 %v1496_v17  ;;  %v1276_v27 = vadd.s32 1, %v521_v4  ;;  %v563_v11 = vand.u32 15, %v449_v9 }
  0x40   : > { %1979 = vrot.lane.b32.xlu2 %v4296_v59, %s4051_s18  ;;  %1977 = vrot.lane.b32.xlu1 %v4291_v49, %s4051_s18  ;;  %v1530_v31 = vunpack.c.l.b16 %v1498_v10  ;;  %v1557_v33 = vpack.c.b16 %v1526_v21, %v4282_v36  ;;  %v1278_v34 = vadd.s32 1, %v535_v22  ;;  %v1280_v35 = vadd.s32 1, %v549_v23 }
  0x41   : > { %v1558_v41 = vpack.c.b16 %v1528_v26, %v4282_v36  ;;  %vm1340_vm12 = vcmp.lt.s32.totalorder %v1276_v27, 16  ;;  %v1282_v46 = vadd.s32 1, %v563_v11  ;;  %v453_v48 = vadd.s32 136, %v4097_v1 }
  0x42   : > { %v1559_v53 = vpack.c.b16 %v1530_v31, %v4282_v36  ;;  %v4320_v58 = vrot.slane %v1557_v33, 7  ;;  %vm1468_vm14 = vmpackc.low %vm1340_vm12, %vm1340_vm12  ;;  %vm1342_vm15 = vcmp.lt.s32.totalorder %v1278_v34, 16  ;;  %vm1344_vm0 = vcmp.lt.s32.totalorder %v1280_v35, 16 }
  0x43   : > { %v1574_v40 = vrot.slane %v1558_v41, 7  ;;  %v1500_v61 = vsel %vm1468_vm14, 65537, %v6086_v5  ;;  %vm1470_vm4 = vmpackc.low %vm1342_vm15, %vm1342_vm15  ;;  %vm1346_vm5 = vcmp.lt.s32.totalorder %v1282_v46, 16  ;;  %v577_v62 = vand.u32 15, %v451_v16 }
  0x44   : > { %v1576_v63 = vrot.slane %v1559_v53, 7  ;;  %v1532_v4 = vunpack.c.l.b16 %v1500_v61  ;;  %vm1472_vm6 = vmpackc.low %vm1344_vm0, %vm1344_vm0  ;;  %v1502_v9 = vsel %vm1470_vm4, 65537, %v6086_v5  ;;  %v591_v17 = vand.u32 15, %v453_v48 }
  0x45   : > { %1981 = vrot.lane.b32.xlu0 %v4301_v60, %s4051_s18  ;;  %v1575_v21 = vsel %vm6095_vm1, %v4320_v58, %v1574_v40  ;;  %v1504_v22 = vsel %vm1472_vm6, 65537, %v6086_v5  ;;  %v1534_v23 = vunpack.c.l.b16 %v1502_v9  ;;  %vm1474_vm7 = vmpackc.low %vm1346_vm5, %vm1346_vm5  ;;  %v4329_v10 = vadd.s32 1, %v577_v62 }
  0x46   : > { %v1577_v16 = vsel %vm6095_vm1, %v1574_v40, %v1576_v63  ;;  %v1604_v26 = vunpack.c.l.b16 %v1575_v21  ;;  %v1605_v27 = vunpack.c.h.b16 %v1575_v21  ;;  %v1560_v11 = vpack.c.b16 %v1532_v4, %v4282_v36 }
  0x47   : > { %v1611_v31 = vunpack.c.l.b16 %v1577_v16  ;;  %v1612_v33 = vunpack.c.h.b16 %v1577_v16  ;;  %v1536_v34 = vunpack.c.l.b16 %v1504_v22  ;;  %v1561_v35 = vpack.c.b16 %v1534_v23, %v4282_v36 }
  0x48   : > { %vm1608_vm8 = vcmp.ne.s32.totalorder %v1604_v26, %v4285_v37  ;;  %vm1609_vm9 = vcmp.ne.s32.totalorder %v1605_v27, %v4288_v42  ;;  %v1578_v41 = vrot.slane %v1560_v11, 7  ;;  %v1506_v46 = vsel %vm1474_vm7, 65537, %v6086_v5 }
  0x49   : > { %vm4337_vm10 = vmpackc.low %vm1609_vm9, %vm1608_vm8  ;;  %v6203_v48 = vmov 0  ;;  %vm1615_vm11 = vcmp.ne.s32.totalorder %v1611_v31, %v4285_v37  ;;  %vm1616_vm12 = vcmp.ne.s32.totalorder %v1612_v33, %v4288_v42  ;;  %v1562_v53 = vpack.c.b16 %v1536_v34, %v4282_v36 }
  0x4a   : > { %v6204_v48 = vsel %vm4337_vm10, 4294967295, %v6203_v48  ;;  %v1580_v40 = vrot.slane %v1561_v35, 7  ;;  %vm4344_vm14 = vmpackc.low %vm1616_vm12, %vm1615_vm11  ;;  %v6205_v61 = vmov 0  ;;  %v1716_v62 = vsel %vm4337_vm10, %v4126_v39, 0 }
  0x4b   : > { %v6206_v61 = vsel %vm4344_vm14, 4294967295, %v6205_v61  ;;  %v1579_v4 = vsel %vm6095_vm1, %v1576_v63, %v1578_v41  ;;  %v1538_v9 = vunpack.c.l.b16 %v1506_v46  ;;  %v1286_v21 = vadd.s32 1, %v591_v17 }
  0x4c   : > { %6207 = vst [vmem:[#allocation19_spill] sm:$0xff] %v6206_v61  ;;  %v1717_v22 = vsel %vm4344_vm14, %v4122_v38, 0  ;;  %v2002_v23 = vrot.slane %v1716_v62, 1  ;;  %v1618_v16 = vunpack.c.l.b16 %v1579_v4  ;;  %v1619_v26 = vunpack.c.h.b16 %v1579_v4 }
  0x4d   : > { %v2004_v27 = vrot.slane %v1717_v22, 1  ;;  %v1581_v11 = vsel %vm6095_vm1, %v1578_v41, %v1580_v40  ;;  %v1582_v31 = vrot.slane %v1562_v53, 7  ;;  %v4357_v33 = vpack.c.b16 %v1538_v9, %v4282_v36 }
  0x4e   : > { %v2003_v34 = vsel %vm6094_vm13, %v4103_v6, %v2002_v23  ;;  %vm1622_vm15 = vcmp.ne.s32.totalorder %v1618_v16, %v4285_v37  ;;  %vm1623_vm0 = vcmp.ne.s32.totalorder %v1619_v26, %v4288_v42  ;;  %v1625_v63 = vunpack.c.l.b16 %v1581_v11 }
  0x4f   : > { %v2005_v17 = vsel %vm6094_vm13, %v2002_v23, %v2004_v27  ;;  %2034 = vrot.lane.b32.xlu1 %v2003_v34, %s4053_s19  ;;  %vm4365_vm4 = vmpackc.low %vm1623_vm0, %vm1622_vm15  ;;  %v6208_v35 = vmov 0  ;;  %v1583_v41 = vsel %vm6095_vm1, %v1580_v40, %v1582_v31  ;;  %v1626_v46 = vunpack.c.h.b16 %v1581_v11 }
  0x50   : > { %v6209_v35 = vsel %vm4365_vm4, 4294967295, %v6208_v35  ;;  %v1584_v53 = vrot.slane %v4357_v33, 7  ;;  %2036 = vrot.lane.b32.xlu2 %v2005_v17, %s4053_s19  ;;  %v1718_v62 = vsel %vm4365_vm4, %v4138_v45, 0  ;;  %vm1629_vm5 = vcmp.ne.s32.totalorder %v1625_v63, %v4285_v37 }
  0x51   : > { %6210 = vst [vmem:[#allocation20_spill] sm:$0xff] %v6209_v35  ;;  %v1632_v4 = vunpack.c.l.b16 %v1583_v41  ;;  %v1633_v9 = vunpack.c.h.b16 %v1583_v41  ;;  %v2006_v22 = vrot.slane %v1718_v62, 1  ;;  %vm1630_vm6 = vcmp.ne.s32.totalorder %v1626_v46, %v4288_v42 }
  0x52   : > { %v1585_v23 = vsel %vm6095_vm1, %v1582_v31, %v1584_v53  ;;  %vm1348_vm7 = vcmp.lt.s32.totalorder %v4329_v10, 16  ;;  %vm4379_vm8 = vmpackc.low %vm1630_vm6, %vm1629_vm5  ;;  %v6211_v40 = vmov 0  ;;  %v6213_v33 = vmov 0 }
  0x53   : > { %v6212_v40 = vsel %vm4379_vm8, 4294967295, %v6211_v40  ;;  %vm1636_vm9 = vcmp.ne.s32.totalorder %v1632_v4, %v4285_v37  ;;  %vm1637_vm11 = vcmp.ne.s32.totalorder %v1633_v9, %v4288_v42  ;;  %v1639_v16 = vunpack.c.l.b16 %v1585_v23  ;;  %vm1476_vm6 = vmpackc.low %vm1348_vm7, %vm1348_vm7 }
  0x54   : > { %v1640_v26 = vunpack.c.h.b16 %v1585_v23  ;;  %v2007_v11 = vsel %vm6094_vm13, %v2004_v27, %v2006_v22  ;;  %vm4386_vm12 = vmpackc.low %vm1637_vm11, %vm1636_vm9  ;;  %v1719_v31 = vsel %vm4379_vm8, %v4132_v43, 0  ;;  %vm1350_vm15 = vcmp.lt.s32.totalorder %v1286_v21, 16 }
  0x55   : > { %v6214_v33 = vsel %vm4386_vm12, 4294967295, %v6213_v33  ;;  %v455_v34 = vadd.s32 152, %v4097_v1  ;;  %2038 = vrot.lane.b32.xlu0 %v2007_v11, %s4053_s19  ;;  %v1720_v63 = vsel %vm4386_vm12, %v4135_v44, 0  ;;  %v2008_v17 = vrot.slane %v1719_v31, 1  ;;  %vm1478_vm11 = vmpackc.low %vm1350_vm15, %vm1350_vm15 }
  0x56   : > { %vm1643_vm0 = vcmp.ne.s32.totalorder %v1639_v16, %v4285_v37  ;;  %vm1644_vm5 = vcmp.ne.s32.totalorder %v1640_v26, %v4288_v42  ;;  %v2010_v27 = vrot.slane %v1720_v63, 1  ;;  %v6215_v21 = vmov 0 }
  0x57   : > { %vm4403_vm9 = vmpackc.low %vm1644_vm5, %vm1643_vm0  ;;  %v1508_v41 = vsel %vm1476_vm6, 65537, %v6086_v5  ;;  %v605_v46 = vand.u32 15, %v455_v34  ;;  %v457_v62 = vadd.s32 168, %v4097_v1  ;;  %v2009_v4 = vsel %vm6094_vm13, %v2006_v22, %v2008_v17 }
  0x58   : > { %v6216_v21 = vsel %vm4403_vm9, 4294967295, %v6215_v21  ;;  %v1721_v9 = vsel %vm4403_vm9, %v4153_v2, 0  ;;  %v1540_v10 = vunpack.c.l.b16 %v1508_v41  ;;  %v459_v23 = vadd.s32 184, %v4097_v1  ;;  %2040 = vrot.lane.b32.xlu1 %v2009_v4, %s4053_s19 }
  0x59   : > { %6217 = vst [vmem:[#allocation21_spill] sm:$0xff] %v6216_v21  ;;  %v2011_v16 = vsel %vm6094_vm13, %v2008_v17, %v2010_v27  ;;  %v2012_v26 = vrot.slane %v1721_v9, 1  ;;  %v1510_v11 = vsel %vm1478_vm11, 65537, %v6086_v5  ;;  %v1288_v31 = vadd.s32 1, %v605_v46 }
  0x5a   : > { %2042 = vrot.lane.b32.xlu2 %v2011_v16, %s4053_s19  ;;  %v1542_v34 = vunpack.c.l.b16 %v1510_v11  ;;  %v1564_v22 = vpack.c.b16 %v1540_v10, %v4282_v36  ;;  %v619_v63 = vand.u32 15, %v457_v62  ;;  %v633_v6 = vand.u32 15, %v459_v23 }
  0x5b   : > { %v2013_v30 = vsel %vm6094_vm13, %v2010_v27, %v2012_v26  ;;  %vm1352_vm7 = vcmp.lt.s32.totalorder %v1288_v31, 16  ;;  %v461_v41 = vadd.s32 200, %v4097_v1  ;;  %v463_v17 = vadd.s32 216, %v4097_v1 }
  0x5c   : > { %v1565_v4 = vpack.c.b16 %v1542_v34, %v4282_v36  ;;  %v1586_v9 = vrot.slane %v1564_v22, 7  ;;  %vm1480_vm15 = vmpackc.low %vm1352_vm7, %vm1352_vm7  ;;  %v1290_v5 = vadd.s32 1, %v619_v63  ;;  %v1292_v46 = vadd.s32 1, %v633_v6 }
  0x5d   : > { %v6218_v13 = vmov 0   ;;  %v647_v11 = vand.u32 15, %v461_v41  ;;  %v465_v10 = vadd.s32 232, %v4097_v1  ;;  %v661_v62 = vand.u32 15, %v463_v17  ;;  %2044 = vrot.lane.b32.xlu0 %v2013_v30, %s4053_s19 }
  0x5e   : > { %v1512_v16 = vsel %vm1480_vm15, 65537, %v6218_v13  ;;  %v1587_v27 = vsel %vm6095_vm1, %v1584_v53, %v1586_v9  ;;  %v1588_v23 = vrot.slane %v1565_v4, 7  ;;  %vm1354_vm0 = vcmp.lt.s32.totalorder %v1290_v5, 16 }
  0x5f   : > { %v1544_v31 = vunpack.c.l.b16 %v1512_v16  ;;  %v1646_v35 = vunpack.c.l.b16 %v1587_v27  ;;  %v1647_v55 = vunpack.c.h.b16 %v1587_v27  ;;  %vm1356_vm5 = vcmp.lt.s32.totalorder %v1292_v46, 16  ;;  %vm1482_vm6 = vmpackc.low %vm1354_vm0, %vm1354_vm0 }
  0x60   : > { %v1294_v34 = vadd.s32 1, %v647_v11  ;;  %v1589_v6 = vsel %vm6095_vm1, %v1586_v9, %v1588_v23  ;;  %vm1484_vm11 = vmpackc.low %vm1356_vm5, %vm1356_vm5  ;;  %v1514_v63 = vsel %vm1482_vm6, 65537, %v6218_v13  ;;  %v675_v41 = vand.u32 15, %v465_v10 }
  0x61   : > { %v1566_v22 = vpack.c.b16 %v1544_v31, %v4282_v36  ;;  %vm1650_vm7 = vcmp.ne.s32.totalorder %v1646_v35, %v4285_v37  ;;  %vm1651_vm15 = vcmp.ne.s32.totalorder %v1647_v55, %v4288_v42  ;;  %v1653_v30 = vunpack.c.l.b16 %v1589_v6 }
  0x62   : > { %v1654_v53 = vunpack.c.h.b16 %v1589_v6  ;;  %vm4432_vm2 = vmpackc.low %vm1651_vm15, %vm1650_vm7  ;;  %v6219_v5 = vmov 0  ;;  %v1516_v4 = vsel %vm1484_vm11, 65537, %v6218_v13  ;;  %v1546_v9 = vunpack.c.l.b16 %v1514_v63 }
  0x63   : > { %v6220_v5 = vsel %vm4432_vm2, 4294967295, %v6219_v5  ;;  %v1590_v17 = vrot.slane %v1566_v22, 7  ;;  %vm1358_vm0 = vcmp.lt.s32.totalorder %v1294_v34, 16  ;;  %vm1657_vm5 = vcmp.ne.s32.totalorder %v1653_v30, %v4285_v37 }
  0x64   : > { %6221 = vst [vmem:[#allocation22_spill] sm:$0xff] %v6220_v5  ;;  %vm1658_vm6 = vcmp.ne.s32.totalorder %v1654_v53, %v4288_v42  ;;  %v1722_v35 = vsel %vm4432_vm2, %v4175_v19, 0  ;;  %v1548_v55 = vunpack.c.l.b16 %v1516_v4  ;;  %vm1486_vm13 = vmpackc.low %vm1358_vm0, %vm1358_vm0  ;;  %vm6224_vm7 = vcmask 1040384  }
  0x65   : > { %vm4442_vm1 = vmpackc.low %vm1658_vm6, %vm1657_vm5  ;;  %v2014_v16 = vrot.slane %v1722_v35, 1  ;;  %v1591_v11 = vsel %vm6224_vm7, %v1588_v23, %v1590_v17  ;;  %v1567_v10 = vpack.c.b16 %v1546_v9, %v4282_v36  ;;  %v1518_v27 = vsel %vm1486_vm13, 65537, %v6218_v13 }
  0x66   : > { %v1723_v31 = vsel %vm4442_vm1, %v4195_v52, 0  ;;  %v1660_v34 = vunpack.c.l.b16 %v1591_v11  ;;  %v1661_v6 = vunpack.c.h.b16 %v1591_v11  ;;  %v1568_v22 = vpack.c.b16 %v1548_v55, %v4282_v36  ;;  %vm6229_vm6 = vmmov %vm6224_vm7 }
  0x67   : > { %v2016_v63 = vrot.slane %v1723_v31, 1  ;;  %vm6225_vm11 = vcmask 1046528   ;;  %v1592_v53 = vrot.slane %v1567_v10, 7  ;;  %v1550_v4 = vunpack.c.l.b16 %v1518_v27  ;;  %vm6230_vm7 = vmmov %vm6229_vm6 }
  0x68   : > { %v2015_v30 = vsel %vm6225_vm11, %v2012_v26, %v2014_v16  ;;  %vm1664_vm15 = vcmp.ne.s32.totalorder %v1660_v34, %v4285_v37  ;;  %vm1665_vm0 = vcmp.ne.s32.totalorder %v1661_v6, %v4288_v42  ;;  %v1594_v23 = vrot.slane %v1568_v22, 7  ;;  %vm6226_vm13 = vmmov %vm6225_vm11 }
  0x69   : > { %2046 = vrot.lane.b32.xlu1 %v2015_v30, %s4053_s19  ;;  %v1296_v9 = vadd.s32 1, %v661_v62  ;;  %v2017_v35 = vsel %vm6226_vm13, %v2014_v16, %v2016_v63  ;;  %vm4458_vm5 = vmpackc.low %vm1665_vm0, %vm1664_vm15  ;;  %v1593_v55 = vsel %vm6229_vm6, %v1590_v17, %v1592_v53  ;;  %v4464_v26 = vpack.c.b16 %v1550_v4, %v4282_v36 }
  0x6a   : > { %v1298_v11 = vadd.s32 1, %v675_v41  ;;  %2048 = vrot.lane.b32.xlu2 %v2017_v35, %s4053_s19  ;;  %v1724_v10 = vsel %vm4458_vm5, %v4198_v56, 0  ;;  %v1595_v62 = vsel %vm6230_vm7, %v1592_v53, %v1594_v23  ;;  %v1667_v27 = vunpack.c.l.b16 %v1593_v55 }
  0x6b   : > { %v1668_v16 = vunpack.c.h.b16 %v1593_v55  ;;  %v2018_v31 = vrot.slane %v1724_v10, 1  ;;  %v1674_v34 = vunpack.c.l.b16 %v1595_v62  ;;  %v1675_v6 = vunpack.c.h.b16 %v1595_v62 }
  0x6c   : > { %v1596_v22 = vrot.slane %v4464_v26, 7  ;;  %vm1671_vm11 = vcmp.ne.s32.totalorder %v1667_v27, %v4285_v37  ;;  %vm1360_vm0 = vcmp.lt.s32.totalorder %v1296_v9, 16  ;;  %vm1362_vm13 = vcmp.lt.s32.totalorder %v1298_v11, 16 }
  0x6d   : > { %vm1672_vm15 = vcmp.ne.s32.totalorder %v1668_v16, %v4288_v42  ;;  %vm6231_vm6 = vcmask 1046528   ;;  %v6232_v17 = vmov 0  ;;  %vm1678_vm7 = vcmp.ne.s32.totalorder %v1674_v34, %v4285_v37 }
  0x6e   : > { %v2019_v41 = vsel %vm6231_vm6, %v2016_v63, %v2018_v31  ;;  %vm4475_vm2 = vmpackc.low %vm1672_vm15, %vm1671_vm11  ;;  %vm1679_vm4 = vcmp.ne.s32.totalorder %v1675_v6, %v4288_v42  ;;  %vm6234_vm3 = vcmask 1040384   ;;  %v6235_v53 = vmov 0 }
  0x6f   : > { %v6233_v17 = vsel %vm4475_vm2, 4294967295, %v6232_v17  ;;  %v1597_v30 = vsel %vm6234_vm3, %v1594_v23, %v1596_v22  ;;  %2050 = vrot.lane.b32.xlu0 %v2019_v41, %s4053_s19  ;;  %vm4483_vm9 = vmpackc.low %vm1679_vm4, %vm1678_vm7  ;;  %v1725_v63 = vsel %vm4475_vm2, %v4209_v0, 0  ;;  %v467_v35 = vadd.s32 248, %v4097_v1 }
  0x70   : > { %v6236_v53 = vsel %vm4483_vm9, 4294967295, %v6235_v53  ;;  %v1681_v4 = vunpack.c.l.b16 %v1597_v30  ;;  %v1682_v9 = vunpack.c.h.b16 %v1597_v30  ;;  %v1726_v55 = vsel %vm4483_vm9, %v4213_v12, 0  ;;  %vm1488_vm3 = vmpackc.low %vm1360_vm0, %vm1360_vm0 }
  0x71   : > { %6237 = vst [vmem:[#allocation23_spill] sm:$0xff] %v6236_v53  ;;  %v2020_v26 = vrot.slane %v1725_v63, 1  ;;  %v472_v23 = vand.u32 15, %v4097_v1  ;;  %v3935_v10 = vunpack.i.l.s16 %v4282_v36  ;;  %v2022_v62 = vrot.slane %v1726_v55, 1  ;;  %vm1490_vm15 = vmpackc.low %vm1362_vm13, %vm1362_vm13 }
  0x72   : > { %vm1685_vm4 = vcmp.ne.s32.totalorder %v1681_v4, %v4285_v37  ;;  %vm1686_vm11 = vcmp.ne.s32.totalorder %v1682_v9, %v4288_v42  ;;  %v1520_v27 = vsel %vm1488_vm3, 65537, %v6218_v13  ;;  %v1522_v6 = vsel %vm1490_vm15, 65537, %v6218_v13  ;;  %vm6240_vm0 = vmmov %vm6231_vm6 }
  0x73   : > { %v2021_v16 = vsel %vm6231_vm6, %v2018_v31, %v2020_v26  ;;  %vm4502_vm7 = vmpackc.low %vm1686_vm11, %vm1685_vm4  ;;  %v1552_v41 = vunpack.c.l.b16 %v1520_v27  ;;  %v689_v30 = vand.u32 15, %v467_v35  ;;  %v2023_v63 = vsel %vm6240_vm0, %v2020_v26, %v2022_v62 }
  0x74   : > { %2052 = vrot.lane.b32.xlu1 %v2021_v16, %s4053_s19  ;;  %v1727_v11 = vsel %vm4502_vm7, %v4216_v15, 0  ;;  %v1554_v4 = vunpack.c.l.b16 %v1522_v6  ;;  %v852_v9 = vadd.s32 4294967295, %v472_v23  ;;  %2054 = vrot.lane.b32.xlu2 %v2023_v63, %s4053_s19  ;;  %vm4515_vm13 = vcmp.ne.s32.totalorder %v3935_v10, %v4288_v42  ;;  %vm6243_vm4 = vmmov %vm6240_vm0 }
  0x75   : > { %v2024_v31 = vrot.slane %v1727_v11, 1  ;;  %v1570_v55 = vpack.c.b16 %v1552_v41, %v4282_v36  ;;  %v1300_v28 = vadd.s32 1, %v689_v30  ;;  %v438_v26 = vadd.s32 16, %v4097_v1 }
  0x76   : > { %v1571_v35 = vpack.c.b16 %v1554_v4, %v4282_v36  ;;  %vm884_vm3 = vcmp.ge.s32.totalorder %v852_v9, 0  ;;  %v442_v16 = vadd.s32 48, %v4097_v1  ;;  %v440_v41 = vadd.s32 32, %v4097_v1 }
  0x77   : > { %v2025_v23 = vsel %vm6243_vm4, %v2022_v62, %v2024_v31  ;;  %v1598_v6 = vrot.slane %v1570_v55, 7  ;;  %vm1364_vm11 = vcmp.lt.s32.totalorder %v1300_v28, 16  ;;  %vm1732_vm15 = vmpackc.low %vm884_vm3, %vm884_vm3  ;;  %v486_v63 = vand.u32 15, %v438_v26 }
  0x78   : > { %2056 = vrot.lane.b32.xlu0 %v2025_v23, %s4053_s19  ;;  %v1600_v10 = vrot.slane %v1571_v35, 7  ;;  %vm1492_vm6 = vmpackc.low %vm1364_vm11, %vm1364_vm11  ;;  %v1734_v30 = vsel %vm1732_vm15, 65537, %v6218_v13  ;;  %v514_v11 = vand.u32 15, %v442_v16  ;;  %vm6244_vm0 = vcmask 1040384  }
  0x79   : > { %v1599_v4 = vsel %vm6244_vm0, %v1596_v22, %v1598_v6  ;;  %v1524_v9 = vsel %vm1492_vm6, 65537, %v6218_v13  ;;  %v1736_v25 = vunpack.c.l.b16 %v1734_v30  ;;  %v500_v8 = vand.u32 15, %v440_v41  ;;  %vm6245_vm4 = vmmov %vm6244_vm0 }
  0x7a   : > { %v1601_v62 = vsel %vm6245_vm4, %v1598_v6, %v1600_v10  ;;  %v1688_v28 = vunpack.c.l.b16 %v1599_v4  ;;  %v1689_v55 = vunpack.c.h.b16 %v1599_v4  ;;  %v1556_v53 = vunpack.c.l.b16 %v1524_v9 }
  0x7b   : > { %v1695_v18 = vunpack.c.l.b16 %v1601_v62  ;;  %v1696_v24 = vunpack.c.h.b16 %v1601_v62  ;;  %v3964_v23 = vunpack.i.l.s16 %v1736_v25  ;;  %v854_v35 = vadd.s32 4294967295, %v486_v63  ;;  %v4560_v62 = vpop.permute.xlu2 %1959 }
  0x7c   : > { %vm1692_vm3 = vcmp.ne.s32.totalorder %v1688_v28, %v4285_v37  ;;  %vm1693_vm11 = vcmp.ne.s32.totalorder %v1689_v55, %v4288_v42  ;;  %v1572_v26 = vpack.c.b16 %v1556_v53, %v4282_v36  ;;  %v858_v22 = vadd.s32 4294967295, %v514_v11 }
  0x7d   : > { %vm4532_vm15 = vmpackc.low %vm1693_vm11, %vm1692_vm3  ;;  %v6246_v16 = vmov 0  ;;  %vm1699_vm6 = vcmp.ne.s32.totalorder %v1695_v18, %v4285_v37  ;;  %vm1700_vm0 = vcmp.ne.s32.totalorder %v1696_v24, %v4288_v42  ;;  %vm1743_vm4 = vcmp.ne.s32.totalorder %v3964_v23, %v4285_v37 }
  0x7e   : > { %v6247_v16 = vsel %vm4532_vm15, 4294967295, %v6246_v16  ;;  %vm886_vm9 = vcmp.ge.s32.totalorder %v854_v35, 0  ;;  %vm4539_vm14 = vmpackc.low %vm1700_vm0, %vm1699_vm6  ;;  %v6248_v25 = vmov 0  ;;  %v1728_v36 = vsel %vm4532_vm15, %v4246_v57, 0 }
  0x7f   : > { %v6249_v25 = vsel %vm4539_vm14, 4294967295, %v6248_v25  ;;  %v1602_v53 = vrot.slane %v1572_v26, 7  ;;  %v1729_v6 = vsel %vm4539_vm14, %v4257_v54, 0  ;;  %v2026_v18 = vrot.slane %v1728_v36, 1  ;;  %vm4551_vm11 = vmpackc.low %vm4515_vm13, %vm1743_vm4 }
  0x80   : > { %v6250_v24 = vmov 0  ;;  %v856_v41 = vadd.s32 4294967295, %v500_v8  ;;  %v444_v30 = vadd.s32 64, %v4097_v1  ;;  %v2028_v63 = vrot.slane %v1729_v6, 1  ;;  %vm1044_vm0 = vmpackc.low %vm886_vm9, %vm886_vm9 }
  0x81   : > { %v6251_v24 = vsel %vm4551_vm11, 4294967295, %v6250_v24  ;;  %vm6252_vm6 = vcmask 1040384   ;;  %v1746_v4 = vsel %vm4551_vm11, %v4126_v39, 0  ;;  %v1709_v9 = vunpack.c.l.b16 %v1602_v53 }
  0x82   : > { %v1603_v11 = vsel %vm6252_vm6, %v1600_v10, %v1602_v53  ;;  %vm6253_vm3 = vcmask 1046528   ;;  %v1710_v35 = vunpack.c.h.b16 %v1602_v53  ;;  %vm6254_vm4 = vcmp.ge.s32.totalorder %v858_v22, 0 }
  0x83   : > { %v2027_v28 = vsel %vm6253_vm3, %v2024_v31, %v2026_v18  ;;  %v1702_v55 = vunpack.c.l.b16 %v1603_v11  ;;  %v1703_v23 = vunpack.c.h.b16 %v1603_v11  ;;  %vm1048_vm14 = vmpackc.low %vm6254_vm4, %vm6254_vm4  ;;  %vm4568_vm6 = vcmp.ne.s32.totalorder %v1709_v9, %v4285_v37 }
  0x84   : > { %vm6255_vm2 = vmmov %vm6253_vm3  ;;  %2058 = vrot.lane.b32.xlu1 %v2027_v28, %s4053_s19  ;;  %v6256_v10 = vmov 0  ;;  %v1074_v26 = vsel %vm1044_vm0, 65537, %v6218_v13  ;;  %v1078_v36 = vsel %vm1048_vm14, 65537, %v6218_v13  ;;  %vm4578_vm4 = vcmp.ne.s32.totalorder %v1710_v35, %v4288_v42 }
  0x85   : > { %v2029_v8 = vsel %vm6255_vm2, %v2026_v18, %v2028_v63  ;;  %v6257_v10 = vsel %vm4568_vm6, 4294967295, %v6256_v10  ;;  %vm1706_vm9 = vcmp.ne.s32.totalorder %v1702_v55, %v4285_v37  ;;  %vm1707_vm3 = vcmp.ne.s32.totalorder %v1703_v23, %v4288_v42  ;;  %vm6131_vm14 = vmpackc.low %vm4578_vm4, %vm4568_vm6 }
  0x86   : > { %6258 = vst [vmem:[#allocation24_spill] sm:$0xff] %v6257_v10  ;;  %2060 = vrot.lane.b32.xlu2 %v2029_v8, %s4053_s19  ;;  %v6259_v31 = vmov 0  ;;  %v1104_v22 = vunpack.c.l.b16 %v1074_v26  ;;  %vm4582_vm2 = vmpackc.low %vm1707_vm3, %vm1706_vm9  ;;  %v6262_v53 = vmov 0  ;;  %v1108_v6 = vunpack.c.l.b16 %v1078_v36 }
  0x87   : > { %v6260_v31 = vsel %vm4578_vm4, 4294967295, %v6259_v31  ;;  %v6263_v53 = vsel %vm4582_vm2, 4294967295, %v6262_v53  ;;  %vm888_vm0 = vcmp.ge.s32.totalorder %v856_v41, 0  ;;  %v528_v18 = vand.u32 15, %v444_v30 }
  0x88   : > { %6261 = vst [vmem:[#allocation25_spill] sm:$0xff] %v6260_v31  ;;  %v448_v11 = vadd.s32 96, %v4097_v1  ;;  %v1730_v9 = vsel %vm4582_vm2, %v4263_v20, 0  ;;  %v3934_v28 = vunpack.i.l.s16 %v1104_v22  ;;  %v446_v55 = vadd.s32 80, %v4097_v1  ;;  %vm1046_vm9 = vmpackc.low %vm888_vm0, %vm888_vm0  ;;  %v4606_v31 = vpop.permute.xlu2 %1961 }
  0x89   : > { %6264 = vst [vmem:[#allocation26_spill] sm:$0xff] %v6263_v53  ;;  %v450_v23 = vadd.s32 112, %v4097_v1  ;;  %v2030_v35 = vrot.slane %v1730_v9, 1  ;;  %v1731_v41 = vsel %vm6131_vm14, %v4274_v32, 0  ;;  %v3938_v30 = vunpack.i.l.s16 %v1108_v6 }
  0x8a   : > { %v860_v8 = vadd.s32 4294967295, %v528_v18  ;;  %v2032_v26 = vrot.slane %v1731_v41, 1  ;;  %vm1153_vm3 = vcmp.ne.s32.totalorder %v3934_v28, %v4285_v37  ;;  %v1076_v36 = vsel %vm1046_vm9, 65537, %v6218_v13 }
  0x8b   : > { %v556_v22 = vand.u32 15, %v448_v11  ;;  %vm6265_vm2 = vcmask 1046528   ;;  %vm1167_vm11 = vcmp.ne.s32.totalorder %v3938_v30, %v4285_v37  ;;  %v1106_v9 = vunpack.c.l.b16 %v1076_v36  ;;  %vm4612_vm0 = vmpackc.low %vm4515_vm13, %vm1153_vm3 }
  0x8c   : > { %v2031_v53 = vsel %vm6265_vm2, %v2028_v63, %v2030_v35  ;;  %vm892_vm12 = vcmp.ge.s32.totalorder %v860_v8, 0  ;;  %vm6266_vm14 = vmmov %vm6265_vm2  ;;  %v6267_v18 = vmov 0  ;;  %v542_v11 = vand.u32 15, %v446_v55 }
  0x8d   : > { %2062 = vrot.lane.b32.xlu0 %v2031_v53, %s4053_s19  ;;  %v2033_v6 = vsel %vm6266_vm14, %v2030_v35, %v2032_v26  ;;  %v6268_v18 = vsel %vm4612_vm0, 4294967295, %v6267_v18  ;;  %v864_v28 = vadd.s32 4294967295, %v556_v22  ;;  %v3936_v63 = vunpack.i.l.s16 %v1106_v9  ;;  %vm1050_vm2 = vmpackc.low %vm892_vm12, %vm892_vm12 }
  0x8e   : > { %6269 = vst [vmem:[#allocation27_spill] sm:$0xff] %v6268_v18  ;;  %2064 = vrot.lane.b32.xlu1 %v2033_v6, %s4053_s19  ;;  %v570_v41 = vand.u32 15, %v450_v23  ;;  %v452_v8 = vadd.s32 128, %v4097_v1  ;;  %2082 = vrot.lane.b32.xlu2 %v1746_v4, %s4054_s20  ;;  %vm4623_vm14 = vmpackc.low %vm4515_vm13, %vm1167_vm11  ;;  %v6270_v53 = vmov 0  ;;  %v1080_v55 = vsel %vm1050_vm2, 65537, %v6218_v13 }
  0x8f   : > { %v6271_v53 = vsel %vm4623_vm14, 4294967295, %v6270_v53  ;;  %vm896_vm9 = vcmp.ge.s32.totalorder %v864_v28, 0  ;;  %v862_v35 = vadd.s32 4294967295, %v542_v11  ;;  %v460_v26 = vadd.s32 192, %v4097_v1 }
  0x90   : > { %6272 = vst [vmem:[#allocation28_spill] sm:$0xff] %v6271_v53  ;;  %vm1160_vm12 = vcmp.ne.s32.totalorder %v3936_v63, %v4285_v37  ;;  %v1110_v23 = vunpack.c.l.b16 %v1080_v55  ;;  %vm1054_vm3 = vmpackc.low %vm896_vm9, %vm896_vm9  ;;  %v866_v36 = vadd.s32 4294967295, %v570_v41  ;;  %v584_v4 = vand.u32 15, %v452_v8 }
  0x91   : > { %v1747_v30 = vsel %vm4612_vm0, %v4122_v38, 0  ;;  %vm4635_vm11 = vmpackc.low %vm4515_vm13, %vm1160_vm12  ;;  %v6273_v22 = vmov 0  ;;  %v1084_v9 = vsel %vm1054_vm3, 65537, %v6218_v13  ;;  %vm894_vm2 = vcmp.ge.s32.totalorder %v862_v35, 0 }
  0x92   : > { %v6274_v22 = vsel %vm4635_vm11, 4294967295, %v6273_v22  ;;  %v640_v6 = vand.u32 15, %v460_v26  ;;  %v1749_v28 = vsel %vm4623_vm14, %v4132_v43, 0  ;;  %v3940_v11 = vunpack.i.l.s16 %v1110_v23  ;;  %vm1052_vm9 = vmpackc.low %vm894_vm2, %vm894_vm2 }
  0x93   : > { %6275 = vst [vmem:[#allocation29_spill] sm:$0xff] %v6274_v22  ;;  %v1114_v63 = vunpack.c.l.b16 %v1084_v9  ;;  %vm898_vm6 = vcmp.ge.s32.totalorder %v866_v36, 0  ;;  %v1748_v41 = vsel %vm4635_vm11, %v4138_v45, 0  ;;  %v1082_v8 = vsel %vm1052_vm9, 65537, %v6218_v13  ;;  %v1968_v9 = vpop.permute.xlu2 %1967 }
  0x94   : > { %vm1056_vm12 = vmpackc.low %vm898_vm6, %vm898_vm6  ;;  %v868_v55 = vadd.s32 4294967295, %v584_v4  ;;  %v876_v10 = vadd.s32 4294967295, %v640_v6  ;;  %vm1174_vm3 = vcmp.ne.s32.totalorder %v3940_v11, %v4285_v37  ;;  %v1112_v26 = vunpack.c.l.b16 %v1082_v8 }
  0x95   : > { %v3944_v35 = vunpack.i.l.s16 %v1114_v63  ;;  %v1086_v21 = vsel %vm1056_vm12, 65537, %v6218_v13  ;;  %2084 = vrot.lane.b32.xlu0 %v1747_v30, %s4054_s20  ;;  %vm4652_vm2 = vmpackc.low %vm4515_vm13, %vm1174_vm3  ;;  %vm6167_vm9 = vcmask 31744   ;;  %v456_v53 = vadd.s32 160, %v4097_v1 }
  0x96   : > { %v1116_v36 = vunpack.c.l.b16 %v1086_v21  ;;  %vm900_vm4 = vcmp.ge.s32.totalorder %v868_v55, 0  ;;  %vm908_vm6 = vcmp.ge.s32.totalorder %v876_v10, 0  ;;  %2086 = vrot.lane.b32.xlu1 %v1748_v41, %s4054_s20  ;;  %v1257_v4 = vsel %vm4652_vm2, %v4132_v43, 0  ;;  %2088 = vrot.lane.b32.xlu2 %v1749_v28, %s4054_s20  ;;  %v4685_v55 = vpop.permute.xlu0 %1951 }
  0x97   : > { %vm1188_vm12 = vcmp.ne.s32.totalorder %v3944_v35, %v4285_v37  ;;  %v3942_v30 = vunpack.i.l.s16 %v1112_v26  ;;  %vm1058_vm8 = vmpackc.low %vm900_vm4, %vm900_vm4  ;;  %v4664_v6 = vsel %vm6167_vm9, %v1257_v4, %v4560_v62  ;;  %v6278_v21 = vmov 0 }
  0x98   : > { %vm4668_vm3 = vmpackc.low %vm4515_vm13, %vm1188_vm12  ;;  %v3946_v10 = vunpack.i.l.s16 %v1116_v36  ;;  %v1088_v11 = vsel %vm1058_vm8, 65537, %v6218_v13  ;;  %v458_v41 = vadd.s32 176, %v4097_v1  ;;  %v1750_v62 = vsel %vm4652_vm2, %v4135_v44, 0 }
  0x99   : > { %v6279_v21 = vsel %vm4668_vm3, 4294967295, %v6278_v21  ;;  %vm1181_vm10 = vcmp.ne.s32.totalorder %v3942_v30, %v4285_v37  ;;  %v1118_v63 = vunpack.c.l.b16 %v1088_v11  ;;  %vm1066_vm15 = vmpackc.low %vm908_vm6, %vm908_vm6  ;;  %v6281_v28 = vmov 0 }
  0x9a   : > { %6280 = vst [vmem:[#allocation30_spill] sm:$0xff] %v6279_v21  ;;  %vm4680_vm4 = vmpackc.low %vm4515_vm13, %vm1181_vm10  ;;  %v1096_v8 = vsel %vm1066_vm15, 65537, %v6218_v13  ;;  %v1255_v4 = vsel %vm4635_vm11, %v4122_v38, 0  ;;  %vm1195_vm10 = vcmp.ne.s32.totalorder %v3946_v10, %v4285_v37  ;;  %v626_v43 = vand.u32 15, %v458_v41 }
  0x9b   : > { %v6282_v28 = vsel %vm4680_vm4, 4294967295, %v6281_v28  ;;  %v1258_v35 = vsel %vm4680_vm4, %v4135_v44, 0  ;;  %v3948_v26 = vunpack.i.l.s16 %v1118_v63  ;;  %v1126_v36 = vunpack.c.l.b16 %v1096_v8  ;;  %v1956_v8 = vpop.permute.xlu1 %1955  ;;  %vm4718_vm6 = vmpackc.low %vm4515_vm13, %vm1195_vm10 }
  0x9c   : > { %6283 = vst [vmem:[#allocation31_spill] sm:$0xff] %v6282_v28  ;;  %v1751_v30 = vsel %vm4680_vm4, %v4153_v2, 0  ;;  %v4698_v11 = vsel %vm6167_vm9, %v1258_v35, %v4606_v31  ;;  %v1752_v63 = vsel %vm4668_vm3, %v4175_v19, 0  ;;  %v874_v31 = vadd.s32 4294967295, %v626_v43 }
  0x9d   : > { %vm1202_vm8 = vcmp.ne.s32.totalorder %v3948_v26, %v4285_v37  ;;  %2090 = vrot.lane.b32.xlu0 %v1750_v62, %s4054_s20  ;;  %v4713_v35 = vsel %vm6167_vm9, %v1255_v4, %v1956_v8  ;;  %v6286_v10 = vmov 0  ;;  %v3956_v62 = vunpack.i.l.s16 %v1126_v36  ;;  %v1974_v26 = vpop.permute.xlu2 %1973 }
  0x9e   : > { %vm4708_vm15 = vmpackc.low %vm4515_vm13, %vm1202_vm8  ;;  %2092 = vrot.lane.b32.xlu1 %v1751_v30, %s4054_s20  ;;  %v6287_v10 = vsel %vm4718_vm6, 4294967295, %v6286_v10  ;;  %2094 = vrot.lane.b32.xlu2 %v1752_v63, %s4054_s20  ;;  %vm906_vm12 = vcmp.ge.s32.totalorder %v874_v31, 0  ;;  %v1254_v4 = vsel %vm4612_vm0, %v4126_v39, 0  ;;  %v464_v30 = vadd.s32 224, %v4097_v1  ;;  %v1954_v28 = vpop.permute.xlu0 %1953 }
  0x9f   : > { %6288 = vst [vmem:[#allocation32_spill] sm:$0xff] %v6287_v10  ;;  %v1261_v41 = vsel %vm4708_vm15, %v4195_v52, 0  ;;  %vm1064_vm10 = vmpackc.low %vm906_vm12, %vm906_vm12  ;;  %v1753_v8 = vsel %vm4718_vm6, %v4195_v52, 0  ;;  %vm1230_vm8 = vcmp.ne.s32.totalorder %v3956_v62, %v4285_v37  ;;  %v4739_v31 = vsel %vm6167_vm9, %v1254_v4, %v1954_v28 }
  0xa0   : > { %v4727_v43 = vsel %vm6167_vm9, %v1261_v41, %v1968_v9  ;;  %v1094_v36 = vsel %vm1064_vm10, 65537, %v6218_v13  ;;  %v668_v63 = vand.u32 15, %v464_v30  ;;  %v1256_v41 = vsel %vm4623_vm14, %v4138_v45, 0  ;;  %vm4757_vm12 = vmpackc.low %vm4515_vm13, %vm1230_vm8 }
  0xa1   : > { %6289 = vst [vmem:[#allocation33_spill] sm:$0xff] %v4727_v43  ;;  %v1124_v9 = vunpack.c.l.b16 %v1094_v36  ;;  %v1754_v43 = vsel %vm4708_vm15, %v4198_v56, 0  ;;  %v1777_v52 = vsel %vm4442_vm1, %v4198_v56, 0  ;;  %v1778_v62 = vsel %vm4458_vm5, %v4209_v0, 0 }
  0xa2   : > { %v880_v18 = vadd.s32 4294967295, %v668_v63  ;;  %v454_v4 = vadd.s32 144, %v4097_v1  ;;  %v4771_v60 = vrot.slane %v1778_v62, 1  ;;  %v1758_v62 = vsel %vm4757_vm12, %v4246_v57, 0 }
  0xa3   : > { %v3954_v30 = vunpack.i.l.s16 %v1124_v9  ;;  %v1958_v28 = vpop.permute.xlu1 %1957  ;;  %v612_v32 = vand.u32 15, %v456_v53  ;;  %v1811_v22 = vsel %vm4458_vm5, %v4213_v12, 0  ;;  %v6307_v5 = vmov 0 }
  0xa4   : > { %vm912_vm10 = vcmp.ge.s32.totalorder %v880_v18, 0  ;;  %v4762_v63 = vsel %vm6167_vm9, %v1256_v41, %v1958_v28  ;;  %v598_v9 = vand.u32 15, %v454_v4  ;;  %v6293_v18 = vmov 0 }
  0xa5   : > { %2096 = vrot.lane.b32.xlu0 %v1753_v8, %s4054_s20  ;;  %vm1223_vm14 = vcmp.ne.s32.totalorder %v3954_v30, %v4285_v37  ;;  %vm1070_vm11 = vmpackc.low %vm912_vm10, %vm912_vm10  ;;  %v4769_v8 = vrot.slane %v1777_v52, 1  ;;  %v1259_v41 = vsel %vm4668_vm3, %v4153_v2, 0  ;;  %vm6297_vm10 = vnez %v6247_v16 }
  0xa6   : > { %2098 = vrot.lane.b32.xlu1 %v1754_v43, %s4054_s20  ;;  %2138 = vrot.lane.b32.xlu2 %v4240_v50, %s4055_s21  ;;  %vm4775_vm8 = vmpackc.low %vm4515_vm13, %vm1223_vm14  ;;  %v1100_v43 = vsel %vm1070_vm11, 65537, %v6218_v13  ;;  %v870_v28 = vadd.s32 4294967295, %v598_v9  ;;  %v1980_v50 = vpop.permute.xlu2 %1979  ;;  %v1964_v61 = vpop.permute.xlu0 %1963  ;;  %vm6296_vm11 = vcmask 1046528   ;;  %v1782_v53 = vsel %vm6297_vm10, %v4257_v54, 0 }
  0xa7   : > { %6292 = vst [vmem:[#allocation34_spill] sm:$0xff] %v4769_v8  ;;  %v6294_v18 = vsel %vm4775_vm8, 4294967295, %v6293_v18  ;;  %v1264_v30 = vsel %vm4775_vm8, %v4213_v12, 0  ;;  %v1130_v52 = vunpack.c.l.b16 %v1100_v43  ;;  %v4793_v21 = vsel %vm6167_vm9, %v1259_v41, %v1964_v61 }
  0xa8   : > { %6295 = vst [vmem:[#allocation35_spill] sm:$0xff] %v6294_v18  ;;  %v4790_v4 = vsel %vm6167_vm9, %v1264_v30, %v1974_v26  ;;  %v1260_v18 = vsel %vm4718_vm6, %v4175_v19, 0  ;;  %vm902_vm14 = vcmp.ge.s32.totalorder %v870_v28, 0  ;;  %v2189_v9 = vsel %vm6296_vm11, %v4769_v8, %v4771_v60 }
  0xa9   : > { %v3960_v3 = vunpack.i.l.s16 %v1130_v52  ;;  %v1781_v26 = vsel %vm4502_vm7, %v4246_v57, 0  ;;  %vm1060_vm8 = vmpackc.low %vm902_vm14, %vm902_vm14  ;;  %v872_v61 = vadd.s32 4294967295, %v612_v32  ;;  %v6298_v30 = vmov 0 }
  0xaa   : > { %v1090_v41 = vsel %vm1060_vm8, 65537, %v6218_v13  ;;  %vm6300_vm6 = vcmask 31744   ;;  %v4822_v32 = vrot.slane %v1782_v53, 1  ;;  %v466_v53 = vadd.s32 240, %v4097_v1 }
  0xab   : > { %vm1244_vm9 = vcmp.ne.s32.totalorder %v3960_v3, %v4285_v37  ;;  %v1966_v43 = vpop.permute.xlu1 %1965  ;;  %v1120_v28 = vunpack.c.l.b16 %v1090_v41  ;;  %vm904_vm3 = vcmp.ge.s32.totalorder %v872_v61, 0  ;;  %v4820_v3 = vrot.slane %v1781_v26, 1  ;;  %vm6302_vm8 = vmmov %vm6300_vm6 }
  0xac   : > { %vm4812_vm11 = vmpackc.low %vm4515_vm13, %vm1244_vm9  ;;  %v4817_v52 = vsel %vm6300_vm6, %v1260_v18, %v1966_v43  ;;  %vm6177_vm6 = vcmask 64512   ;;  %v1794_v8 = vsel %vm4708_vm15, %v4209_v0, 0 }
  0xad   : > { %2106 = vrot.lane.b32.xlu0 %v1758_v62, %s4054_s20  ;;  %v6299_v30 = vsel %vm4812_vm11, 4294967295, %v6298_v30  ;;  %6301 = vst [vmem:[#allocation36_spill] sm:$0xff] %v4820_v3  ;;  %v1267_v62 = vsel %vm4812_vm11, %v4257_v54, 0  ;;  %vm1062_vm9 = vmpackc.low %vm904_vm3, %vm904_vm3  ;;  %v3950_v43 = vunpack.i.l.s16 %v1120_v28  ;;  %vm6303_vm3 = vcmask 1046528  }
  0xae   : > { %2220 = vrot.lane.b32.xlu1 %v2189_v9, %s4056_s22  ;;  %2146 = vrot.lane.b32.xlu2 %v4291_v49, %s4055_s21  ;;  %v4830_v18 = vsel %vm6302_vm8, %v1267_v62, %v1980_v50  ;;  %v1092_v61 = vsel %vm1062_vm9, 65537, %v6218_v13  ;;  %v462_v9 = vadd.s32 208, %v4097_v1  ;;  %v1970_v41 = vpop.permute.xlu0 %1969  ;;  %v2197_v50 = vsel %vm6303_vm3, %v4820_v3, %v4822_v32  ;;  %vm6306_vm15 = vmmov %vm6302_vm8 }
  0xaf   : > { %v1122_v26 = vunpack.c.l.b16 %v1092_v61  ;;  %vm1209_vm14 = vcmp.ne.s32.totalorder %v3950_v43, %v4285_v37  ;;  %v682_v62 = vand.u32 15, %v466_v53  ;;  %v1810_v43 = vsel %vm4442_vm1, %v4209_v0, 0  ;;  %v2037_v61 = vpop.permute.xlu2 %2036 }
  0xb0   : > { %v654_v10 = vand.u32 15, %v462_v9  ;;  %vm4844_vm9 = vmpackc.low %vm4515_vm13, %vm1209_vm14  ;;  %v4859_v3 = vsel %vm6177_vm6, %v4739_v31, %v2037_v61  ;;  %v1763_v61 = vunpack.c.h.b16 %v4320_v58 }
  0xb1   : > { %v3952_v1 = vunpack.i.l.s16 %v1122_v26  ;;  %v1262_v9 = vsel %vm4844_vm9, %v4198_v56, 0  ;;  %v882_v53 = vadd.s32 4294967295, %v682_v62 }
  0xb2   : > { %v878_v49 = vadd.s32 4294967295, %v654_v10  ;;  %v4862_v26 = vsel %vm6306_vm15, %v1262_v9, %v1970_v41  ;;  %v4873_v10 = vrot.slane %v1810_v43, 1  ;;  %v1762_v43 = vunpack.c.l.b16 %v4320_v58 }
  0xb3   : > { %vm1216_vm8 = vcmp.ne.s32.totalorder %v3952_v1, %v4285_v37  ;;  %v1972_v46 = vpop.permute.xlu1 %1971  ;;  %vm914_vm3 = vcmp.ge.s32.totalorder %v882_v53, 0  ;;  %v1814_v58 = vsel %vm4502_vm7, %v4257_v54, 0  ;;  %vm4919_vm7 = vcmp.ne.s32.totalorder %v1763_v61, %v4288_v42 }
  0xb4   : > { %vm4868_vm1 = vmpackc.low %vm4515_vm13, %vm1216_vm8  ;;  %vm910_vm5 = vcmp.ge.s32.totalorder %v878_v49, 0  ;;  %v1265_v49 = vsel %vm4757_vm12, %v4216_v15, 0  ;;  %v6317_v42 = vmov 0 }
  0xb5   : > { %2268 = vrot.lane.b32.xlu0 %v1794_v8, %s4057_s23  ;;  %v6308_v5 = vsel %vm4868_vm1, 4294967295, %v6307_v5  ;;  %v1263_v31 = vsel %vm4868_vm1, %v4209_v0, 0  ;;  %vm1068_vm14 = vmpackc.low %vm910_vm5, %vm910_vm5  ;;  %v4880_v8 = vrot.slane %v1811_v22, 1  ;;  %vm6329_vm1 = vnez %v6251_v24 }
  0xb6   : > { %2228 = vrot.lane.b32.xlu1 %v2197_v50, %s4056_s22  ;;  %2304 = vrot.lane.b32.xlu2 %v4243_v51, %s4058_s24  ;;  %v4883_v41 = vsel %vm6306_vm15, %v1263_v31, %v1972_v46  ;;  %v1098_v50 = vsel %vm1068_vm14, 65537, %v6218_v13  ;;  %vm1072_vm8 = vmpackc.low %vm914_vm3, %vm914_vm3  ;;  %v1976_v9 = vpop.permute.xlu0 %1975  ;;  %v1798_v46 = vsel %vm4757_vm12, %v4257_v54, 0  ;;  %vm6310_vm14 = vcmask 1046528  }
  0xb7   : > { %v1128_v1 = vunpack.c.l.b16 %v1098_v50  ;;  %v1102_v62 = vsel %vm1072_vm8, 65537, %v6218_v13  ;;  %vm6309_vm5 = vmmov %vm6306_vm15  ;;  %v2354_v50 = vsel %vm6310_vm14, %v4873_v10, %v4880_v8  ;;  %v2043_v56 = vpop.permute.xlu2 %2042  ;;  %vm4914_vm3 = vcmp.ne.s32.totalorder %v1762_v43, %v4285_v37 }
  0xb8   : > { %v1132_v22 = vunpack.c.l.b16 %v1102_v62  ;;  %v4896_v53 = vsel %vm6309_vm5, %v1265_v49, %v1976_v9  ;;  %v4906_v62 = vsel %vm6177_vm6, %v4664_v6, %v2043_v56  ;;  %v1815_v49 = vsel %vm6297_vm10, %v4263_v20, 0  ;;  %vm6319_vm14 = vmmov %vm6309_vm5 }
  0xb9   : > { %v3958_v31 = vunpack.i.l.s16 %v1128_v1  ;;  %v4946_v43 = vrot.slane %v1814_v58, 1  ;;  %v4948_v61 = vrot.slane %v1815_v49, 1 }
  0xba   : > { %v3962_v13 = vunpack.i.l.s16 %v1132_v22 }
  0xbb   : > { %vm1237_vm12 = vcmp.ne.s32.totalorder %v3958_v31, %v4285_v37  ;;  %v1978_v36 = vpop.permute.xlu1 %1977 }
  0xbc   : > { %vm4925_vm15 = vmpackc.low %vm4515_vm13, %vm1237_vm12  ;;  %vm1251_vm8 = vcmp.ne.s32.totalorder %v3962_v13, %v4285_v37  ;;  %vm6320_vm12 = vnez %v6204_v48 }
  0xbd   : > { %2276 = vrot.lane.b32.xlu0 %v1798_v46, %s4057_s23  ;;  %v1266_v16 = vsel %vm4925_vm15, %v4246_v57, 0  ;;  %vm4936_vm10 = vmpackc.low %vm4515_vm13, %vm1251_vm8  ;;  %v1770_v46 = vsel %vm6320_vm12, %v4122_v38, 0  ;;  %vm6321_vm8 = vcmask 1046528  }
  0xbe   : > { %2384 = vrot.lane.b32.xlu1 %v2354_v50, %s4059_s25  ;;  %v6318_v42 = vsel %vm4936_vm10, 4294967295, %v6317_v42  ;;  %2312 = vrot.lane.b32.xlu2 %v4296_v59, %s4058_s24  ;;  %v2441_v6 = vsel %vm6309_vm5, %v1266_v16, %v1978_v36  ;;  %v1268_v37 = vsel %vm4936_vm10, %v4263_v20, 0  ;;  %vm6176_vm13 = vmpackc.low %vm4919_vm7, %vm4914_vm3  ;;  %v1982_v27 = vpop.permute.xlu0 %1981  ;;  %v2362_v31 = vsel %vm6321_vm8, %v4946_v43, %v4948_v61 }
  0xbf   : > { %v4955_v9 = vsel %vm6319_vm14, %v1268_v37, %v1982_v27  ;;  %v1769_v22 = vsel %vm6176_vm13, %v4126_v39, 0  ;;  %vm6322_vm5 = vnez %v6212_v40  ;;  %vm6323_vm14 = vnez %v6214_v33 }
  0xc0   : > { %v1773_v50 = vsel %vm6322_vm5, %v4135_v44, 0  ;;  %v1774_v13 = vsel %vm6323_vm14, %v4153_v2, 0  ;;  %v2171_v39 = vrot.slane %v1769_v22, 1  ;;  %v4979_v58 = vrot.slane %v1770_v46, 1 }
  0xc1   : > { %v4982_v36 = vrot.slane %v1773_v50, 1  ;;  %v4984_v49 = vrot.slane %v1774_v13, 1  ;;  %vm6324_vm8 = vcmask 31744   ;;  %vm6325_vm13 = vcmask 1046528  }
  0xc2   : > { %v2402_v16 = vsel %vm6324_vm8, 0, %v4685_v55  ;;  %v2173_v37 = vsel %vm6325_vm13, %v2171_v39, %v4979_v58  ;;  %vm6326_vm6 = vmmov %vm6325_vm13  ;;  %vm6327_vm10 = vcmask 64512   ;;  %v1786_v50 = vsel %vm6329_vm1, %v4122_v38, 0 }
  0xc3   : > { %v2181_v22 = vsel %vm6326_vm6, %v4982_v36, %v4984_v49  ;;  %vm6328_vm11 = vmmov %vm6327_vm10  ;;  %v1807_v1 = vsel %vm6323_vm14, %v4175_v19, 0  ;;  %vm6341_vm8 = vnez %v6249_v25 }
  0xc4   : > { %v2049_v27 = vpop.permute.xlu2 %2048  ;;  %vm6330_vm13 = vmmov %vm6327_vm10 }
  0xc5   : > { %2122 = vrot.lane.b32.xlu0 %v4158_v7, %s4055_s21  ;;  %v2035_v7 = vpop.permute.xlu1 %2034  ;;  %v4995_v46 = vsel %vm6327_vm10, %v4817_v52, %v2049_v27  ;;  %v1790_v52 = vsel %vm4652_vm2, %v4153_v2, 0  ;;  %vm6332_vm6 = vmmov %vm6327_vm10  ;;  %v1806_v27 = vsel %vm6322_vm5, %v4153_v2, 0  ;;  %vm6337_vm10 = vnez %v6233_v17 }
  0xc6   : > { %2130 = vrot.lane.b32.xlu1 %v4184_v29, %s4055_s21  ;;  %2392 = vrot.lane.b32.xlu2 %v2362_v31, %s4059_s25  ;;  %v2450_v31 = vsel %vm6328_vm11, %v2402_v16, %v2035_v7  ;;  %vm6331_vm11 = vmpackc.low %vm4919_vm7, %vm4914_vm3  ;;  %vm6335_vm3 = vcmask 1046528   ;;  %v1755_v7 = vsel %vm4844_vm9, %v4209_v0, 0  ;;  %v1759_v0 = vsel %vm4925_vm15, %v4257_v54, 0 }
  0xc7   : > { %v2039_v55 = vpop.permute.xlu0 %2038  ;;  %v1802_v24 = vsel %vm6331_vm11, %v4122_v38, 0  ;;  %vm6333_vm1 = vmmov %vm6332_vm6 }
  0xc8   : > { %v5006_v13 = vsel %vm6330_vm13, %v4713_v35, %v2039_v55  ;;  %v2336_v38 = vrot.slane %v1802_v24, 1  ;;  %vm6334_vm2 = vmmov %vm6333_vm1  ;;  %v1783_v24 = vsel %vm6341_vm8, %v4263_v20, 0  ;;  %vm2481_vm13 = vcmask 97280  }
  0xc9   : > { %vm6336_vm7 = vmmov %vm6335_vm3 }
  0xca   : > { %vm6339_vm5 = vmmov %vm6333_vm1 }
  0xcb   : > { %vm6340_vm14 = vmmov %vm6335_vm3 }
  0xcc   : > { %vm6342_vm11 = vmmov %vm6333_vm1 }
  0xcd   : > { %2204 = vrot.lane.b32.xlu0 %v2173_v37, %s4056_s22  ;;  %v2041_v39 = vpop.permute.xlu1 %2040  ;;  %v1803_v37 = vsel %vm6320_vm12, %v4138_v45, 0  ;;  %vm6338_vm12 = vmmov %vm6333_vm1 }
  0xce   : > { %2212 = vrot.lane.b32.xlu1 %v2181_v22, %s4056_s22  ;;  %2252 = vrot.lane.b32.xlu2 %v1786_v50, %s4057_s23  ;;  %v2055_v16 = vpop.permute.xlu2 %2054  ;;  %v2456_v35 = vsel %vm6332_vm6, %v4762_v63, %v2041_v39  ;;  %v5035_v48 = vrot.slane %v1803_v37, 1  ;;  %v5039_v63 = vrot.slane %v1806_v27, 1  ;;  %v1779_v22 = vsel %vm6337_vm10, %v4213_v12, 0  ;;  %vm6343_vm6 = vmmov %vm6335_vm3 }
  0xcf   : > { %v5024_v23 = vsel %vm6333_vm1, %v4883_v41, %v2055_v16  ;;  %v5041_v41 = vrot.slane %v1807_v1, 1  ;;  %v2045_v2 = vpop.permute.xlu0 %2044 }
  0xd0   : > { %v5045_v40 = vsel %vm6334_vm2, %v4698_v11, %v2045_v2  ;;  %v2338_v33 = vsel %vm6335_vm3, %v2336_v38, %v5035_v48  ;;  %v5061_v11 = vrot.slane %v1779_v22, 1  ;;  %v6348_v22 = vld [vmem:[#allocation19_spill] sm:$0xff] }
  0xd1   : > { %v2346_v34 = vsel %vm6336_vm7, %v5039_v63, %v5041_v41 }
  0xd2   : > { %v2191_v16 = vsel %vm6340_vm14, %v4771_v60, %v5061_v11  ;;  %vm2736_vm14 = vcmask 1041408  }
  0xd5   : > { %2260 = vrot.lane.b32.xlu0 %v1790_v52, %s4057_s23 }
  0xd6   : > { %2288 = vrot.lane.b32.xlu1 %v4166_v14, %s4058_s24  ;;  %2296 = vrot.lane.b32.xlu2 %v4190_v47, %s4058_s24 }
  0xdb   : > { %v2047_v50 = vpop.permute.xlu1 %2046 }
  0xdc   : > { %v2462_v52 = vsel %vm6338_vm12, %v4793_v21, %v2047_v50  ;;  %v6350_v50 = vld [vmem:[#allocation18_spill] sm:$0xff] }
  0xdd   : > { %2368 = vrot.lane.b32.xlu0 %v2338_v33, %s4059_s25  ;;  %v6346_v33 = vld [vmem:[#allocation12_spill] sm:$0xff] }
  0xde   : > { %2376 = vrot.lane.b32.xlu1 %v2346_v34, %s4059_s25  ;;  %2100 = vrot.lane.b32.xlu2 %v1755_v7, %s4054_s20  ;;  %v6347_v7 = vld [vmem:[#allocation15_spill] sm:$0xff] }
  0xdf   : > { %v1816_v56 = vsel %vm6341_vm8, %v6347_v7, 0  ;;  %vm6366_vm8 = vnez %v6308_v5  ;;  %v6375_v5 = vld [vmem:[#allocation13_spill] sm:$0xff] }
  0xe0   : > { %v2061_v55 = vpop.permute.xlu2 %2060 }
  0xe1   : > { %v5066_v39 = vsel %vm6339_vm5, %v2441_v6, %v2061_v55  ;;  %v5080_v21 = vpop.permute.xlu0 %2050  ;;  %v5083_v6 = vrot.slane %v1783_v24, 1  ;;  %v6351_v55 = vld [vmem:[#allocation21_spill] sm:$0xff] }
  0xe2   : > { %vm6352_vm2 = vnez %v6351_v55 }
  0xe3   : > { %v2199_v1 = vsel %vm6343_vm6, %v4822_v32, %v5083_v6  ;;  %vm6369_vm6 = vnez %v6299_v30  ;;  %v6381_v30 = vld [vmem:[#allocation17_spill] sm:$0xff] }
  0xe5   : > { %2140 = vrot.lane.b32.xlu0 %v4243_v51, %s4055_s21  ;;  %v1795_v51 = vsel %vm4844_vm9, %v4213_v12, 0  ;;  %vm6344_vm9 = vmmov %vm6333_vm1 }
  0xe6   : > { %2108 = vrot.lane.b32.xlu1 %v1759_v0, %s4054_s20  ;;  %2222 = vrot.lane.b32.xlu2 %v2191_v16, %s4056_s22  ;;  %v2053_v60 = vpop.permute.xlu1 %2052  ;;  %vm6345_vm1 = vmmov %vm6335_vm3  ;;  %v1775_v0 = vsel %vm6352_vm2, %v4175_v19, 0 }
  0xe7   : > { %v5093_v27 = vsel %vm6342_vm11, %v4862_v26, %v2053_v60  ;;  %vm6353_vm3 = vmmov %vm6339_vm5  ;;  %v5152_v60 = vrot.slane %v1775_v0, 1  ;;  %v1791_v0 = vsel %vm4680_vm4, %v4175_v19, 0 }
  0xe8   : > { %v2083_v54 = vpop.permute.xlu2 %2082  ;;  %vm6354_vm7 = vmmov %vm6353_vm3 }
  0xe9   : > { %v5086_v37 = vsel %vm2481_vm13, %v2450_v31, %v2083_v54  ;;  %v1812_v31 = vsel %vm6337_vm10, %v4216_v15, 0  ;;  %vm6355_vm10 = vmmov %vm6345_vm1 }
  0xea   : > { %v2057_v38 = vpop.permute.xlu0 %2056  ;;  %v5109_v26 = vrot.slane %v1812_v31, 1  ;;  %vm6356_vm12 = vmmov %vm6345_vm1 }
  0xeb   : > { %v5107_v28 = vsel %vm6344_vm9, %v4790_v4, %v2057_v38  ;;  %vm6357_vm5 = vmmov %vm6345_vm1 }
  0xec   : > { %v2356_v17 = vsel %vm6345_vm1, %v4880_v8, %v5109_v26  ;;  %v2183_v38 = vsel %vm6357_vm5, %v4984_v49, %v5152_v60 }
  0xed   : > { %2148 = vrot.lane.b32.xlu0 %v4296_v59, %s4055_s21  ;;  %v1799_v59 = vsel %vm4925_vm15, %v4263_v20, 0  ;;  %vm6349_vm15 = vnez %v6348_v22  ;;  %v6362_v22 = vld [vmem:[#allocation6_spill] sm:$0xff] }
  0xee   : > { %2270 = vrot.lane.b32.xlu1 %v1795_v51, %s4057_s23  ;;  %2230 = vrot.lane.b32.xlu2 %v2199_v1, %s4056_s22  ;;  %v1771_v8 = vsel %vm6349_vm15, %v4138_v45, 0 }
  0xef   : > { %v5146_v25 = vrot.slane %v1771_v8, 1  ;;  %v1760_v8 = vsel %vm6369_vm6, %v4263_v20, 0 }
  0xf0   : > { %v2089_v2 = vpop.permute.xlu2 %2088 }
  0xf1   : > { %v5112_v32 = vsel %vm2481_vm13, %v2456_v35, %v2089_v2 }
  0xf5   : > { %2306 = vrot.lane.b32.xlu0 %v6346_v33, %s4058_s24 }
  0xf6   : > { %2278 = vrot.lane.b32.xlu1 %v1799_v59, %s4057_s23  ;;  %2386 = vrot.lane.b32.xlu2 %v2356_v17, %s4059_s25  ;;  %v5124_v4 = vpop.permute.xlu1 %2058 }
  0xf8   : > { %v2095_v34 = vpop.permute.xlu2 %2094 }
  0xf9   : > { %v5127_v35 = vsel %vm2481_vm13, %v2462_v52, %v2095_v34  ;;  %v5142_v52 = vrot.slane %v1816_v56, 1  ;;  %v4011_v34 = vld [vmem:[%s6079_s1 + $0x8] sm:$0xff] }
  0xfb   : > { %v2364_v1 = vsel %vm6355_vm10, %v4948_v61, %v5142_v52 }
  0xfd   : > { %2314 = vrot.lane.b32.xlu0 %v6350_v50, %s4058_s24 }
  0xfe   : > { %2124 = vrot.lane.b32.xlu1 %v4166_v14, %s4055_s21  ;;  %2132 = vrot.lane.b32.xlu2 %v4190_v47, %s4055_s21  ;;  %v2683_v47 = vld [vmem:[%s6079_s1 + $0x10] sm:$0x3] }
  0xff   : > { %v2063_v16 = vpop.permute.xlu0 %2062  ;;  %v2697_v31 = vunpack.c.l.b16 %v2683_v47 }
 0x100   : > { %v5150_v24 = vsel %vm6353_vm3, %v4830_v18, %v2063_v16  ;;  %v2065_v54 = vpop.permute.xlu1 %2064  ;;  %v5154_v51 = vpop.permute.xlu2 %2138  ;;  %v2175_v18 = vsel %vm6356_vm12, %v4979_v58, %v5146_v25  ;;  %v6360_v16 = vld [vmem:[#allocation4_spill] sm:$0xff]  ;;  %vm2580_vm12 = vcmask 195584  }
 0x101   : > { %v5158_v14 = vsel %vm6354_vm7, %v4955_v9, %v2065_v54  ;;  %v2700_v9 = vpack.c.b16 %v2697_v31, %v2697_v31  ;;  %v1804_v54 = vsel %vm6349_vm15, %v6360_v16, 0  ;;  %vm6374_vm15 = vmmov %vm6353_vm3  ;;  %vm2547_vm7 = vcmask 162816  }
 0x102   : > { %v5210_v47 = vrot.slane %v1804_v54, 1  ;;  %vm6378_vm10 = vmmov %vm6374_vm15 }
 0x103   : > { %v2738_v2 = vsel %vm2736_vm14, %v2700_v9, 0 }
 0x104   : > { %4013 = vmatpush.bf16.msra.mxu2 %v2738_v2  ;;  %4014 = vmatpush.bf16.msra.mxu3 %v2738_v2 }
 0x105   : > { %2394 = vrot.lane.b32.xlu0 %v2364_v1, %s4059_s25  ;;  %2745 = vmatpush.bf16.msra.mxu0 %v2738_v2 }
 0x106   : > { %2206 = vrot.lane.b32.xlu1 %v2175_v18, %s4056_s22  ;;  %2214 = vrot.lane.b32.xlu2 %v2183_v38, %s4056_s22 }
 0x107   : > { %v2085_v61 = vpop.permute.xlu0 %2084  ;;  %4012 = vmatpush.bf16.msra.mxu1 %v2738_v2  ;;  %v6365_v2 = vld [vmem:[#allocation9_spill] sm:$0xff] }
 0x108   : > { %v5178_v59 = vsel %vm2481_vm13, %v4859_v3, %v2085_v61  ;;  %v2087_v58 = vpop.permute.xlu1 %2086  ;;  %v5180_v17 = vpop.permute.xlu2 %2146  ;;  %v1787_v3 = vsel %vm4612_vm0, %v4138_v45, 0  ;;  %4016 = vmatpush.bf16.msra.mxu2 %v4011_v34  ;;  %4017 = vmatpush.bf16.msra.mxu3 %v4011_v34  ;;  %v4010_v45 = vld [vmem:[%s6079_s1] sm:$0xff]  ;;  %vm6363_vm0 = vmmov %vm6345_vm1 }
 0x109   : > { %v5184_v49 = vsel %vm2481_vm13, %v5006_v13, %v2087_v58  ;;  %v6361_v13 = vld [vmem:[#allocation7_spill] sm:$0xff]  ;;  %2746 = vmatpush.bf16.msra.mxu0 %v4011_v34  ;;  %v2340_v9 = vsel %vm6363_vm0, %v5035_v48, %v5210_v47  ;;  %vm6364_vm4 = vmmov %vm6363_vm0  ;;  %v1756_v48 = vsel %vm6366_vm8, %v4213_v12, 0 }
 0x10a   : > { %v1808_v1 = vsel %vm6352_vm2, %v6361_v13, 0  ;;  %vm6370_vm9 = vmmov %vm6363_vm0  ;;  %vm2514_vm2 = vcmask 130048  }
 0x10b   : > { %4015 = vmatpush.bf16.msra.mxu1 %v4011_v34  ;;  %v5212_v31 = vrot.slane %v1808_v1, 1  ;;  %vm6379_vm5 = vmmov %vm6363_vm0  ;;  %vm2613_vm0 = vcmask 228352  }
 0x10c   : > { %4019 = vmatpush.bf16.msra.mxu2 %v4010_v45  ;;  %4020 = vmatpush.bf16.msra.mxu3 %v4010_v45 }
 0x10d   : > { %2254 = vrot.lane.b32.xlu0 %v1787_v3, %s4057_s23  ;;  %2747 = vmatpush.bf16.msra.mxu0 %v4010_v45  ;;  %v2348_v61 = vsel %vm6364_vm4, %v5041_v41, %v5212_v31  ;;  %v6367_v41 = vld [vmem:[#allocation23_spill] sm:$0xff]  ;;  %vm2646_vm4 = vcmask 261120  }
 0x10e   : > { %2262 = vrot.lane.b32.xlu1 %v1791_v0, %s4057_s23  ;;  %2290 = vrot.lane.b32.xlu2 %v6362_v22, %s4058_s24  ;;  %vm6368_vm11 = vnez %v6367_v41 }
 0x10f   : > { %v5206_v19 = vpop.permute.xlu0 %2090  ;;  %4018 = vmatpush.bf16.msra.mxu1 %v4010_v45  ;;  %v1780_v3 = vsel %vm6368_vm11, %v4216_v15, 0  ;;  %v6371_v45 = vld [vmem:[#allocation26_spill] sm:$0xff] }
 0x110   : > { %v2093_v18 = vpop.permute.xlu1 %2092  ;;  %v5214_v55 = vpop.permute.xlu2 %2304  ;;  %vm6372_vm1 = vnez %v6371_v45 }
 0x111   : > { %v5218_v38 = vsel %vm2481_vm13, %v5045_v40, %v2093_v18  ;;  %v1784_v20 = vsel %vm6372_vm1, %v6347_v7, 0  ;;  %v1796_v18 = vsel %vm6366_vm8, %v4216_v15, 0  ;;  %vm2703_vm8 = vcmask 293888  }
 0x115   : > { %2298 = vrot.lane.b32.xlu0 %v6365_v2, %s4058_s24 }
 0x116   : > { %2370 = vrot.lane.b32.xlu1 %v2340_v9, %s4059_s25  ;;  %2378 = vrot.lane.b32.xlu2 %v2348_v61, %s4059_s25  ;;  %v6373_v9 = vld [vmem:[#allocation33_spill] sm:$0xff] }
 0x117   : > { %v2097_v58 = vpop.permute.xlu0 %2096  ;;  %v2466_v61 = vsel %vm6374_vm15, %v6373_v9, %v5080_v21  ;;  %v2114_v9 = vshrl.u32 %v6347_v7, 16 }
 0x118   : > { %v5232_v40 = vsel %vm2481_vm13, %v4995_v46, %v2097_v58  ;;  %v2099_v34 = vpop.permute.xlu1 %2098  ;;  %v2313_v56 = vpop.permute.xlu2 %2312  ;;  %v5246_v46 = vrot.slane %v1780_v3, 1  ;;  %v6376_v3 = vld [vmem:[#allocation3_spill] sm:$0xff] }
 0x119   : > { %v2499_v58 = vsel %vm2481_vm13, %v2466_v61, %v2099_v34  ;;  %vm6377_vm3 = vnez %v6376_v3  ;;  %v1813_v34 = vsel %vm6368_vm11, %v4246_v57, 0  ;;  %vm6382_vm11 = vmmov %vm6379_vm5 }
 0x11a   : > { %v2193_v1 = vsel %vm6370_vm9, %v5061_v11, %v5246_v46 }
 0x11d   : > { %2102 = vrot.lane.b32.xlu0 %v1756_v48, %s4054_s20 }
 0x11e   : > { %2142 = vrot.lane.b32.xlu1 %v6346_v33, %s4055_s21  ;;  %2110 = vrot.lane.b32.xlu2 %v1760_v8, %s4054_s20  ;;  %v5261_v33 = vrot.slane %v1784_v20, 1  ;;  %v5271_v8 = vsel %vm6377_vm3, %v6375_v5, 0 }
 0x11f   : > { %v2107_v0 = vpop.permute.xlu0 %2106  ;;  %v2118_v61 = vshll.u32 %v5271_v8, 16 }
 0x120   : > { %v2221_v54 = vpop.permute.xlu1 %2220  ;;  %v2393_v12 = vpop.permute.xlu2 %2392  ;;  %v2201_v21 = vsel %vm6379_vm5, %v5083_v6, %v5261_v33 }
 0x121   : > { %v5304_v5 = vrot.slane %v2118_v61, 1 }
 0x125   : > { %2224 = vrot.lane.b32.xlu0 %v2193_v1, %s4056_s22  ;;  %v2474_v1 = vsel %vm6378_vm10, %v4896_v53, %v5124_v4  ;;  %v1800_v4 = vsel %vm6369_vm6, %v6347_v7, 0  ;;  %vm6383_vm6 = vsmask.f32 7424 }
 0x126   : > { %2150 = vrot.lane.b32.xlu1 %v6350_v50, %s4055_s21  ;;  %2272 = vrot.lane.b32.xlu2 %v1796_v18, %s4057_s23  ;;  %v2507_v20 = vsel %vm2481_vm13, %v2474_v1, %v2107_v0  ;;  %v2532_v18 = vsel %vm2514_vm2, %v2499_v58, %v5154_v51  ;;  %v6380_v51 = vld [vmem:[#allocation14_spill] sm:$0xff]  ;;  %v5299_v0 = vrot.slane %v1813_v34, 1 }
 0x127   : > { %v2269_v11 = vpop.permute.xlu0 %2268  ;;  %v2565_v53 = vsel %vm2547_vm7, %v2532_v18, %v2221_v54  ;;  %v2540_v41 = vsel %vm2514_vm2, %v2507_v20, %v5180_v17 }
 0x128   : > { %v2229_v48 = vpop.permute.xlu1 %2228  ;;  %v5273_v50 = vpop.permute.xlu2 %2252  ;;  %v2598_v6 = vsel %vm2580_vm12, %v2565_v53, %v2269_v11  ;;  %v2116_v11 = vor.u32 %v2114_v9, %v6381_v30  ;;  %v2358_v18 = vsel %vm6382_vm11, %v5109_v26, %v5299_v0 }
 0x129   : > { %v2573_v54 = vsel %vm2547_vm7, %v2540_v41, %v2229_v48  ;;  %v2631_v17 = vsel %vm2613_vm0, %v2598_v6, %v5214_v55  ;;  %v1817_v55 = vsel %vm6372_vm1, %v5271_v8, 0  ;;  %vm6386_vm1 = vmmov %vm6379_vm5  ;;  %v6387_v41 = vld [vmem:[#allocation22_spill] sm:$0xff] }
 0x12a   : > { %v5319_v9 = vsel %vm6383_vm6, %v2116_v11, %v5304_v5  ;;  %v5332_v61 = vrot.slane %v1817_v55, 1  ;;  %vm6388_vm15 = vnez %v6387_v41  ;;  %vm6389_vm3 = vmmov %vm6386_vm1 }
 0x12b   : > { %vm6390_vm10 = vmmov %vm6386_vm1 }
 0x12c   : > { %v2366_v6 = vsel %vm6386_vm1, %v5142_v52, %v5332_v61  ;;  %vm6396_vm6 = vmmov %vm6386_vm1 }
 0x12d   : > { %2232 = vrot.lane.b32.xlu0 %v2201_v21, %s4056_s22 }
 0x12e   : > { %2308 = vrot.lane.b32.xlu1 %v6380_v51, %s4058_s24  ;;  %2280 = vrot.lane.b32.xlu2 %v1800_v4, %s4057_s23 }
 0x12f   : > { %v2277_v58 = vpop.permute.xlu0 %2276 }
 0x130   : > { %v2606_v3 = vsel %vm2580_vm12, %v2573_v54, %v2277_v58  ;;  %v2385_v1 = vpop.permute.xlu1 %2384  ;;  %v2297_v21 = vpop.permute.xlu2 %2296  ;;  %v1776_v54 = vsel %vm6388_vm15, %v6361_v13, 0 }
 0x131   : > { %v2664_v34 = vsel %vm2646_vm4, %v2631_v17, %v2385_v1  ;;  %v2639_v20 = vsel %vm2613_vm0, %v2606_v3, %v2313_v56  ;;  %v6384_v56 = vld [vmem:[#allocation20_spill] sm:$0xff]  ;;  %v6391_v1 = vld [vmem:[#allocation29_spill] sm:$0xff]  ;;  %v6393_v17 = vld [vmem:[#allocation30_spill] sm:$0xff] }
 0x132   : > { %3982 = vmatmul.msk.bf16.vlgmr.msra.gmra.mxu2 %vm2703_vm8, %v2664_v34  ;;  %v2672_v48 = vsel %vm2646_vm4, %v2639_v20, %v2393_v12  ;;  %vm6385_vm9 = vnez %v6384_v56  ;;  %vm6392_vm5 = vnez %v6391_v1  ;;  %vm6394_vm11 = vnez %v6393_v17  ;;  %v6400_v17 = vld [vmem:[#allocation35_spill] sm:$0xff] }
 0x133   : > { %3986 = vmatmul.msk.bf16.vlgmr.msra.gmra.mxu3 %vm2703_vm8, %v2672_v48  ;;  %v1772_v12 = vsel %vm6385_vm9, %v6360_v16, 0  ;;  %v1805_v34 = vsel %vm6385_vm9, %v4135_v44, 0  ;;  %vm6399_vm9 = vmmov %vm6386_vm1  ;;  %vm6401_vm1 = vnez %v6400_v17 }
 0x134   : > { %v5334_v4 = vrot.slane %v1772_v12, 1  ;;  %v5368_v48 = vrot.slane %v1805_v34, 1  ;;  %v6395_v12 = vld [vmem:[#allocation8_spill] sm:$0xff] }
 0x135   : > { %2388 = vrot.lane.b32.xlu0 %v2358_v18, %s4059_s25 }
 0x136   : > { %2316 = vrot.lane.b32.xlu1 %v5319_v9, %s4058_s24  ;;  %2126 = vrot.lane.b32.xlu2 %v6362_v22, %s4055_s21  ;;  %v2177_v58 = vsel %vm6389_vm3, %v5146_v25, %v5334_v4  ;;  %v5350_v22 = vrot.slane %v1776_v54, 1  ;;  %v1788_v25 = vsel %vm6392_vm5, %v6360_v16, 0  ;;  %v2491_v16 = vsel %vm2481_vm13, %v4906_v62, %v5206_v19  ;;  %v6397_v62 = vld [vmem:[#allocation5_spill] sm:$0xff]  ;;  %v6398_v19 = vld [vmem:[#allocation10_spill] sm:$0xff] }
 0x137   : > { %v2123_v26 = vpop.permute.xlu0 %2122 }
 0x138   : > { %v2131_v53 = vpop.permute.xlu1 %2130  ;;  %v5336_v45 = vpop.permute.xlu2 %2100  ;;  %v2185_v3 = vsel %vm6390_vm10, %v5152_v60, %v5350_v22 }
 0x139   : > { %v2524_v55 = vsel %vm2514_vm2, %v2491_v16, %v2131_v53 }
 0x13d   : > { %2134 = vrot.lane.b32.xlu0 %v6365_v2, %s4055_s21  ;;  %v1792_v2 = vsel %vm6394_vm11, %v6361_v13, 0  ;;  %v2516_v13 = vsel %vm2514_vm2, %v5086_v37, %v2123_v26 }
 0x13e   : > { %2396 = vrot.lane.b32.xlu1 %v2366_v6, %s4059_s25  ;;  %2208 = vrot.lane.b32.xlu2 %v2177_v58, %s4056_s22  ;;  %v1809_v6 = vsel %vm6388_vm15, %v6395_v12, 0  ;;  %v2342_v58 = vsel %vm6396_vm6, %v5210_v47, %v5368_v48  ;;  %vm6402_vm15 = vnez %v6318_v42  ;;  %vm6409_vm6 = vmmov %vm6389_vm3 }
 0x13f   : > { %v2205_v30 = vpop.permute.xlu0 %2204  ;;  %v5393_v26 = vrot.slane %v1809_v6, 1 }
 0x140   : > { %v2213_v11 = vpop.permute.xlu1 %2212  ;;  %v2223_v52 = vpop.permute.xlu2 %2222  ;;  %v2549_v56 = vsel %vm2547_vm7, %v2516_v13, %v2205_v30  ;;  %v6406_v13 = vld [vmem:[#allocation24_spill] sm:$0xff] }
 0x141   : > { %v2557_v54 = vsel %vm2547_vm7, %v2524_v55, %v2213_v11  ;;  %v2582_v37 = vsel %vm2580_vm12, %v2549_v56, %v5273_v50  ;;  %vm6407_vm5 = vnez %v6406_v13 }
 0x145   : > { %2216 = vrot.lane.b32.xlu0 %v2185_v3, %s4056_s22 }
 0x146   : > { %2256 = vrot.lane.b32.xlu1 %v1788_v25, %s4057_s23  ;;  %2264 = vrot.lane.b32.xlu2 %v1792_v2, %s4057_s23  ;;  %v2350_v25 = vsel %vm6399_vm9, %v5212_v31, %v5393_v26  ;;  %v1757_v2 = vsel %vm6401_vm1, %v4216_v15, 0  ;;  %v6403_v31 = vld [vmem:[#allocation36_spill] sm:$0xff]  ;;  %v6404_v15 = vld [vmem:[#allocation25_spill] sm:$0xff]  ;;  %vm6411_vm9 = vmmov %vm6389_vm3 }
 0x147   : > { %v2261_v20 = vpop.permute.xlu0 %2260  ;;  %v2195_v16 = vsel %vm6389_vm3, %v5246_v46, %v6403_v31  ;;  %vm6405_vm10 = vnez %v6404_v15  ;;  %v2501_v46 = vsel %vm2481_vm13, %v5093_v27, %v5336_v45  ;;  %v6410_v45 = vld [vmem:[#allocation16_spill] sm:$0xff] }
 0x148   : > { %v2289_v60 = vpop.permute.xlu1 %2288  ;;  %v5370_v18 = vpop.permute.xlu2 %2230  ;;  %v2590_v3 = vsel %vm2580_vm12, %v2557_v54, %v2261_v20  ;;  %vm6408_vm11 = vmpackc.low %vm6405_vm10, %vm6407_vm5  ;;  %v1797_v54 = vsel %vm6401_vm1, %v4246_v57, 0  ;;  %vm6413_vm1 = vsmask.f32 7424 }
 0x149   : > { %v2615_v53 = vsel %vm2613_vm0, %v2582_v37, %v2289_v60  ;;  %v2623_v11 = vsel %vm2613_vm0, %v2590_v3, %v2297_v21  ;;  %v1761_v60 = vsel %vm6402_vm15, %v6347_v7, 0  ;;  %v1785_v55 = vsel %vm6408_vm11, %v5271_v8, 0  ;;  %vm6416_vm10 = vmmov %vm6389_vm3 }
 0x14a   : > { %v2202_v56 = vrot.slane %v1785_v55, 1  ;;  %v2284_v37 = vshrl.u32 %v5271_v8, 16  ;;  %v6419_v55 = vld [vmem:[#allocation32_spill] sm:$0xff] }
 0x14b   : > { %vm6420_vm11 = vnez %v6419_v55 }
 0x14c   : > { %v2203_v3 = vsel %vm6409_vm6, %v5261_v33, %v2202_v56  ;;  %vm6422_vm6 = vmmov %vm6389_vm3 }
 0x14d   : > { %2292 = vrot.lane.b32.xlu0 %v6397_v62, %s4058_s24 }
 0x14e   : > { %2300 = vrot.lane.b32.xlu1 %v6398_v19, %s4058_s24  ;;  %2372 = vrot.lane.b32.xlu2 %v2342_v58, %s4059_s25 }
 0x14f   : > { %v2369_v41 = vpop.permute.xlu0 %2368 }
 0x150   : > { %v2648_v47 = vsel %vm2646_vm4, %v2615_v53, %v2369_v41  ;;  %v2377_v30 = vpop.permute.xlu1 %2376  ;;  %v2387_v1 = vpop.permute.xlu2 %2386 }
 0x151   : > { %3974 = vmatmul.msk.bf16.vlgmr.msra.gmra.mxu0 %vm2703_vm8, %v2648_v47  ;;  %v2656_v50 = vsel %vm2646_vm4, %v2623_v11, %v2377_v30  ;;  %v2286_v47 = vor.u32 %v2284_v37, %v5304_v5  ;;  %v2360_v11 = vsel %vm6411_vm9, %v5299_v0, %v4946_v43  ;;  %vm6423_vm9 = vmmov %vm6389_vm3 }
 0x152   : > { %3978 = vmatmul.msk.bf16.vlgmr.msra.gmra.mxu1 %vm2703_vm8, %v2656_v50  ;;  %v6412_v50 = vld [vmem:[#allocation2_spill] sm:$0xff] }
 0x155   : > { %2380 = vrot.lane.b32.xlu0 %v2350_v25, %s4059_s25  ;;  %v2287_v25 = vsel %vm6413_vm1, %v2286_v47, %v6412_v50  ;;  %vm6424_vm1 = vcmask 1040384  }
 0x156   : > { %2104 = vrot.lane.b32.xlu1 %v1757_v2, %s4054_s20  ;;  %2144 = vrot.lane.b32.xlu2 %v6380_v51, %s4055_s21 }
 0x157   : > { %v2141_v21 = vpop.permute.xlu0 %2140 }
 0x158   : > { %v2109_v34 = vpop.permute.xlu1 %2108  ;;  %v5412_v20 = vpop.permute.xlu2 %2132  ;;  %v2534_v58 = vsel %vm2514_vm2, %v2501_v46, %v2141_v21 }
 0x159   : > { %v2509_v17 = vsel %vm2481_vm13, %v5066_v39, %v2109_v34 }
 0x15d   : > { %2112 = vrot.lane.b32.xlu0 %v1761_v60, %s4054_s20 }
 0x15e   : > { %2226 = vrot.lane.b32.xlu1 %v2195_v16, %s4056_s22  ;;  %2152 = vrot.lane.b32.xlu2 %v5319_v9, %s4055_s21  ;;  %v2567_v9 = vsel %vm2547_vm7, %v2534_v58, %v2223_v52  ;;  %v1801_v52 = vsel %vm6402_vm15, %v5271_v8, 0  ;;  %vm6414_vm15 = vmmov %vm6389_vm3 }
 0x15f   : > { %v2149_v51 = vpop.permute.xlu0 %2148  ;;  %v2367_v43 = vsel %vm6414_vm15, %v5332_v61, %v6412_v50  ;;  %vm3217_vm15 = vcmask 1045504  }
 0x160   : > { %v2271_v7 = vpop.permute.xlu1 %2270  ;;  %v2215_v6 = vpop.permute.xlu2 %2214  ;;  %v2542_v8 = vsel %vm2514_vm2, %v2509_v17, %v2149_v51 }
 0x161   : > { %v2600_v53 = vsel %vm2580_vm12, %v2567_v9, %v2271_v7  ;;  %v2575_v0 = vsel %vm2547_vm7, %v2542_v8, %v5370_v18  ;;  %v2179_v18 = vsel %vm6389_vm3, %v5334_v4, %v4982_v36  ;;  %v1793_v36 = vsel %vm6420_vm11, %v6395_v12, 0  ;;  %vm6425_vm3 = vmmov %vm6424_vm1 }
 0x165   : > { %2274 = vrot.lane.b32.xlu0 %v1797_v54, %s4057_s23 }
 0x166   : > { %2234 = vrot.lane.b32.xlu1 %v2203_v3, %s4056_s22  ;;  %2310 = vrot.lane.b32.xlu2 %v6410_v45, %s4058_s24 }
 0x167   : > { %v2307_v27 = vpop.permute.xlu0 %2306 }
 0x168   : > { %v2633_v57 = vsel %vm2613_vm0, %v2600_v53, %v2307_v27  ;;  %v2279_v41 = vpop.permute.xlu1 %2278  ;;  %v2291_v33 = vpop.permute.xlu2 %2290 }
 0x169   : > { %v2666_v30 = vsel %vm2646_vm4, %v2633_v57, %v2387_v1  ;;  %v2608_v2 = vsel %vm2580_vm12, %v2575_v0, %v2279_v41 }
 0x16a   : > { %3983 = vmatmul.msk.bf16.gmra.mxu2 %vm2703_vm8, %v2666_v30 }
 0x16d   : > { %2282 = vrot.lane.b32.xlu0 %v1801_v52, %s4057_s23 }
 0x16e   : > { %2390 = vrot.lane.b32.xlu1 %v2360_v11, %s4059_s25  ;;  %2318 = vrot.lane.b32.xlu2 %v2287_v25, %s4058_s24 }
 0x16f   : > { %v2315_v5 = vpop.permute.xlu0 %2314 }
 0x170   : > { %v2125_v1 = vpop.permute.xlu1 %2124  ;;  %v2379_v42 = vpop.permute.xlu2 %2378  ;;  %v2641_v39 = vsel %vm2613_vm0, %v2608_v2, %v2315_v5  ;;  %v5540_v2 = vld [vmem:[%s6080_s2] ss:$0 sm:$0xff] }
 0x171   : > { %v2518_v4 = vsel %vm2514_vm2, %v5178_v59, %v2125_v1  ;;  %v6421_v59 = vld [vmem:[#allocation11_spill] sm:$0xff] }
 0x175   : > { %2128 = vrot.lane.b32.xlu0 %v6397_v62, %s4055_s21  ;;  %v6415_v62 = vld [vmem:[#allocation34_spill] sm:$0xff] }
 0x176   : > { %2136 = vrot.lane.b32.xlu1 %v6398_v19, %s4055_s21  ;;  %2398 = vrot.lane.b32.xlu2 %v2367_v43, %s4059_s25  ;;  %v2187_v31 = vsel %vm6416_vm10, %v5350_v22, %v6415_v62  ;;  %v6417_v19 = vld [vmem:[#allocation28_spill] sm:$0xff]  ;;  %vm6426_vm10 = vmmov %vm6424_vm1 }
 0x177   : > { %v2395_v21 = vpop.permute.xlu0 %2394  ;;  %vm6418_vm5 = vnez %v6417_v19 }
 0x178   : > { %v2674_v34 = vsel %vm2646_vm4, %v2641_v39, %v2395_v21  ;;  %v2207_v60 = vpop.permute.xlu1 %2206  ;;  %v2111_v61 = vpop.permute.xlu2 %2110  ;;  %v1789_v16 = vsel %vm6418_vm5, %v4135_v44, 0  ;;  %v2526_v44 = vsel %vm2514_vm2, %v5218_v38, %v5412_v20  ;;  %vm6427_vm5 = vmmov %vm6422_vm6 }
 0x179   : > { %3987 = vmatmul.msk.bf16.gmra.mxu3 %vm2703_vm8, %v2674_v34  ;;  %v2551_v22 = vsel %vm2547_vm7, %v2518_v4, %v2207_v60  ;;  %v2559_v7 = vsel %vm2547_vm7, %v2526_v44, %v2215_v6  ;;  %v2352_v6 = vsel %vm6423_vm9, %v5393_v26, %v4873_v10  ;;  %vm6428_vm11 = vmmov %vm6427_vm5 }
 0x17a   : > { %vm6429_vm9 = vmmov %vm6424_vm1 }
 0x17d   : > { %2210 = vrot.lane.b32.xlu0 %v2179_v18, %s4056_s22 }
 0x17e   : > { %2218 = vrot.lane.b32.xlu1 %v2187_v31, %s4056_s22  ;;  %2258 = vrot.lane.b32.xlu2 %v1789_v16, %s4057_s23 }
 0x17f   : > { %v2255_v15 = vpop.permute.xlu0 %2254 }
 0x180   : > { %v2263_v13 = vpop.permute.xlu1 %2262  ;;  %v2273_v51 = vpop.permute.xlu2 %2272  ;;  %v2584_v56 = vsel %vm2580_vm12, %v2551_v22, %v2255_v15 }
 0x181   : > { %v2592_v12 = vsel %vm2580_vm12, %v2559_v7, %v2263_v13  ;;  %v2617_v38 = vsel %vm2613_vm0, %v2584_v56, %v2291_v33 }
 0x185   : > { %2266 = vrot.lane.b32.xlu0 %v1793_v36, %s4057_s23 }
 0x186   : > { %2294 = vrot.lane.b32.xlu1 %v4184_v29, %s4058_s24  ;;  %2302 = vrot.lane.b32.xlu2 %v6421_v59, %s4058_s24  ;;  %v2344_v29 = vsel %vm6422_vm6, %v5368_v48, %v5039_v63  ;;  %vm3677_vm6 = vcmask 1042432  }
 0x187   : > { %v2299_v46 = vpop.permute.xlu0 %2298 }
 0x188   : > { %v2625_v54 = vsel %vm2613_vm0, %v2592_v12, %v2299_v46  ;;  %v2371_v58 = vpop.permute.xlu1 %2370  ;;  %v2281_v37 = vpop.permute.xlu2 %2280 }
 0x189   : > { %v2658_v20 = vsel %vm2646_vm4, %v2625_v54, %v2379_v42  ;;  %v2650_v3 = vsel %vm2646_vm4, %v2617_v38, %v2371_v58 }
 0x18a   : > { %3979 = vmatmul.msk.bf16.gmra.mxu1 %vm2703_vm8, %v2658_v20  ;;  %3975 = vmatmul.msk.bf16.gmra.mxu0 %vm2703_vm8, %v2650_v3 }
 0x18d   : > { %2374 = vrot.lane.b32.xlu0 %v2344_v29, %s4059_s25 }
 0x18e   : > { %2382 = vrot.lane.b32.xlu1 %v2352_v6, %s4059_s25 }
 0x18f   : > { %v2103_v9 = vpop.permute.xlu0 %2102 }
 0x190   : > { %v2143_v53 = vpop.permute.xlu1 %2142  ;;  %v2127_v45 = vpop.permute.xlu2 %2126  ;;  %v2503_v41 = vsel %vm2481_vm13, %v5024_v23, %v2103_v9  ;;  %v2511_v23 = vsel %vm2481_vm13, %v5150_v24, %v2111_v61 }
 0x191   : > { %v2536_v63 = vsel %vm2514_vm2, %v2503_v41, %v2143_v53  ;;  %v2520_v18 = vsel %vm2514_vm2, %v5184_v49, %v2127_v45 }
 0x197   : > { %v2225_v27 = vpop.permute.xlu0 %2224 }
 0x198   : > { %v2151_v57 = vpop.permute.xlu1 %2150  ;;  %v2209_v48 = vpop.permute.xlu2 %2208  ;;  %v2569_v10 = vsel %vm2547_vm7, %v2536_v63, %v2225_v27 }
 0x199   : > { %v2602_v26 = vsel %vm2580_vm12, %v2569_v10, %v2273_v51  ;;  %v2544_v5 = vsel %vm2514_vm2, %v2511_v23, %v2151_v57  ;;  %v2553_v19 = vsel %vm2547_vm7, %v2520_v18, %v2209_v48 }
 0x19f   : > { %v2233_v47 = vpop.permute.xlu0 %2232 }
 0x1a0   : > { %v2309_v33 = vpop.permute.xlu1 %2308  ;;  %v2265_v25 = vpop.permute.xlu2 %2264  ;;  %v2577_v1 = vsel %vm2547_vm7, %v2544_v5, %v2233_v47 }
 0x1a1   : > { %v2635_v30 = vsel %vm2613_vm0, %v2602_v26, %v2309_v33  ;;  %v2610_v17 = vsel %vm2580_vm12, %v2577_v1, %v2281_v37 }
 0x1a7   : > { %v2389_v52 = vpop.permute.xlu0 %2388 }
 0x1a8   : > { %v2668_v11 = vsel %vm2646_vm4, %v2635_v30, %v2389_v52  ;;  %v2317_v50 = vpop.permute.xlu1 %2316  ;;  %v2373_v24 = vpop.permute.xlu2 %2372 }
 0x1a9   : > { %3984 = vmatmul.msk.bf16.gmra.mxu2 %vm2703_vm8, %v2668_v11  ;;  %v2643_v8 = vsel %vm2613_vm0, %v2610_v17, %v2317_v50 }
 0x1af   : > { %v2135_v42 = vpop.permute.xlu0 %2134 }
 0x1b0   : > { %v2397_v43 = vpop.permute.xlu1 %2396  ;;  %v2145_v15 = vpop.permute.xlu2 %2144  ;;  %v2528_v49 = vsel %vm2514_vm2, %v5127_v35, %v2135_v42 }
 0x1b1   : > { %v2676_v0 = vsel %vm2646_vm4, %v2643_v8, %v2397_v43 }
 0x1b2   : > { %3988 = vmatmul.msk.bf16.gmra.mxu3 %vm2703_vm8, %v2676_v0 }
 0x1b5   : > { %v2789_v39 = vpop.f32.mrf.mxu2 }
 0x1b6   : > { %v2790_v21 = vadd.f32 %v5540_v2, %v2789_v39 }
 0x1b7   : > { %v2217_v34 = vpop.permute.xlu0 %2216 }
 0x1b8   : > { %v2257_v60 = vpop.permute.xlu1 %2256  ;;  %v2845_v61 = vmax.f32 %v2790_v21, 0.0  ;;  %v2561_v7 = vsel %vm2547_vm7, %v2528_v49, %v2217_v34  ;;  %v2153_v41 = vpop.permute.xlu2 %2152 }
 0x1b9   : > { %v2586_v13 = vsel %vm2580_vm12, %v2553_v19, %v2257_v60  ;;  %v2594_v29 = vsel %vm2580_vm12, %v2561_v7, %v2265_v25 }
 0x1ba   : > { %v2921_v62 = vrot.slane %v2845_v61, 7 }
 0x1bc   : > { %v3004_v51 = vsel %vm6424_vm1, 0.0, %v2921_v62  ;;  %vm3695_vm1 = vcmask 1043456  }
 0x1bd   : > { %v2791_v31 = vpop.f32.mrf.mxu2  ;;  %v3109_v12 = vrot.slane %v3004_v51, 1  ;;  %v3263_v46 = vrot.slane %v3004_v51, 2 }
 0x1be   : > { %v2792_v16 = vadd.f32 %v5540_v2, %v2791_v31 }
 0x1bf   : > { %v2293_v55 = vpop.permute.xlu0 %2292 }
 0x1c0   : > { %v2846_v36 = vmax.f32 %v2792_v16, 0.0  ;;  %v2619_v4 = vsel %vm2613_vm0, %v2586_v13, %v2293_v55  ;;  %v2301_v22 = vpop.permute.xlu1 %2300  ;;  %v2311_v0 = vpop.permute.xlu2 %2310 }
 0x1c1   : > { %v2652_v44 = vsel %vm2646_vm4, %v2619_v4, %v2373_v24  ;;  %v2627_v57 = vsel %vm2613_vm0, %v2594_v29, %v2301_v22 }
 0x1c2   : > { %v2922_v56 = vrot.slane %v2846_v36, 7  ;;  %3976 = vmatmul.msk.bf16.gmra.mxu0 %vm2703_vm8, %v2652_v44 }
 0x1c4   : > { %v2923_v59 = vsel %vm6425_vm3, %v2921_v62, %v2922_v56  ;;  %v3021_v54 = vsel %vm6426_vm10, %v2922_v56, 0.0  ;;  %vm3713_vm3 = vcmask 1044480   ;;  %vm6430_vm10 = vmmov %vm6427_vm5 }
 0x1c5   : > { %v3110_v58 = vrot.slane %v2923_v59, 1  ;;  %v3112_v38 = vrot.slane %v3021_v54, 1  ;;  %v3264_v20 = vrot.slane %v2923_v59, 2  ;;  %v3266_v3 = vrot.slane %v3021_v54, 2 }
 0x1c7   : > { %v3111_v35 = vsel %vm6427_vm5, %v3109_v12, %v3110_v58  ;;  %v3113_v6 = vsel %vm6428_vm11, %v3110_v58, %v3112_v38  ;;  %v3265_v37 = vsel %vm3217_vm15, %v3263_v46, %v3264_v20  ;;  %v3267_v9 = vsel %vm3217_vm15, %v3264_v20, %v3266_v3  ;;  %v2381_v53 = vpop.permute.xlu0 %2380  ;;  %vm6432_vm5 = vmmov %vm6429_vm9 }
 0x1c8   : > { %v3201_v27 = vadd.f32 %v3111_v35, %v3004_v51  ;;  %v3202_v45 = vadd.f32 %v3113_v6, %v2923_v59  ;;  %v2105_v47 = vpop.permute.xlu1 %2104  ;;  %v2660_v33 = vsel %vm2646_vm4, %v2627_v57, %v2381_v53  ;;  %v2319_v61 = vpop.permute.xlu2 %2318  ;;  %v4060_v3 = vmov 0.0  }
 0x1c9   : > { %3980 = vmatmul.msk.bf16.gmra.mxu1 %vm2703_vm8, %v2660_v33  ;;  %v2505_v60 = vsel %vm2481_vm13, %v5107_v28, %v2105_v47  ;;  %v2895_v29 = vrot.slane %v4060_v3, 7  ;;  %v2809_v6 = vpop.f32.mrf.mxu3 }
 0x1ca   : > { %v3355_v63 = vadd.f32 %v3265_v37, %v3201_v27  ;;  %v3356_v48 = vadd.f32 %v3267_v9, %v3202_v45  ;;  %v2538_v18 = vsel %vm2514_vm2, %v2505_v60, %v2145_v15 }
 0x1cc   : > { %v3397_v10 = vrot.slane %v3355_v63, 1  ;;  %v3431_v26 = vrot.slane %v3355_v63, 2  ;;  %v3465_v30 = vrot.slane %v3355_v63, 3  ;;  %v3516_v11 = vrot.slane %v3356_v48, 4 }
 0x1cd   : > { %v3550_v25 = vrot.slane %v3356_v48, 5  ;;  %v3584_v17 = vrot.slane %v3356_v48, 6  ;;  %v3618_v8 = vrot.slane %v3356_v48, 7 }
 0x1ce   : > { %v3652_v52 = vsel %vm6429_vm9, %v3355_v63, %v3397_v10  ;;  %v2749_v51 = vpop.f32.mrf.mxu0 }
 0x1cf   : > { %v3669_v50 = vsel %vm2736_vm14, %v3652_v52, %v3431_v26  ;;  %v2113_v23 = vpop.permute.xlu0 %2112  ;;  %v2750_v58 = vadd.f32 %v5540_v2, %v2749_v51  ;;  %v3065_v26 = vrot.slane %v2895_v29, 1 }
 0x1d0   : > { %v3687_v5 = vsel %vm3677_vm6, %v3669_v50, %v3465_v30  ;;  %v2227_v1 = vpop.permute.xlu1 %2226  ;;  %v2513_v19 = vsel %vm2481_vm13, %v5158_v14, %v2113_v23  ;;  %v2399_v15 = vpop.permute.xlu2 %2398  ;;  %vm6431_vm13 = vmmov %vm6429_vm9 }
 0x1d1   : > { %v3705_v42 = vsel %vm3695_vm1, %v3687_v5, %v3516_v11  ;;  %v2571_v62 = vsel %vm2547_vm7, %v2538_v18, %v2227_v1  ;;  %v2546_v55 = vsel %vm2514_vm2, %v2513_v19, %v2153_v41  ;;  %v2829_v37 = vmax.f32 %v2750_v58, 0.0  ;;  %v2769_v19 = vpop.f32.mrf.mxu1 }
 0x1d2   : > { %v3723_v43 = vsel %vm3713_vm3, %v3705_v42, %v3550_v25  ;;  %v2995_v57 = vsel %vm6431_vm13, 0.0, %v2895_v29  ;;  %v3219_v42 = vrot.slane %v2895_v29, 2  ;;  %v2810_v18 = vadd.f32 %v5540_v2, %v2809_v6 }
 0x1d3   : > { %v3740_v24 = vsel %vm3217_vm15, %v3723_v43, %v3584_v17  ;;  %v2897_v63 = vrot.slane %v2829_v37, 7  ;;  %v3064_v10 = vrot.slane %v2995_v57, 1  ;;  %v3218_v17 = vrot.slane %v2995_v57, 2 }
 0x1d4   : > { %v5572_v39 = vsel %vm6430_vm10, %v3740_v24, %v3618_v8  ;;  %v2811_v8 = vpop.f32.mrf.mxu3 }
 0x1d5   : > { %v3220_v60 = vsel %vm3217_vm15, %v3218_v17, %v3219_v42 }
 0x1d6   : > { %v2751_v46 = vpop.f32.mrf.mxu0 }
 0x1d7   : > { %v2275_v21 = vpop.permute.xlu0 %2274  ;;  %v2752_v54 = vadd.f32 %v5540_v2, %v2751_v46 }
 0x1d8   : > { %v2235_v34 = vpop.permute.xlu1 %2234  ;;  %v2604_v16 = vsel %vm2580_vm12, %v2571_v62, %v2275_v21  ;;  %v2259_v59 = vpop.permute.xlu2 %2258  ;;  %v2812_v21 = vadd.f32 %v5540_v2, %v2811_v8 }
 0x1d9   : > { %v2637_v36 = vsel %vm2613_vm0, %v2604_v16, %v2311_v0  ;;  %v2579_v4 = vsel %vm2547_vm7, %v2546_v55, %v2235_v34  ;;  %v2830_v20 = vmax.f32 %v2752_v54, 0.0 }
 0x1db   : > { %v2898_v45 = vrot.slane %v2830_v20, 7 }
 0x1df   : > { %v2283_v31 = vpop.permute.xlu0 %2282 }
 0x1e0   : > { %v2391_v13 = vpop.permute.xlu1 %2390  ;;  %v2612_v22 = vsel %vm2580_vm12, %v2579_v4, %v2283_v31  ;;  %v2303_v33 = vpop.permute.xlu2 %2302 }
 0x1e1   : > { %v2670_v28 = vsel %vm2646_vm4, %v2637_v36, %v2391_v13  ;;  %v2645_v14 = vsel %vm2613_vm0, %v2612_v22, %v2319_v61  ;;  %v2854_v36 = vmax.f32 %v2812_v21, 0.0 }
 0x1e2   : > { %3985 = vmatmul.msk.bf16.gmra.mxu2 %vm2703_vm8, %v2670_v28  ;;  %v2678_v56 = vsel %vm2646_vm4, %v2645_v14, %v2399_v15  ;;  %v2853_v28 = vmax.f32 %v2810_v18, 0.0 }
 0x1e3   : > { %3989 = vmatmul.msk.bf16.gmra.mxu3 %vm2703_vm8, %v2678_v56 }
 0x1e7   : > { %v2129_v44 = vpop.permute.xlu0 %2128 }
 0x1e8   : > { %v2137_v49 = vpop.permute.xlu1 %2136  ;;  %v2522_v9 = vsel %vm2514_vm2, %v5112_v32, %v2129_v44 }
 0x1e9   : > { %v2530_v53 = vsel %vm2514_vm2, %v5232_v40, %v2137_v49  ;;  %v5603_v40 = vsel %vm6432_vm5, %v2897_v63, %v2898_v45  ;;  %vm6433_vm2 = vmmov %vm6432_vm5 }
 0x1ea   : > { %v2996_v25 = vsel %vm6433_vm2, 0.0, %v2897_v63  ;;  %v3070_v1 = vrot.slane %v5603_v40, 1  ;;  %v3224_v31 = vrot.slane %v5603_v40, 2  ;;  %vm6440_vm9 = vmmov %vm6433_vm2 }
 0x1eb   : > { %v3069_v43 = vrot.slane %v2996_v25, 1  ;;  %v3223_v4 = vrot.slane %v2996_v25, 2  ;;  %vm6442_vm13 = vmmov %vm6433_vm2 }
 0x1ec   : > { %vm6443_vm5 = vmmov %vm6433_vm2 }
 0x1ed   : > { %v3225_v44 = vsel %vm3217_vm15, %v3223_v4, %v3224_v31  ;;  %v2794_v20 = vpop.f32.mrf.mxu2 }
 0x1ef   : > { %v2211_v7 = vpop.permute.xlu0 %2210 }
 0x1f0   : > { %v2219_v12 = vpop.permute.xlu1 %2218  ;;  %v2555_v27 = vsel %vm2547_vm7, %v2522_v9, %v2211_v7  ;;  %v2934_v7 = vrot.slane %v2854_v36, 7 }
 0x1f1   : > { %v2563_v41 = vsel %vm2547_vm7, %v2530_v53, %v2219_v12  ;;  %v2588_v48 = vsel %vm2580_vm12, %v2555_v27, %v2259_v59  ;;  %vm6434_vm7 = vmmov %vm6430_vm10  ;;  %v2933_v59 = vrot.slane %v2853_v28, 7 }
 0x1f2   : > { %v3066_v5 = vsel %vm6434_vm7, %v3064_v10, %v3065_v26  ;;  %vm6441_vm10 = vmmov %vm6433_vm2 }
 0x1f3   : > { %v3183_v24 = vadd.f32 %v3066_v5, %v2995_v57  ;;  %v5628_v9 = vsel %vm6441_vm10, %v2933_v59, %v2934_v7 }
 0x1f4   : > { %v3130_v10 = vrot.slane %v5628_v9, 1  ;;  %v3284_v21 = vrot.slane %v5628_v9, 2 }
 0x1f5   : > { %v3337_v55 = vadd.f32 %v3220_v60, %v3183_v24  ;;  %v2796_v18 = vpop.f32.mrf.mxu2 }
 0x1f6   : > { %v2797_v28 = vadd.f32 %v5540_v2, %v2796_v18 }
 0x1f7   : > { %v2267_v38 = vpop.permute.xlu0 %2266  ;;  %v3388_v56 = vrot.slane %v3337_v55, 1  ;;  %v3456_v57 = vrot.slane %v3337_v55, 3 }
 0x1f8   : > { %v2295_v35 = vpop.permute.xlu1 %2294  ;;  %v2596_v47 = vsel %vm2580_vm12, %v2563_v41, %v2267_v38  ;;  %vm6435_vm12 = vmmov %vm6433_vm2  ;;  %v3422_v38 = vrot.slane %v3337_v55, 2  ;;  %v2771_v41 = vpop.f32.mrf.mxu1 }
 0x1f9   : > { %v2621_v32 = vsel %vm2613_vm0, %v2588_v48, %v2295_v35  ;;  %v2629_v52 = vsel %vm2613_vm0, %v2596_v47, %v2303_v33  ;;  %v3012_v0 = vsel %vm6435_vm12, %v2895_v29, 0.0  ;;  %vm6436_vm0 = vmmov %vm6434_vm7  ;;  %v3643_v37 = vsel %vm6440_vm9, %v3337_v55, %v3388_v56 }
 0x1fa   : > { %v3071_v34 = vsel %vm6436_vm0, %v3069_v43, %v3070_v1  ;;  %v3067_v62 = vrot.slane %v3012_v0, 1  ;;  %v3221_v15 = vrot.slane %v3012_v0, 2  ;;  %vm6439_vm11 = vmmov %vm6436_vm0  ;;  %v3008_v47 = vsel %vm6442_vm13, 0.0, %v2933_v59 }
 0x1fb   : > { %v3185_v13 = vadd.f32 %v3071_v34, %v2996_v25  ;;  %v3660_v63 = vsel %vm2736_vm14, %v3643_v37, %v3422_v38  ;;  %vm6444_vm7 = vmmov %vm6433_vm2  ;;  %v3283_v8 = vrot.slane %v3008_v47, 2  ;;  %v2795_v59 = vadd.f32 %v5540_v2, %v2794_v20 }
 0x1fc   : > { %v3222_v54 = vsel %vm3217_vm15, %v3219_v42, %v3221_v15  ;;  %v3678_v25 = vsel %vm3677_vm6, %v3660_v63, %v3456_v57  ;;  %vm6445_vm12 = vmmov %vm6433_vm2  ;;  %v2814_v56 = vpop.f32.mrf.mxu3  ;;  %v2848_v37 = vmax.f32 %v2797_v28, 0.0 }
 0x1fd   : > { %v3339_v49 = vadd.f32 %v3225_v44, %v3185_v13 }
 0x1ff   : > { %v2375_v30 = vpop.permute.xlu0 %2374  ;;  %v3389_v6 = vrot.slane %v3339_v49, 1  ;;  %v3423_v33 = vrot.slane %v3339_v49, 2  ;;  %v3457_v24 = vrot.slane %v3339_v49, 3 }
 0x200   : > { %v2383_v11 = vpop.permute.xlu1 %2382  ;;  %v2654_v50 = vsel %vm2646_vm4, %v2621_v32, %v2375_v30 }
 0x201   : > { %3977 = vmatmul.msk.bf16.gmra.mxu0 %vm2703_vm8, %v2654_v50  ;;  %v2662_v23 = vsel %vm2646_vm4, %v2629_v52, %v2383_v11  ;;  %vm6437_vm4 = vmmov %vm6433_vm2  ;;  %v2772_v11 = vadd.f32 %v5540_v2, %v2771_v41  ;;  %v2770_v50 = vadd.f32 %v5540_v2, %v2769_v19 }
 0x202   : > { %3981 = vmatmul.msk.bf16.gmra.mxu1 %vm2703_vm8, %v2662_v23  ;;  %v3013_v16 = vsel %vm6437_vm4, %v2898_v45, 0.0  ;;  %vm6438_vm8 = vmmov %vm6436_vm0 }
 0x203   : > { %v3068_v22 = vsel %vm6438_vm8, %v3065_v26, %v3067_v62  ;;  %v3072_v51 = vrot.slane %v3013_v16, 1  ;;  %v3226_v53 = vrot.slane %v3013_v16, 2  ;;  %v3644_v26 = vsel %vm6443_vm5, %v3339_v49, %v3389_v6  ;;  %vm6446_vm0 = vmmov %vm6433_vm2 }
 0x204   : > { %v3184_v12 = vadd.f32 %v3068_v22, %v2895_v29  ;;  %v3661_v5 = vsel %vm2736_vm14, %v3644_v26, %v3423_v33  ;;  %v5649_v43 = vsel %vm6446_vm0, %v2934_v7, 0.0  ;;  %vm6447_vm4 = vmmov %vm6438_vm8  ;;  %v2837_v55 = vmax.f32 %v2770_v50, 0.0 }
 0x205   : > { %v3073_v58 = vsel %vm6439_vm11, %v3070_v1, %v3072_v51  ;;  %v3227_v30 = vsel %vm3217_vm15, %v3224_v31, %v3226_v53  ;;  %v3679_v62 = vsel %vm3677_vm6, %v3661_v5, %v3457_v24  ;;  %vm6448_vm8 = vmmov %vm6447_vm4  ;;  %v2847_v33 = vmax.f32 %v2795_v59, 0.0 }
 0x206   : > { %v5630_v27 = vadd.f32 %v3222_v54, %v3184_v12  ;;  %v3186_v45 = vadd.f32 %v3073_v58, %v5603_v40  ;;  %v3129_v40 = vrot.slane %v3008_v47, 1  ;;  %vm6449_vm11 = vmmov %vm6447_vm4  ;;  %v3285_v58 = vsel %vm3217_vm15, %v3283_v8, %v3284_v21 }
 0x207   : > { %v2754_v61 = vpop.f32.mrf.mxu0  ;;  %v2909_v38 = vrot.slane %v2837_v55, 7  ;;  %vm6450_vm9 = vmmov %vm6446_vm0  ;;  %v3132_v26 = vrot.slane %v5649_v43, 1  ;;  %v2924_v8 = vrot.slane %v2847_v33, 7 }
 0x208   : > { %v2755_v14 = vadd.f32 %v5540_v2, %v2754_v61  ;;  %v3507_v52 = vrot.slane %v5630_v27, 4  ;;  %v5641_v23 = vadd.f32 %v3227_v30, %v3186_v45  ;;  %v3131_v0 = vsel %vm6447_vm4, %v3129_v40, %v3130_v10  ;;  %vm6451_vm10 = vmmov %vm6446_vm0 }
 0x209   : > { %v3541_v34 = vrot.slane %v5630_v27, 5  ;;  %v2838_v61 = vmax.f32 %v2772_v11, 0.0  ;;  %v3209_v13 = vadd.f32 %v3131_v0, %v3008_v47  ;;  %v3575_v44 = vrot.slane %v5630_v27, 6  ;;  %vm6452_vm13 = vmmov %vm6446_vm0 }
 0x20a   : > { %v2831_v3 = vmax.f32 %v2755_v14, 0.0  ;;  %v3696_v60 = vsel %vm3695_vm1, %v3678_v25, %v3507_v52  ;;  %v3508_v36 = vrot.slane %v5641_v23, 4  ;;  %v3542_v12 = vrot.slane %v5641_v23, 5  ;;  %vm6453_vm5 = vmmov %vm6447_vm4 }
 0x20b   : > { %v3714_v49 = vsel %vm3713_vm3, %v3696_v60, %v3541_v34  ;;  %v3576_v45 = vrot.slane %v5641_v23, 6  ;;  %v3609_v57 = vrot.slane %v5630_v27, 7  ;;  %v3000_v30 = vsel %vm6451_vm10, 0.0, %v2909_v38  ;;  %v2816_v34 = vpop.f32.mrf.mxu3 }
 0x20c   : > { %v2900_v48 = vrot.slane %v2831_v3, 7  ;;  %v3697_v14 = vsel %vm3695_vm1, %v3679_v62, %v3508_v36  ;;  %v3731_v20 = vsel %vm3217_vm15, %v3714_v49, %v3575_v44  ;;  %v3610_v11 = vrot.slane %v5641_v23, 7 }
 0x20d   : > { %v3715_v6 = vsel %vm3713_vm3, %v3697_v14, %v3542_v12  ;;  %v2925_v27 = vrot.slane %v2848_v37, 7  ;;  %v3748_v25 = vsel %vm6453_vm5, %v3731_v20, %v3609_v57  ;;  %v2817_v28 = vadd.f32 %v5540_v2, %v2816_v34  ;;  %v2774_v57 = vpop.f32.mrf.mxu1 }
 0x20e   : > { %v2997_v1 = vsel %vm6433_vm2, 0.0, %v2900_v48  ;;  %v3732_v52 = vsel %vm3217_vm15, %v3715_v6, %v3576_v45  ;;  %vm6454_vm2 = vmmov %vm6447_vm4  ;;  %v2815_v12 = vadd.f32 %v5540_v2, %v2814_v56  ;;  %vm3797_vm10 = vcmask 125952  }
 0x20f   : > { %v2756_v46 = vpop.f32.mrf.mxu0  ;;  %v3074_v31 = vrot.slane %v2997_v1, 1  ;;  %v3228_v7 = vrot.slane %v2997_v1, 2 }
 0x210   : > { %v2757_v35 = vadd.f32 %v5540_v2, %v2756_v46  ;;  %v2910_v46 = vrot.slane %v2838_v61, 7  ;;  %v3089_v61 = vrot.slane %v3000_v30, 1  ;;  %v2855_v45 = vmax.f32 %v2815_v12, 0.0 }
 0x212   : > { %v2832_v29 = vmax.f32 %v2757_v35, 0.0  ;;  %v5677_v47 = vsel %vm6450_vm9, %v2909_v38, %v2910_v46 }
 0x213   : > { %v3090_v5 = vrot.slane %v5677_v47, 1 }
 0x214   : > { %v2901_v32 = vrot.slane %v2832_v29, 7 }
 0x216   : > { %v2902_v17 = vsel %vm6444_vm7, %v2900_v48, %v2901_v32  ;;  %v3014_v42 = vsel %vm6445_vm12, %v2901_v32, 0.0  ;;  %v5680_v32 = vadd.f32 %v3285_v58, %v3209_v13  ;;  %vm6455_vm7 = vmmov %vm6446_vm0 }
 0x217   : > { %v3075_v19 = vrot.slane %v2902_v17, 1  ;;  %v3077_v16 = vrot.slane %v3014_v42, 1  ;;  %v3229_v4 = vrot.slane %v2902_v17, 2  ;;  %v3231_v51 = vrot.slane %v3014_v42, 2  ;;  %vm6456_vm12 = vmmov %vm6454_vm2 }
 0x218   : > { %v3749_v42 = vsel %vm6454_vm2, %v3732_v52, %v3610_v11  ;;  %v5693_v18 = vsel %vm6455_vm7, %v2924_v8, %v2925_v27  ;;  %vm6457_vm0 = vmmov %vm6454_vm2  ;;  %v3435_v49 = vrot.slane %v5680_v32, 2 }
 0x219   : > { %v3076_v22 = vsel %vm6448_vm8, %v3074_v31, %v3075_v19  ;;  %v3078_v15 = vsel %vm6449_vm11, %v3075_v19, %v3077_v16  ;;  %v3230_v35 = vsel %vm3217_vm15, %v3228_v7, %v3229_v4  ;;  %v3232_v53 = vsel %vm3217_vm15, %v3229_v4, %v3231_v51  ;;  %vm6458_vm4 = vmmov %vm6455_vm7 }
 0x21a   : > { %v3187_v54 = vadd.f32 %v3076_v22, %v2997_v1  ;;  %v3188_v3 = vadd.f32 %v3078_v15, %v2902_v17  ;;  %v3133_v19 = vsel %vm6456_vm12, %v3130_v10, %v3132_v26  ;;  %v3401_v16 = vrot.slane %v5680_v32, 1  ;;  %vm6459_vm8 = vmmov %vm6457_vm0 }
 0x21b   : > { %v3765_v13 = vadd.f32 %v3749_v42, %v3748_v25  ;;  %v3091_v36 = vsel %vm6457_vm0, %v3089_v61, %v3090_v5  ;;  %v3005_v4 = vsel %vm6458_vm4, 0.0, %v2924_v8  ;;  %v3286_v15 = vrot.slane %v5649_v43, 2  ;;  %vm6460_vm11 = vmmov %vm6458_vm4 }
 0x21c   : > { %v3341_v29 = vadd.f32 %v3230_v35, %v3187_v54  ;;  %v3342_v41 = vadd.f32 %v3232_v53, %v3188_v3  ;;  %v3115_v51 = vrot.slane %v5693_v18, 1  ;;  %v3210_v14 = vadd.f32 %v3133_v19, %v5628_v9  ;;  %vm6461_vm9 = vmmov %vm6458_vm4 }
 0x21d   : > { %v3244_v7 = vrot.slane %v5677_v47, 2  ;;  %v3017_v59 = vsel %vm6460_vm11, %v2910_v46, 0.0  ;;  %v3193_v54 = vadd.f32 %v3091_v36, %v3000_v30  ;;  %v3114_v58 = vrot.slane %v3005_v4, 1  ;;  %vm6463_vm5 = vmmov %vm6458_vm4  ;;  %v2776_v36 = vpop.f32.mrf.mxu1 }
 0x21e   : > { %v3390_v63 = vrot.slane %v3341_v29, 1  ;;  %v3424_v48 = vrot.slane %v3341_v29, 2  ;;  %v3458_v40 = vrot.slane %v3341_v29, 3  ;;  %v3509_v1 = vrot.slane %v3342_v41, 4  ;;  %vm6464_vm2 = vmmov %vm6457_vm0 }
 0x21f   : > { %v3543_v0 = vrot.slane %v3342_v41, 5  ;;  %v3577_v60 = vrot.slane %v3342_v41, 6  ;;  %v3611_v62 = vrot.slane %v3342_v41, 7  ;;  %v3656_v43 = vsel %vm6461_vm9, %v5680_v32, %v3401_v16  ;;  %vm6465_vm7 = vmmov %vm6458_vm4 }
 0x220   : > { %v3645_v50 = vsel %vm6452_vm13, %v3341_v29, %v3390_v63  ;;  %v3243_v3 = vrot.slane %v3000_v30, 2  ;;  %v2856_v35 = vmax.f32 %v2817_v28, 0.0  ;;  %v3287_v56 = vsel %vm3217_vm15, %v3284_v21, %v3286_v15  ;;  %vm6462_vm13 = vmmov %vm6457_vm0 }
 0x221   : > { %v3662_v17 = vsel %vm2736_vm14, %v3645_v50, %v3424_v48  ;;  %v3116_v46 = vsel %vm6462_vm13, %v3114_v58, %v3115_v51  ;;  %v5727_v37 = vadd.f32 %v3287_v56, %v3210_v14  ;;  %v3092_v53 = vrot.slane %v3017_v59, 1  ;;  %vm6466_vm12 = vmmov %vm6457_vm0 }
 0x222   : > { %v3680_v24 = vsel %vm3677_vm6, %v3662_v17, %v3458_v40  ;;  %v3245_v29 = vsel %vm3217_vm15, %v3243_v3, %v3244_v7  ;;  %v3673_v20 = vsel %vm2736_vm14, %v3656_v43, %v3435_v49  ;;  %v3022_v33 = vsel %vm6463_vm5, %v2925_v27, 0.0  ;;  %vm6467_vm0 = vmmov %vm6458_vm4 }
 0x223   : > { %v3698_v23 = vsel %vm3695_vm1, %v3680_v24, %v3509_v1  ;;  %v3347_v41 = vadd.f32 %v3245_v29, %v3193_v54  ;;  %v3269_v63 = vrot.slane %v5693_v18, 2  ;;  %v3469_v9 = vrot.slane %v5680_v32, 3  ;;  %vm6468_vm4 = vmmov %vm6467_vm0 }
 0x224   : > { %v3716_v31 = vsel %vm3713_vm3, %v3698_v23, %v3543_v0  ;;  %v3203_v21 = vadd.f32 %v3116_v46, %v3005_v4  ;;  %v2937_v48 = vrot.slane %v2856_v35, 7  ;;  %v3268_v26 = vrot.slane %v3005_v4, 2  ;;  %vm6470_vm11 = vmmov %vm6467_vm0 }
 0x225   : > { %v3733_v55 = vsel %vm3217_vm15, %v3716_v31, %v3577_v60  ;;  %v3691_v52 = vsel %vm3677_vm6, %v3673_v20, %v3469_v9  ;;  %v3093_v11 = vsel %vm6464_vm2, %v3090_v5, %v3092_v53  ;;  %v3117_v40 = vrot.slane %v3022_v33, 1  ;;  %vm6471_vm9 = vmmov %vm6467_vm0 }
 0x226   : > { %v5705_v22 = vsel %vm6459_vm8, %v3733_v55, %v3611_v62  ;;  %v2936_v50 = vrot.slane %v2855_v45, 7  ;;  %v3520_v25 = vrot.slane %v5727_v37, 4  ;;  %v3393_v1 = vrot.slane %v3347_v41, 1  ;;  %vm6469_vm8 = vmmov %vm6464_vm2 }
 0x227   : > { %v3773_v10 = vadd.f32 %v3765_v13, %v5705_v22  ;;  %v3270_v27 = vsel %vm3217_vm15, %v3268_v26, %v3269_v63  ;;  %v3246_v42 = vrot.slane %v3017_v59, 2  ;;  %v3194_v24 = vadd.f32 %v3093_v11, %v5677_v47  ;;  %vm6472_vm13 = vmmov %vm6467_vm0 }
 0x228   : > { %v3357_v8 = vadd.f32 %v3270_v27, %v3203_v21  ;;  %v5741_v32 = vsel %vm6465_vm7, %v2936_v50, %v2937_v48  ;;  %v3709_v0 = vsel %vm3695_vm1, %v3691_v52, %v3520_v25  ;;  %v3427_v34 = vrot.slane %v3347_v41, 2  ;;  %vm6473_vm5 = vmmov %vm6464_vm2 }
 0x229   : > { %v3781_v38 = vmul.f32 0.11111111, %v3773_v10  ;;  %v3118_v5 = vsel %vm6466_vm12, %v3115_v51, %v3117_v40  ;;  %v3271_v60 = vrot.slane %v3022_v33, 2  ;;  %v3009_v23 = vsel %vm6467_vm0, 0.0, %v2936_v50  ;;  %vm6474_vm2 = vmmov %vm6467_vm0 }
 0x22a   : > { %v3554_v62 = vrot.slane %v5727_v37, 5  ;;  %v3588_v31 = vrot.slane %v5727_v37, 6  ;;  %v3648_v19 = vsel %vm6468_vm4, %v3347_v41, %v3393_v1  ;;  %v3135_v16 = vrot.slane %v5741_v32, 1  ;;  %vm6475_vm7 = vmmov %vm6467_vm0 }
 0x22b   : > { %v3789_v6 = vpack.c.bf16 %v3781_v38, %v3781_v38  ;;  %v3622_v13 = vrot.slane %v5727_v37, 7  ;;  %v3247_v47 = vsel %vm3217_vm15, %v3244_v7, %v3246_v42  ;;  %v3398_v55 = vrot.slane %v3357_v8, 1  ;;  %vm6476_vm12 = vmmov %vm6473_vm5 }
 0x22c   : > { %v2799_v44 = vpop.f32.mrf.mxu2  ;;  %v3727_v28 = vsel %vm3713_vm3, %v3709_v0, %v3554_v62  ;;  %v5756_v15 = vadd.f32 %v3247_v47, %v3194_v24  ;;  %v3204_v51 = vadd.f32 %v3118_v5, %v5693_v18  ;;  %v3134_v10 = vrot.slane %v3009_v23, 1  ;;  %vm6477_vm4 = vmmov %vm6467_vm0 }
 0x22d   : > { %3798 = vst.msk [vmem:[%s5721_s10] sm:$0xf] %vm3797_vm10, %v3789_v6  ;;  %v2800_v4 = vadd.f32 %v5540_v2, %v2799_v44  ;;  %v3461_v49 = vrot.slane %v3347_v41, 3  ;;  %v3665_v12 = vsel %vm2736_vm14, %v3648_v19, %v3427_v34  ;;  %v3272_v59 = vsel %vm3217_vm15, %v3269_v63, %v3271_v60 }
 0x22e   : > { %v3432_v58 = vrot.slane %v3357_v8, 2  ;;  %v3136_v7 = vsel %vm6469_vm8, %v3134_v10, %v3135_v16  ;;  %v2777_v44 = vadd.f32 %v5540_v2, %v2776_v36  ;;  %v3653_v43 = vsel %vm6470_vm11, %v3357_v8, %v3398_v55  ;;  %vm6478_vm8 = vmmov %vm6467_vm0 }
 0x22f   : > { %v2775_v18 = vadd.f32 %v5540_v2, %v2774_v57  ;;  %v2849_v3 = vmax.f32 %v2800_v4, 0.0  ;;  %v3512_v56 = vrot.slane %v5756_v15, 4  ;;  %v3683_v46 = vsel %vm3677_vm6, %v3665_v12, %v3461_v49  ;;  %vm6479_vm11 = vmmov %vm6473_vm5 }
 0x230   : > { %v5771_v6 = vadd.f32 %v3272_v59, %v3204_v51  ;;  %v3289_v37 = vrot.slane %v5741_v32, 2  ;;  %v3288_v29 = vrot.slane %v3009_v23, 2  ;;  %v3211_v45 = vadd.f32 %v3136_v7, %v3009_v23 }
 0x231   : > { %v3670_v33 = vsel %vm2736_vm14, %v3653_v43, %v3432_v58  ;;  %v3026_v57 = vsel %vm6471_vm9, %v2937_v48, 0.0  ;;  %v2840_v63 = vmax.f32 %v2777_v44, 0.0  ;;  %v3701_v21 = vsel %vm3695_vm1, %v3683_v46, %v3512_v56  ;;  %vm6480_vm9 = vmmov %vm6467_vm0 }
 0x232   : > { %v3466_v26 = vrot.slane %v3357_v8, 3  ;;  %v2927_v52 = vrot.slane %v2849_v3, 7  ;;  %v3744_v11 = vsel %vm3217_vm15, %v3727_v28, %v3588_v31  ;;  %v3546_v40 = vrot.slane %v5756_v15, 5 }
 0x233   : > { %v3290_v50 = vsel %vm3217_vm15, %v3288_v29, %v3289_v37  ;;  %v3137_v27 = vrot.slane %v3026_v57, 1  ;;  %v3517_v8 = vrot.slane %v5771_v6, 4  ;;  %v2913_v0 = vrot.slane %v2840_v63, 7 }
 0x234   : > { %v2801_v17 = vpop.f32.mrf.mxu2  ;;  %v3688_v1 = vsel %vm3677_vm6, %v3670_v33, %v3466_v26  ;;  %v3719_v42 = vsel %vm3713_vm3, %v3701_v21, %v3546_v40  ;;  %v5791_v34 = vsel %vm6473_vm5, %v3744_v11, %v3622_v13  ;;  %v3580_v5 = vrot.slane %v5756_v15, 6 }
 0x235   : > { %v2819_v30 = vpop.f32.mrf.mxu3  ;;  %v2802_v61 = vadd.f32 %v5540_v2, %v2801_v17  ;;  %v5783_v17 = vadd.f32 %v3290_v50, %v3211_v45  ;;  %v3006_v23 = vsel %vm6474_vm2, 0.0, %v2927_v52  ;;  %v3706_v62 = vsel %vm3695_vm1, %v3688_v1, %v3517_v8  ;;  %vm6482_vm2 = vmmov %vm6467_vm0 }
 0x236   : > { %v2820_v38 = vadd.f32 %v5540_v2, %v2819_v30  ;;  %v2839_v30 = vmax.f32 %v2775_v18, 0.0  ;;  %v3736_v47 = vsel %vm3217_vm15, %v3719_v42, %v3580_v5  ;;  %v3551_v55 = vrot.slane %v5771_v6, 5 }
 0x237   : > { %v2850_v54 = vmax.f32 %v2802_v61, 0.0  ;;  %v3614_v61 = vrot.slane %v5756_v15, 7  ;;  %v3138_v13 = vsel %vm6476_vm12, %v3135_v16, %v3137_v27  ;;  %v3402_v36 = vrot.slane %v5783_v17, 1  ;;  %vm6484_vm12 = vmmov %vm6467_vm0 }
 0x238   : > { %v2857_v9 = vmax.f32 %v2820_v38, 0.0  ;;  %v2912_v60 = vrot.slane %v2839_v30, 7  ;;  %v3291_v4 = vrot.slane %v3026_v57, 2  ;;  %v3119_v15 = vrot.slane %v3006_v23, 1 }
 0x239   : > { %v2928_v20 = vrot.slane %v2850_v54, 7  ;;  %v3724_v49 = vsel %vm3713_vm3, %v3706_v62, %v3551_v55  ;;  %v3619_v16 = vrot.slane %v5771_v6, 7  ;;  %v3212_v54 = vadd.f32 %v3138_v13, %v5741_v32 }
 0x23a   : > { %v2939_v24 = vrot.slane %v2857_v9, 7  ;;  %v5808_v28 = vsel %vm6467_vm0, %v2912_v60, %v2913_v0  ;;  %v3001_v12 = vsel %vm6478_vm8, 0.0, %v2912_v60  ;;  %v3436_v58 = vrot.slane %v5783_v17, 2 }
 0x23b   : > { %v5786_v48 = vsel %vm6472_vm13, %v2927_v52, %v2928_v20  ;;  %v3657_v44 = vsel %vm6480_vm9, %v5783_v17, %v3402_v36  ;;  %v3095_v38 = vrot.slane %v5808_v28, 1  ;;  %v3094_v56 = vrot.slane %v3001_v12, 1  ;;  %vm6481_vm13 = vmmov %vm6467_vm0 }
 0x23c   : > { %v3120_v31 = vrot.slane %v5786_v48, 1  ;;  %v3010_v51 = vsel %vm6477_vm4, 0.0, %v2939_v24  ;;  %v3274_v46 = vrot.slane %v5786_v48, 2  ;;  %v3470_v57 = vrot.slane %v5783_v17, 3  ;;  %vm6485_vm0 = vmmov %vm6473_vm5 }
 0x23d   : > { %v2821_v14 = vpop.f32.mrf.mxu3  ;;  %v3139_v43 = vrot.slane %v3010_v51, 1  ;;  %v3674_v63 = vsel %vm2736_vm14, %v3657_v44, %v3436_v58  ;;  %v3273_v9 = vrot.slane %v3006_v23, 2  ;;  %v3249_v30 = vrot.slane %v5808_v28, 2  ;;  %vm6486_vm4 = vmmov %vm6485_vm0 }
 0x23e   : > { %v2822_v35 = vadd.f32 %v5540_v2, %v2821_v14  ;;  %v3585_v14 = vrot.slane %v5771_v6, 6  ;;  %v3121_v7 = vsel %vm6479_vm11, %v3119_v15, %v3120_v31  ;;  %v3023_v6 = vsel %vm6481_vm13, %v2928_v20, 0.0  ;;  %vm6487_vm8 = vmmov %vm6485_vm0 }
 0x23f   : > { %v5774_v53 = vpop.f32.mrf.mxu0  ;;  %v3205_v29 = vadd.f32 %v3121_v7, %v3006_v23  ;;  %v3122_v52 = vrot.slane %v3023_v6, 1  ;;  %v3275_v11 = vsel %vm3217_vm15, %v3273_v9, %v3274_v46  ;;  %v3293_v50 = vrot.slane %v3010_v51, 2  ;;  %vm6488_vm11 = vmmov %vm6485_vm0 }
 0x240   : > { %v2858_v41 = vmax.f32 %v2822_v35, 0.0  ;;  %v3741_v3 = vsel %vm3217_vm15, %v3724_v49, %v3585_v14  ;;  %v3292_v35 = vsel %vm3217_vm15, %v3289_v37, %v3291_v4  ;;  %v3018_v37 = vsel %vm6482_vm2, %v2913_v0, 0.0  ;;  %vm6489_vm9 = vmmov %vm6482_vm2 }
 0x241   : > { %v5830_v33 = vadd.f32 %v3292_v35, %v3212_v54  ;;  %v3359_v40 = vadd.f32 %v3275_v11, %v3205_v29  ;;  %v5841_v17 = vsel %vm6485_vm0, %v3736_v47, %v3614_v61  ;;  %v5844_v42 = vsel %vm6486_vm4, %v3741_v3, %v3619_v16  ;;  %vm6490_vm13 = vmmov %vm6485_vm0 }
 0x242   : > { %v2940_v25 = vrot.slane %v2858_v41, 7  ;;  %v2760_v41 = vadd.f32 %v5540_v2, %v5774_v53  ;;  %v3248_v8 = vrot.slane %v3001_v12, 2  ;;  %v3097_v5 = vrot.slane %v3018_v37, 1  ;;  %vm6494_vm4 = vmmov %vm6482_vm2 }
 0x243   : > { %v3521_v62 = vrot.slane %v5830_v33, 4  ;;  %v3555_v55 = vrot.slane %v5830_v33, 5  ;;  %v3123_v47 = vsel %vm6487_vm8, %v3120_v31, %v3122_v52  ;;  %v3399_v36 = vrot.slane %v3359_v40, 1  ;;  %vm6495_vm8 = vmmov %vm6485_vm0 }
 0x244   : > { %v5799_v19 = vsel %vm6475_vm7, %v2939_v24, %v2940_v25  ;;  %vm6483_vm7 = vmmov %vm6473_vm5  ;;  %v3027_v1 = vsel %vm6484_vm12, %v2940_v25, 0.0  ;;  %v2833_v27 = vmax.f32 %v2760_v41, 0.0  ;;  %v3692_v24 = vsel %vm3677_vm6, %v3674_v63, %v3470_v57 }
 0x245   : > { %v3140_v59 = vrot.slane %v5799_v19, 1  ;;  %v3096_v21 = vsel %vm6483_vm7, %v3094_v56, %v3095_v38  ;;  %v3294_v26 = vrot.slane %v5799_v19, 2  ;;  %v3142_v25 = vrot.slane %v3027_v1, 1  ;;  %vm6492_vm7 = vmmov %vm6482_vm2 }
 0x246   : > { %v2779_v32 = vpop.f32.mrf.mxu1  ;;  %v3195_v0 = vadd.f32 %v3096_v21, %v3001_v12  ;;  %v3250_v61 = vsel %vm3217_vm15, %v3248_v8, %v3249_v30  ;;  %v2903_v4 = vrot.slane %v2833_v27, 7  ;;  %v3589_v15 = vrot.slane %v5830_v33, 6  ;;  %vm6493_vm12 = vmmov %vm6482_vm2 }
 0x247   : > { %v2761_v10 = vpop.f32.mrf.mxu0  ;;  %v3141_v45 = vsel %vm6473_vm5, %v3139_v43, %v3140_v59  ;;  %v3295_v60 = vsel %vm3217_vm15, %v3293_v50, %v3294_v26  ;;  %v3098_v12 = vsel %vm6488_vm11, %v3095_v38, %v3097_v5  ;;  %v3251_v16 = vrot.slane %v3018_v37, 2  ;;  %vm6491_vm5 = vmmov %vm6482_vm2 }
 0x248   : > { %v2762_v18 = vadd.f32 %v5540_v2, %v2761_v10  ;;  %v3213_v53 = vadd.f32 %v3141_v45, %v3010_v51  ;;  %v3623_v51 = vrot.slane %v5830_v33, 7  ;;  %v3710_v10 = vsel %vm3695_vm1, %v3692_v24, %v3521_v62  ;;  %vm6496_vm11 = vmmov %vm6482_vm2 }
 0x249   : > { %v3349_v14 = vadd.f32 %v3250_v61, %v3195_v0  ;;  %v3276_v54 = vrot.slane %v3023_v6, 2  ;;  %v3206_v7 = vadd.f32 %v3123_v47, %v5786_v48  ;;  %v3433_v31 = vrot.slane %v3359_v40, 2 }
 0x24a   : > { %v2834_v20 = vmax.f32 %v2762_v18, 0.0  ;;  %v3367_v13 = vadd.f32 %v3295_v60, %v3213_v53  ;;  %v3143_v44 = vsel %vm6490_vm13, %v3140_v59, %v3142_v25  ;;  %v3728_v18 = vsel %vm3713_vm3, %v3710_v10, %v3555_v55  ;;  %vm6498_vm13 = vmmov %vm6485_vm0 }
 0x24b   : > { %v3654_v3 = vsel %vm6491_vm5, %v3359_v40, %v3399_v36  ;;  %v2998_v35 = vsel %vm6482_vm2, 0.0, %v2903_v4  ;;  %v3196_v38 = vadd.f32 %v3098_v12, %v5808_v28  ;;  %v3394_v6 = vrot.slane %v3349_v14, 1  ;;  %vm6499_vm5 = vmmov %vm6482_vm2 }
 0x24c   : > { %v2904_v23 = vrot.slane %v2834_v20, 7  ;;  %v3403_v43 = vrot.slane %v3367_v13, 1  ;;  %v3296_v29 = vrot.slane %v3027_v1, 2  ;;  %v3277_v48 = vsel %vm3217_vm15, %v3274_v46, %v3276_v54 }
 0x24d   : > { %v3214_v41 = vadd.f32 %v3143_v44, %v5799_v19  ;;  %v3437_v59 = vrot.slane %v3367_v13, 2  ;;  %v2780_v33 = vadd.f32 %v5540_v2, %v2779_v32  ;;  %v5870_v57 = vadd.f32 %v3277_v48, %v3206_v7  ;;  %v5908_v44 = vld [vmem:[%s6080_s2] ss:$0 sm:$0xff] }
 0x24e   : > { %v2781_v49 = vpop.f32.mrf.mxu1  ;;  %v5857_v58 = vsel %vm6489_vm9, %v2903_v4, %v2904_v23  ;;  %v3671_v63 = vsel %vm2736_vm14, %v3654_v3, %v3433_v31  ;;  %v3658_v9 = vsel %vm6492_vm7, %v3367_v13, %v3403_v43  ;;  %v3079_v37 = vrot.slane %v2998_v35, 1  ;;  %vm6497_vm9 = vmmov %vm6482_vm2 }
 0x24f   : > { %v2782_v56 = vadd.f32 %v5540_v2, %v2781_v49  ;;  %v3080_v45 = vrot.slane %v5857_v58, 1  ;;  %v3252_v28 = vsel %vm3217_vm15, %v3249_v30, %v3251_v16  ;;  %v3428_v21 = vrot.slane %v3349_v14, 2  ;;  %vm6500_vm2 = vmmov %vm6485_vm0 }
 0x250   : > { %v3467_v20 = vrot.slane %v3359_v40, 3  ;;  %v5875_v11 = vadd.f32 %v3252_v28, %v3196_v38  ;;  %v3649_v46 = vsel %vm6493_vm12, %v3349_v14, %v3394_v6  ;;  %v3297_v19 = vsel %vm3217_vm15, %v3294_v26, %v3296_v29  ;;  %vm6501_vm7 = vmmov %vm6485_vm0 }
 0x251   : > { %v2842_v52 = vmax.f32 %v2782_v56, 0.0  ;;  %v3081_v2 = vsel %vm6485_vm0, %v3079_v37, %v3080_v45  ;;  %v5881_v53 = vadd.f32 %v3297_v19, %v3214_v41  ;;  %v3675_v50 = vsel %vm2736_vm14, %v3658_v9, %v3437_v59  ;;  %vm6502_vm12 = vmmov %vm6494_vm4 }
 0x252   : > { %v3689_v32 = vsel %vm3677_vm6, %v3671_v63, %v3467_v20  ;;  %v2841_v1 = vmax.f32 %v2780_v33, 0.0  ;;  %v3518_v30 = vrot.slane %v5870_v57, 4  ;;  %v3471_v27 = vrot.slane %v3367_v13, 3 }
 0x253   : > { %v3015_v40 = vsel %vm6494_vm4, %v2904_v23, 0.0  ;;  %v3234_v8 = vrot.slane %v5857_v58, 2  ;;  %v3745_v0 = vsel %vm3217_vm15, %v3728_v18, %v3589_v15  ;;  %v3666_v26 = vsel %vm2736_vm14, %v3649_v46, %v3428_v21  ;;  %vm6503_vm4 = vmmov %vm6485_vm0 }
 0x254   : > { %v3189_v24 = vadd.f32 %v3081_v2, %v2998_v35  ;;  %v2916_v5 = vrot.slane %v2842_v52, 7  ;;  %v3462_v60 = vrot.slane %v3349_v14, 3  ;;  %v3707_v62 = vsel %vm3695_vm1, %v3689_v32, %v3518_v30 }
 0x255   : > { %v3693_v55 = vsel %vm3677_vm6, %v3675_v50, %v3471_v27  ;;  %v3233_v25 = vrot.slane %v2998_v35, 2  ;;  %v3552_v61 = vrot.slane %v5870_v57, 5  ;;  %v3522_v13 = vrot.slane %v5881_v53, 4 }
 0x256   : > { %v2915_v47 = vrot.slane %v2841_v1, 7  ;;  %v3082_v23 = vrot.slane %v3015_v40, 1  ;;  %v5894_v36 = vsel %vm6495_vm8, %v3745_v0, %v3623_v51  ;;  %v3513_v4 = vrot.slane %v5875_v11, 4  ;;  %vm6504_vm8 = vmmov %vm6499_vm5 }
 0x257   : > { %v3684_v15 = vsel %vm3677_vm6, %v3666_v26, %v3462_v60  ;;  %v3235_v10 = vsel %vm3217_vm15, %v3233_v25, %v3234_v8  ;;  %v3725_v14 = vsel %vm3713_vm3, %v3707_v62, %v3552_v61  ;;  %v3711_v49 = vsel %vm3695_vm1, %v3693_v55, %v3522_v13 }
 0x258   : > { %v3343_v12 = vadd.f32 %v3235_v10, %v3189_v24  ;;  %v2917_v16 = vsel %vm6496_vm11, %v2915_v47, %v2916_v5  ;;  %v3547_v7 = vrot.slane %v5875_v11, 5  ;;  %v3586_v31 = vrot.slane %v5870_v57, 6  ;;  %vm6505_vm11 = vmmov %vm6499_vm5 }
 0x259   : > { %v3556_v51 = vrot.slane %v5881_v53, 5  ;;  %v3702_v18 = vsel %vm3695_vm1, %v3684_v15, %v3513_v4  ;;  %v3620_v3 = vrot.slane %v5870_v57, 7  ;;  %v3002_v35 = vsel %vm6497_vm9, 0.0, %v2915_v47  ;;  %vm6506_vm9 = vmmov %vm6499_vm5 }
 0x25a   : > { %v3083_v56 = vsel %vm6498_vm13, %v3080_v45, %v3082_v23  ;;  %v3742_v38 = vsel %vm3217_vm15, %v3725_v14, %v3586_v31  ;;  %v3019_v29 = vsel %vm6499_vm5, %v2916_v5, 0.0  ;;  %v3100_v48 = vrot.slane %v2917_v16, 1  ;;  %vm6507_vm13 = vmmov %vm6485_vm0 }
 0x25b   : > { %v3729_v6 = vsel %vm3713_vm3, %v3711_v49, %v3556_v51  ;;  %v3590_v41 = vrot.slane %v5881_v53, 6  ;;  %v3236_v59 = vrot.slane %v3015_v40, 2  ;;  %v3391_v33 = vrot.slane %v3343_v12, 1  ;;  %vm6508_vm5 = vmmov %vm6485_vm0 }
 0x25c   : > { %v3581_v9 = vrot.slane %v5875_v11, 6  ;;  %v3615_v57 = vrot.slane %v5875_v11, 7  ;;  %v3099_v37 = vrot.slane %v3002_v35, 1  ;;  %v3190_v28 = vadd.f32 %v3083_v56, %v5857_v58 }
 0x25d   : > { %v3720_v21 = vsel %vm3713_vm3, %v3702_v18, %v3547_v7  ;;  %v3759_v20 = vsel %vm6500_vm2, %v3742_v38, %v3620_v3  ;;  %v3746_v52 = vsel %vm3217_vm15, %v3729_v6, %v3590_v41  ;;  %v3102_v46 = vrot.slane %v3019_v29, 1  ;;  %vm6509_vm2 = vmmov %vm6504_vm8 }
 0x25e   : > { %v3624_v19 = vrot.slane %v5881_v53, 7  ;;  %v3425_v2 = vrot.slane %v3343_v12, 2  ;;  %v3101_v32 = vsel %vm6501_vm7, %v3099_v37, %v3100_v48  ;;  %v3237_v1 = vsel %vm3217_vm15, %v3234_v8, %v3236_v59  ;;  %vm6510_vm7 = vmmov %vm6509_vm2 }
 0x25f   : > { %v3646_v30 = vsel %vm6502_vm12, %v3343_v12, %v3391_v33  ;;  %v3254_v58 = vrot.slane %v2917_v16, 2  ;;  %v5931_v0 = vsel %vm3217_vm15, %v3720_v21, %v3581_v9  ;;  %v5934_v24 = vadd.f32 %v3237_v1, %v3190_v28  ;;  %vm6511_vm12 = vmmov %vm6509_vm2 }
 0x260   : > { %v3763_v26 = vsel %vm6485_vm0, %v3746_v52, %v3624_v19  ;;  %v3253_v5 = vrot.slane %v3002_v35, 2  ;;  %v3103_v60 = vsel %vm6503_vm4, %v3100_v48, %v3102_v46  ;;  %v3197_v62 = vadd.f32 %v3101_v32, %v3002_v35  ;;  %vm6512_vm4 = vmmov %vm6509_vm2 }
 0x261   : > { %v3256_v55 = vrot.slane %v3019_v29, 2  ;;  %v5939_v8 = vadd.f32 %v3759_v20, %v5844_v42  ;;  %v3663_v25 = vsel %vm2736_vm14, %v3646_v30, %v3425_v2  ;;  %v5943_v47 = vadd.f32 %v3763_v26, %v5894_v36 }
 0x262   : > { %v3459_v23 = vrot.slane %v3343_v12, 3  ;;  %v3255_v4 = vsel %vm3217_vm15, %v3253_v5, %v3254_v58  ;;  %v3510_v10 = vrot.slane %v5934_v24, 4  ;;  %v3544_v14 = vrot.slane %v5934_v24, 5 }
 0x263   : > { %v3198_v49 = vadd.f32 %v3103_v60, %v2917_v16  ;;  %v3257_v51 = vsel %vm3217_vm15, %v3254_v58, %v3256_v55  ;;  %v3578_v48 = vrot.slane %v5934_v24, 6 }
 0x264   : > { %v3681_v31 = vsel %vm3677_vm6, %v3663_v25, %v3459_v23 }
 0x265   : > { %v2804_v54 = vpop.f32.mrf.mxu2  ;;  %v5958_v41 = vsel %vm3695_vm1, %v3681_v31, %v3510_v10  ;;  %v5960_v59 = vadd.f32 %v3257_v51, %v3198_v49 }
 0x266   : > { %v2805_v43 = vadd.f32 %v5908_v44, %v2804_v54  ;;  %v2824_v45 = vpop.f32.mrf.mxu3 }
 0x267   : > { %v2825_v50 = vadd.f32 %v5908_v44, %v2824_v45  ;;  %v3514_v60 = vrot.slane %v5960_v59, 4 }
 0x268   : > { %v2851_v63 = vmax.f32 %v2805_v43, 0.0  ;;  %v5951_v43 = vadd.f32 %v3255_v4, %v3197_v62 }
 0x269   : > { %v2859_v61 = vmax.f32 %v2825_v50, 0.0 }
 0x26a   : > { %v2930_v27 = vrot.slane %v2851_v63, 7  ;;  %v3395_v63 = vrot.slane %v5951_v43, 1  ;;  %v3429_v46 = vrot.slane %v5951_v43, 2  ;;  %v3463_v19 = vrot.slane %v5951_v43, 3 }
 0x26b   : > { %v2942_v3 = vrot.slane %v2859_v61, 7 }
 0x26c   : > { %v3007_v15 = vsel %vm6504_vm8, 0.0, %v2930_v27  ;;  %vm6513_vm8 = vmmov %vm6485_vm0 }
 0x26d   : > { %v2806_v40 = vpop.f32.mrf.mxu2  ;;  %v3124_v12 = vrot.slane %v3007_v15, 1  ;;  %v3278_v9 = vrot.slane %v3007_v15, 2  ;;  %v3011_v45 = vsel %vm6509_vm2, 0.0, %v2942_v3 }
 0x26e   : > { %v2807_v53 = vadd.f32 %v5908_v44, %v2806_v40  ;;  %v2826_v7 = vpop.f32.mrf.mxu3 }
 0x26f   : > { %v2827_v18 = vadd.f32 %v5908_v44, %v2826_v7 }
 0x270   : > { %v2852_v13 = vmax.f32 %v2807_v53, 0.0 }
 0x271   : > { %v2860_v33 = vmax.f32 %v2827_v18, 0.0 }
 0x272   : > { %v2931_v54 = vrot.slane %v2852_v13, 7  ;;  %v3298_v13 = vrot.slane %v3011_v45, 2 }
 0x273   : > { %v2943_v52 = vrot.slane %v2860_v33, 7 }
 0x274   : > { %v2932_v35 = vsel %vm6505_vm11, %v2930_v27, %v2931_v54  ;;  %v3024_v56 = vsel %vm6506_vm9, %v2931_v54, 0.0  ;;  %v3144_v27 = vrot.slane %v3011_v45, 1  ;;  %vm6514_vm11 = vmmov %vm6509_vm2 }
 0x275   : > { %v3125_v38 = vrot.slane %v2932_v35, 1  ;;  %v3127_v6 = vrot.slane %v3024_v56, 1  ;;  %v3279_v29 = vrot.slane %v2932_v35, 2  ;;  %v3281_v16 = vrot.slane %v3024_v56, 2  ;;  %vm6515_vm9 = vmmov %vm6485_vm0 }
 0x276   : > { %v2944_v30 = vsel %vm6510_vm7, %v2942_v3, %v2943_v52  ;;  %v3028_v58 = vsel %vm6511_vm12, %v2943_v52, 0.0  ;;  %vm6519_vm7 = vmmov %vm6512_vm4 }
 0x277   : > { %v3126_v37 = vsel %vm6507_vm13, %v3124_v12, %v3125_v38  ;;  %v3128_v28 = vsel %vm6508_vm5, %v3125_v38, %v3127_v6  ;;  %v3280_v2 = vsel %vm3217_vm15, %v3278_v9, %v3279_v29  ;;  %v3282_v32 = vsel %vm3217_vm15, %v3279_v29, %v3281_v16  ;;  %vm6516_vm13 = vmmov %vm6509_vm2 }
 0x278   : > { %v3207_v21 = vadd.f32 %v3126_v37, %v3007_v15  ;;  %v3208_v20 = vadd.f32 %v3128_v28, %v2932_v35  ;;  %v3145_v40 = vrot.slane %v2944_v30, 1  ;;  %v3147_v26 = vrot.slane %v3028_v58, 1  ;;  %vm6517_vm5 = vmmov %vm6509_vm2 }
 0x279   : > { %v3299_v53 = vrot.slane %v2944_v30, 2  ;;  %v3301_v25 = vrot.slane %v3028_v58, 2  ;;  %vm6518_vm2 = vmmov %vm6485_vm0 }
 0x27a   : > { %v3361_v50 = vadd.f32 %v3280_v2, %v3207_v21  ;;  %v3362_v1 = vadd.f32 %v3282_v32, %v3208_v20  ;;  %v3146_v15 = vsel %vm6485_vm0, %v3144_v27, %v3145_v40  ;;  %v3148_v54 = vsel %vm6513_vm8, %v3145_v40, %v3147_v26  ;;  %vm6520_vm12 = vmmov %vm6512_vm4 }
 0x27b   : > { %v3215_v7 = vadd.f32 %v3146_v15, %v3011_v45  ;;  %v3216_v51 = vadd.f32 %v3148_v54, %v2944_v30  ;;  %v3300_v18 = vsel %vm3217_vm15, %v3298_v13, %v3299_v53  ;;  %v3302_v56 = vsel %vm3217_vm15, %v3299_v53, %v3301_v25  ;;  %vm6521_vm0 = vmmov %vm6512_vm4 }
 0x27c   : > { %v3400_v62 = vrot.slane %v3361_v50, 1  ;;  %v3434_v55 = vrot.slane %v3361_v50, 2  ;;  %v3468_v23 = vrot.slane %v3361_v50, 3  ;;  %v3519_v4 = vrot.slane %v3362_v1, 4  ;;  %vm6523_vm8 = vmmov %vm6521_vm0 }
 0x27d   : > { %v3553_v10 = vrot.slane %v3362_v1, 5  ;;  %v3587_v3 = vrot.slane %v3362_v1, 6  ;;  %v3369_v38 = vadd.f32 %v3300_v18, %v3215_v7  ;;  %v3370_v29 = vadd.f32 %v3302_v56, %v3216_v51 }
 0x27e   : > { %v2764_v5 = vpop.f32.mrf.mxu0  ;;  %v3655_v49 = vsel %vm6512_vm4, %v3361_v50, %v3400_v62  ;;  %v3621_v9 = vrot.slane %v3362_v1, 7  ;;  %v3650_v21 = vsel %vm6514_vm11, %v5951_v43, %v3395_v63  ;;  %vm6522_vm4 = vmmov %vm6521_vm0 }
 0x27f   : > { %v2784_v61 = vpop.f32.mrf.mxu1  ;;  %v3672_v31 = vsel %vm2736_vm14, %v3655_v49, %v3434_v55  ;;  %v2765_v12 = vadd.f32 %v5908_v44, %v2764_v5  ;;  %v3404_v28 = vrot.slane %v3369_v38, 1  ;;  %v3438_v45 = vrot.slane %v3369_v38, 2  ;;  %vm6524_vm11 = vmmov %vm6518_vm2 }
 0x280   : > { %v3690_v35 = vsel %vm3677_vm6, %v3672_v31, %v3468_v23  ;;  %v2785_v33 = vadd.f32 %v5908_v44, %v2784_v61  ;;  %v3472_v52 = vrot.slane %v3369_v38, 3  ;;  %v3523_v2 = vrot.slane %v3370_v29, 4 }
 0x281   : > { %v3708_v6 = vsel %vm3695_vm1, %v3690_v35, %v3519_v4  ;;  %v2835_v16 = vmax.f32 %v2765_v12, 0.0  ;;  %v3557_v30 = vrot.slane %v3370_v29, 5  ;;  %v3659_v58 = vsel %vm6516_vm13, %v3369_v38, %v3404_v28  ;;  %vm6526_vm13 = vmmov %vm6518_vm2 }
 0x282   : > { %v3726_v37 = vsel %vm3713_vm3, %v3708_v6, %v3553_v10  ;;  %v3676_v53 = vsel %vm2736_vm14, %v3659_v58, %v3438_v45  ;;  %v2843_v5 = vmax.f32 %v2785_v33, 0.0  ;;  %v3591_v63 = vrot.slane %v3370_v29, 6 }
 0x283   : > { %v3743_v20 = vsel %vm3217_vm15, %v3726_v37, %v3587_v3  ;;  %v2906_v27 = vrot.slane %v2835_v16, 7  ;;  %v3694_v62 = vsel %vm3677_vm6, %v3676_v53, %v3472_v52  ;;  %v3625_v23 = vrot.slane %v3370_v29, 7 }
 0x284   : > { %v3760_v50 = vsel %vm6515_vm9, %v3743_v20, %v3621_v9  ;;  %v3712_v4 = vsel %vm3695_vm1, %v3694_v62, %v3523_v2  ;;  %v2918_v15 = vrot.slane %v2843_v5, 7  ;;  %vm6525_vm9 = vmmov %vm6518_vm2 }
 0x285   : > { %v3771_v1 = vadd.f32 %v5791_v34, %v3760_v50  ;;  %v3778_v26 = vadd.f32 %v5939_v8, %v3760_v50  ;;  %v3730_v34 = vsel %vm3713_vm3, %v3712_v4, %v3557_v30  ;;  %v2999_v8 = vsel %vm6517_vm5, 0.0, %v2906_v27  ;;  %vm6527_vm5 = vmmov %vm6518_vm2 }
 0x286   : > { %v2766_v32 = vpop.f32.mrf.mxu0  ;;  %v3747_v7 = vsel %vm3217_vm15, %v3730_v34, %v3591_v63  ;;  %v3003_v51 = vsel %vm6519_vm7, 0.0, %v2918_v15  ;;  %v3084_v35 = vrot.slane %v2999_v8, 1  ;;  %v3238_v56 = vrot.slane %v2999_v8, 2  ;;  %vm6529_vm7 = vmmov %vm6527_vm5 }
 0x287   : > { %v2786_v40 = vpop.f32.mrf.mxu1  ;;  %v2767_v55 = vadd.f32 %v5908_v44, %v2766_v32  ;;  %v3779_v61 = vadd.f32 %v3771_v1, %v5894_v36  ;;  %v3786_v13 = vmul.f32 0.11111111, %v3778_v26  ;;  %v3667_v36 = vsel %vm2736_vm14, %v3650_v21, %v3429_v46 }
 0x288   : > { %v2787_v25 = vadd.f32 %v5908_v44, %v2786_v40  ;;  %v3764_v44 = vsel %vm6518_vm2, %v3747_v7, %v3625_v23  ;;  %v3104_v38 = vrot.slane %v3003_v51, 1  ;;  %v3685_v46 = vsel %vm3677_vm6, %v3667_v36, %v3463_v19  ;;  %vm6528_vm2 = vmmov %vm6521_vm0 }
 0x289   : > { %v2836_v10 = vmax.f32 %v2767_v55, 0.0  ;;  %v3787_v49 = vmul.f32 0.11111111, %v3779_v61  ;;  %v3794_v54 = vpack.c.bf16 %v3786_v13, %v3786_v13  ;;  %v3780_v3 = vadd.f32 %v5943_v47, %v3764_v44 }
 0x28a   : > { %v2844_v31 = vmax.f32 %v2787_v25, 0.0  ;;  %v3717_v19 = vsel %vm3713_vm3, %v5958_v41, %v3544_v14  ;;  %v3703_v32 = vsel %vm3695_vm1, %v3685_v46, %v3514_v60  ;;  %v3548_v14 = vrot.slane %v5960_v59, 5 }
 0x28b   : > { %v2907_v18 = vrot.slane %v2836_v10, 7  ;;  %v3795_v12 = vpack.c.bf16 %v3787_v49, %v3787_v49  ;;  %3803 = vst.msk [vmem:[%s5721_s10 + $0x14] sm:$0xf] %vm3797_vm10, %v3794_v54  ;;  %v3788_v33 = vmul.f32 0.11111111, %v3780_v3  ;;  %v3258_v41 = vrot.slane %v3003_v51, 2 }
 0x28c   : > { %v2919_v16 = vrot.slane %v2844_v31, 7  ;;  %v3612_v55 = vrot.slane %v5934_v24, 7  ;;  %v3734_v25 = vsel %vm3217_vm15, %v3717_v19, %v3578_v48  ;;  %v3582_v23 = vrot.slane %v5960_v59, 6 }
 0x28d   : > { %v2908_v6 = vsel %vm6520_vm12, %v2906_v27, %v2907_v18  ;;  %v3016_v29 = vsel %vm6521_vm0, %v2907_v18, 0.0  ;;  %3804 = vst.msk [vmem:[%s5721_s10 + $0x18] sm:$0xf] %vm3797_vm10, %v3795_v12  ;;  %v3796_v20 = vpack.c.bf16 %v3788_v33, %v3788_v33  ;;  %v3721_v4 = vsel %vm3713_vm3, %v3703_v32, %v3548_v14  ;;  %vm6530_vm12 = vmmov %vm6521_vm0 }
 0x28e   : > { %v3085_v9 = vrot.slane %v2908_v6, 1  ;;  %v3087_v37 = vrot.slane %v3016_v29, 1  ;;  %v3239_v28 = vrot.slane %v2908_v6, 2  ;;  %v3241_v47 = vrot.slane %v3016_v29, 2  ;;  %vm6531_vm0 = vmmov %vm6527_vm5 }
 0x28f   : > { %v2920_v45 = vsel %vm6522_vm4, %v2918_v15, %v2919_v16  ;;  %v3020_v21 = vsel %vm6523_vm8, %v2919_v16, 0.0  ;;  %3805 = vst.msk [vmem:[%s5721_s10 + $0x1c] sm:$0xf] %vm3797_vm10, %v3796_v20  ;;  %v3751_v7 = vsel %vm6529_vm7, %v3734_v25, %v3612_v55  ;;  %v3616_v12 = vrot.slane %v5960_v59, 7  ;;  %vm6532_vm4 = vmmov %vm6531_vm0 }
 0x290   : > { %v3086_v52 = vsel %vm6524_vm11, %v3084_v35, %v3085_v9  ;;  %v3088_v2 = vsel %vm6525_vm9, %v3085_v9, %v3087_v37  ;;  %v3105_v43 = vrot.slane %v2920_v45, 1  ;;  %v3240_v58 = vsel %vm3217_vm15, %v3238_v56, %v3239_v28  ;;  %vm6533_vm8 = vmmov %vm6531_vm0 }
 0x291   : > { %v3191_v50 = vadd.f32 %v3086_v52, %v2999_v8  ;;  %v3192_v30 = vadd.f32 %v3088_v2, %v2908_v6  ;;  %v3107_v40 = vrot.slane %v3020_v21, 1  ;;  %v3259_v1 = vrot.slane %v2920_v45, 2 }
 0x292   : > { %v3106_v27 = vsel %vm6526_vm13, %v3104_v38, %v3105_v43  ;;  %v3242_v26 = vsel %vm3217_vm15, %v3239_v28, %v3241_v47  ;;  %v3261_v63 = vrot.slane %v3020_v21, 2  ;;  %v3738_v3 = vsel %vm3217_vm15, %v3721_v4, %v3582_v23 }
 0x293   : > { %v3345_v53 = vadd.f32 %v3240_v58, %v3191_v50  ;;  %v3199_v5 = vadd.f32 %v3106_v27, %v3003_v51  ;;  %v3346_v62 = vadd.f32 %v3242_v26, %v3192_v30  ;;  %v3108_v60 = vsel %vm6527_vm5, %v3105_v43, %v3107_v40 }
 0x294   : > { %v3200_v34 = vadd.f32 %v3108_v60, %v2920_v45  ;;  %v3260_v8 = vsel %vm3217_vm15, %v3258_v41, %v3259_v1  ;;  %v3262_v49 = vsel %vm3217_vm15, %v3259_v1, %v3261_v63  ;;  %v3766_v46 = vadd.f32 %v3751_v7, %v5705_v22 }
 0x295   : > { %v3392_v61 = vrot.slane %v3345_v53, 1  ;;  %v3426_v13 = vrot.slane %v3345_v53, 2  ;;  %v3460_v15 = vrot.slane %v3345_v53, 3  ;;  %v3353_v54 = vadd.f32 %v3260_v8, %v3199_v5 }
 0x296   : > { %v3511_v24 = vrot.slane %v3346_v62, 4  ;;  %v3354_v31 = vadd.f32 %v3262_v49, %v3200_v34  ;;  %v3545_v36 = vrot.slane %v3346_v62, 5  ;;  %v3579_v35 = vrot.slane %v3346_v62, 6 }
 0x297   : > { %v3647_v10 = vsel %vm6528_vm2, %v3345_v53, %v3392_v61  ;;  %v3396_v51 = vrot.slane %v3353_v54, 1  ;;  %v3430_v18 = vrot.slane %v3353_v54, 2  ;;  %v3613_v38 = vrot.slane %v3346_v62, 7 }
 0x298   : > { %v3664_v48 = vsel %vm2736_vm14, %v3647_v10, %v3426_v13  ;;  %v3464_v29 = vrot.slane %v3353_v54, 3  ;;  %v3515_v9 = vrot.slane %v3354_v31, 4  ;;  %v3755_v59 = vsel %vm6531_vm0, %v3738_v3, %v3616_v12 }
 0x299   : > { %v3682_v44 = vsel %vm3677_vm6, %v3664_v48, %v3460_v15  ;;  %v3651_v16 = vsel %vm6530_vm12, %v3353_v54, %v3396_v51  ;;  %v3549_v47 = vrot.slane %v3354_v31, 5  ;;  %v3583_v52 = vrot.slane %v3354_v31, 6 }
 0x29a   : > { %v3700_v56 = vsel %vm3695_vm1, %v3682_v44, %v3511_v24  ;;  %v3668_v37 = vsel %vm2736_vm14, %v3651_v16, %v3430_v18  ;;  %v3754_v22 = vsel %vm6533_vm8, %v5931_v0, %v3615_v57  ;;  %v3617_v43 = vrot.slane %v3354_v31, 7  ;;  %vm6534_vm14 = vmmov %vm6531_vm0 }
 0x29b   : > { %v3718_v6 = vsel %vm3713_vm3, %v3700_v56, %v3545_v36  ;;  %v3686_v45 = vsel %vm3677_vm6, %v3668_v37, %v3464_v29  ;;  %v3768_v32 = vadd.f32 %v3755_v59, %v3754_v22 }
 0x29c   : > { %v3735_v33 = vsel %vm3217_vm15, %v3718_v6, %v3579_v35  ;;  %v3704_v2 = vsel %vm3695_vm1, %v3686_v45, %v3515_v9 }
 0x29d   : > { %v3752_v28 = vsel %vm6532_vm4, %v3735_v33, %v3613_v38  ;;  %v3722_v19 = vsel %vm3713_vm3, %v3704_v2, %v3549_v47 }
 0x29e   : > { %v3767_v21 = vadd.f32 %v5841_v17, %v3752_v28  ;;  %v3774_v20 = vadd.f32 %v3766_v46, %v3752_v28  ;;  %v3739_v17 = vsel %vm3217_vm15, %v3722_v19, %v3583_v52 }
 0x29f   : > { %v3756_v58 = vsel %vm6534_vm14, %v3739_v17, %v3617_v43 }
 0x2a0   : > { %v3775_v50 = vadd.f32 %v3767_v21, %v3754_v22  ;;  %v3782_v30 = vmul.f32 0.11111111, %v3774_v20  ;;  %v3769_v11 = vadd.f32 %v5572_v39, %v3756_v58  ;;  %v3776_v1 = vadd.f32 %v3768_v32, %v3756_v58 }
 0x2a2   : > { %v3783_v27 = vmul.f32 0.11111111, %v3775_v50  ;;  %v3790_v40 = vpack.c.bf16 %v3782_v30, %v3782_v30  ;;  %v3777_v57 = vadd.f32 %v3769_v11, %v5844_v42  ;;  %v3784_v0 = vmul.f32 0.11111111, %v3776_v1 }
 0x2a4   : > { %v3791_v26 = vpack.c.bf16 %v3783_v27, %v3783_v27  ;;  %3799 = vst.msk [vmem:[%s5721_s10 + $0x4] sm:$0xf] %vm3797_vm10, %v3790_v40  ;;  %v3785_v53 = vmul.f32 0.11111111, %v3777_v57  ;;  %v3792_v5 = vpack.c.bf16 %v3784_v0, %v3784_v0 }
 0x2a6   : > { %3800 = vst.msk [vmem:[%s5721_s10 + $0x8] sm:$0xf] %vm3797_vm10, %v3791_v26  ;;  %v3793_v63 = vpack.c.bf16 %v3785_v53, %v3785_v53 }
 0x2a7   : > { %3801 = vst.msk [vmem:[%s5721_s10 + $0xc] sm:$0xf] %vm3797_vm10, %v3792_v5 }
 0x2a8   : > { %3802 = vst.msk [vmem:[%s5721_s10 + $0x10] sm:$0xf] %vm3797_vm10, %v3793_v63 }
 0x2a9 PF: > { %s13_s12 = sadd.s32 1, %s4048_s12  }
 0x2aa   : > { %p10_p4 = scmp.ge.s32.totalorder %s13_s12, 4  }
 0x2ac   :  { %12 = sbr.rel (!%p10_p4) target bundleno = 1 (0x1), region = 62 }

</bundles_post_ra>
